<compile_context>
chip_gen: v5e
topology: v5e:2x2
jax: 0.10.0
libtpu: 0.0.40
codegen_flags: <defaults>
</compile_context>

<pallas_src>
import functools
import math

import jax
import jax.numpy as jnp
from jax.experimental import pallas as pl
from jax.experimental.pallas import tpu as pltpu


# ---------------------------------------------------------------------------
# Pallas kernels
# ---------------------------------------------------------------------------
def _matmul_bias_act_kernel(x_ref, w_ref, b_ref, o_ref, *, slope):
    """One (TM, K) x (K, Cout) tile: y = x @ w + b, optionally LeakyReLU(slope).

    x/w are bf16; accumulation and epilogue are f32.
    """
    y = jnp.dot(x_ref[...], w_ref[...], preferred_element_type=jnp.float32)
    y = y + b_ref[...]
    if slope is not None:
        y = jnp.where(y >= 0, y, slope * y)
    o_ref[...] = y


def _inorm_lrelu_kernel(x_ref, o_ref, *, eps, slope):
    """InstanceNorm2d (affine=False, biased var) fused with LeakyReLU.

    Block is (1, H*W, Cb): the full spatial reduction happens inside one block.
    """
    x = x_ref[...]
    mean = jnp.mean(x, axis=1, keepdims=True)
    var = jnp.mean(jnp.square(x - mean), axis=1, keepdims=True)
    y = (x - mean) * jax.lax.rsqrt(var + eps)
    o_ref[...] = jnp.where(y >= 0, y, slope * y)


# ---------------------------------------------------------------------------
# Pallas wrappers
# ---------------------------------------------------------------------------
_VMEM_LIMIT = 32 * 1024 * 1024  # safe scoped-VMEM budget on v5e/v6e/v7x


def _pick_tm(M, K, Cout, budget_bytes=16 * 2 ** 20):
    """Pick an M-tile: double-buffered bf16 inputs + f32 outputs under `budget_bytes`."""
    per_row = 2 * (K * 2 + Cout * 4)          # 2 buffers x (bf16 in row + f32 out row)
    tm = budget_bytes // max(per_row, 1)
    tm = max(16, min(1024, (tm // 16) * 16))  # multiple of 16 (bf16 sublane packing)
    m_pad8 = -(-M // 8) * 8
    if m_pad8 <= tm:
        return m_pad8                         # single full-extent tile
    return tm


def matmul_bias_act(patches, wm, b, slope=None):
    """(M, K) @ (K, Cout) + b [+ LeakyReLU], tiled over M, bf16 MXU / f32 accumulate."""
    M, K = patches.shape
    Cout = wm.shape[1]
    tm = _pick_tm(M, K, Cout)
    Mp = -(-M // tm) * tm

    x = patches.astype(jnp.bfloat16)
    if Mp != M:
        x = jnp.pad(x, ((0, Mp - M), (0, 0)))
    w_b16 = wm.astype(jnp.bfloat16)
    bias = b.astype(jnp.float32).reshape(1, Cout)

    cost = pl.CostEstimate(
        flops=2 * Mp * K * Cout,
        transcendentals=0,
        bytes_accessed=Mp * K * 2 + K * Cout * 2 + Cout * 4 + Mp * Cout * 4,
    )
    out = pl.pallas_call(
        functools.partial(_matmul_bias_act_kernel, slope=slope),
        out_shape=jax.ShapeDtypeStruct((Mp, Cout), jnp.float32),
        grid=(Mp // tm,),
        in_specs=[
            pl.BlockSpec((tm, K), lambda i: (i, 0)),
            pl.BlockSpec((K, Cout), lambda i: (0, 0)),
            pl.BlockSpec((1, Cout), lambda i: (0, 0)),
        ],
        out_specs=pl.BlockSpec((tm, Cout), lambda i: (i, 0)),
        compiler_params=pltpu.CompilerParams(
            dimension_semantics=("parallel",),
            vmem_limit_bytes=_VMEM_LIMIT,
        ),
        cost_estimate=cost,
    )(x, w_b16, bias)
    return out[:M] if Mp != M else out


def instance_norm_lrelu(x_nhwc, eps=1e-5, slope=0.2):
    """Per-(sample, channel-block) tiled InstanceNorm + LeakyReLU, lane-dense C blocks."""
    N, H, W, C = x_nhwc.shape
    HW = H * W
    cb = 128 if C % 128 == 0 else C
    x3 = x_nhwc.reshape(N, HW, C)
    y3 = pl.pallas_call(
        functools.partial(_inorm_lrelu_kernel, eps=eps, slope=slope),
        out_shape=jax.ShapeDtypeStruct((N, HW, C), jnp.float32),
        grid=(N, C // cb),
        in_specs=[pl.BlockSpec((1, HW, cb), lambda n, c: (n, 0, c))],
        out_specs=pl.BlockSpec((1, HW, cb), lambda n, c: (n, 0, c)),
        compiler_params=pltpu.CompilerParams(
            dimension_semantics=("parallel", "parallel"),
            vmem_limit_bytes=_VMEM_LIMIT,
        ),
    )(x3)
    return y3.reshape(N, H, W, C)


# ---------------------------------------------------------------------------
# Glue: im2col + conv wrapper (matmul happens in the Pallas kernel above)
# ---------------------------------------------------------------------------
def extract_patches(x, k, stride, pad):
    """x: (N, H, W, C) -> (N*Ho*Wo, k*k*C) patches, (kh, kw, cin) ordering."""
    N, H, W, C = x.shape
    xp = jnp.pad(x, ((0, 0), (pad, pad), (pad, pad), (0, 0)))
    Ho = (H + 2 * pad - k) // stride + 1
    Wo = (W + 2 * pad - k) // stride + 1
    cols = []
    for kh in range(k):
        for kw in range(k):
            cols.append(
                xp[:, kh:kh + stride * Ho:stride, kw:kw + stride * Wo:stride, :]
            )
    patches = jnp.stack(cols, axis=3)                 # (N, Ho, Wo, k*k, C)
    return patches.reshape(N * Ho * Wo, k * k * C), Ho, Wo


def conv2d_pallas(x, wm, b, k, stride, pad, slope=None):
    """x: (N,H,W,C); wm: (k*k*Cin, Cout) matmul layout; returns (N,Ho,Wo,Cout)."""
    N = x.shape[0]
    patches, Ho, Wo = extract_patches(x, k, stride, pad)
    y = matmul_bias_act(patches, wm, b, slope=slope)
    return y.reshape(N, Ho, Wo, wm.shape[1])


def mean_patches(x, k, stride, pad):
    """Per-sample column-mean of im2col patches without materializing them.

    Returns (N, k*k*C) in (kh, kw, cin) ordering -- used to fold the Cout=1
    conv4 + global average pool into a tiny dot.
    """
    N, H, W, C = x.shape
    xp = jnp.pad(x, ((0, 0), (pad, pad), (pad, pad), (0, 0)))
    Ho = (H + 2 * pad - k) // stride + 1
    Wo = (W + 2 * pad - k) // stride + 1
    cols = []
    for kh in range(k):
        for kw in range(k):
            win = xp[:, kh:kh + stride * Ho:stride, kw:kw + stride * Wo:stride, :]
            cols.append(jnp.mean(win, axis=(1, 2)))   # (N, C)
    return jnp.concatenate(cols, axis=1)              # (N, k*k*C)


# ---------------------------------------------------------------------------
# Parameter setup (deterministic) + spectral norm (power iteration)
# ---------------------------------------------------------------------------
def spectral_normalize(w, key, n_iter=30):
    # TODO(synk): PyTorch spectral_norm does 1 power iteration per forward with a
    # persistent u; here we converge sigma once at init (numerically close).
    cout = w.shape[0]
    wmat = w.reshape(cout, -1)
    u = jax.random.normal(key, (cout,), dtype=jnp.float32)
    u = u / (jnp.linalg.norm(u) + 1e-12)
    v = None
    for _ in range(n_iter):
        v = wmat.T @ u
        v = v / (jnp.linalg.norm(v) + 1e-12)
        u = wmat @ v
        u = u / (jnp.linalg.norm(u) + 1e-12)
    sigma = u @ (wmat @ v)
    return w / sigma


def init_params(key, input_nc):
    def conv_init(k, cout, cin, ksz):
        kw_key, kb_key, ksn_key = jax.random.split(k, 3)
        fan_in = cin * ksz * ksz
        bound = 1.0 / math.sqrt(fan_in)
        w = jax.random.uniform(kw_key, (cout, cin, ksz, ksz), jnp.float32,
                               -bound, bound)
        b = jax.random.uniform(kb_key, (cout,), jnp.float32, -bound, bound)
        w = spectral_normalize(w, ksn_key)
        # Hoist matmul-layout reshape out of the forward: (Cout,Cin,KH,KW) -> (KH*KW*Cin, Cout)
        wm = jnp.transpose(w, (2, 3, 1, 0)).reshape(ksz * ksz * cin, cout)
        return wm, b

    keys = jax.random.split(key, 4)
    wm1, b1 = conv_init(keys[0], 64, input_nc, 4)
    wm2, b2 = conv_init(keys[1], 128, 64, 4)
    wm3, b3 = conv_init(keys[2], 256, 128, 4)
    wm4, b4 = conv_init(keys[3], 1, 256, 4)
    return dict(wm1=wm1, b1=b1, wm2=wm2, b2=b2, wm3=wm3, b3=b3, wm4=wm4, b4=b4)


# ---------------------------------------------------------------------------
# Forward pass
# ---------------------------------------------------------------------------
def discriminator_forward(params, x_nchw):
    x = jnp.transpose(x_nchw, (0, 2, 3, 1)).astype(jnp.float32)   # NCHW -> NHWC
    # conv1 + LeakyReLU(0.2)  (activation fused into the matmul epilogue)
    # NOTE: Cout=64 output is below lane width 128 (masked stores); kept as-is to
    # avoid doubling conv2's matmul work with zero channels.
    x = conv2d_pallas(x, params["wm1"], params["b1"], k=4, stride=2, pad=1, slope=0.2)
    # Dropout(0.1): eval-mode identity
    # conv2 + InstanceNorm + LeakyReLU(0.2)
    x = conv2d_pallas(x, params["wm2"], params["b2"], k=4, stride=2, pad=1)
    x = instance_norm_lrelu(x)
    # Dropout(0.1): eval-mode identity
    # conv3 + InstanceNorm + LeakyReLU(0.2)
    x = conv2d_pallas(x, params["wm3"], params["b3"], k=4, stride=2, pad=1)
    x = instance_norm_lrelu(x)
    # conv4 (Cout=1, s1 p1) + global average pool, folded:
    #   mean_spatial(patches @ w4 + b4) == mean_spatial(patches) @ w4 + b4
    mp = mean_patches(x, k=4, stride=1, pad=1)                    # (N, 16*256)
    y = mp @ params["wm4"] + params["b4"]                         # (N, 1), tiny dot
    return y


if __name__ == "__main__":
    key = jax.random.PRNGKey(0)
    pkey, xkey = jax.random.split(key)

    input_nc = 4
    params = init_params(pkey, input_nc)
    x = jax.random.normal(xkey, (2, input_nc, 16, 16), dtype=jnp.float32)  # NCHW

    fwd = jax.jit(discriminator_forward)
    out = jax.block_until_ready(fwd(params, x))
    assert out.shape == (2, 1), out.shape
    print("KERNEL_OK")
</pallas_src>

<mosaic_0001>
module attributes {stable_mosaic.version = 11 : i64} {
  func.func @_matmul_bias_act_kernel(%arg0: i32, %arg1: memref<128x64xbf16, #tpu.memory_space<vmem>>, %arg2: memref<64x64xbf16, #tpu.memory_space<vmem>>, %arg3: memref<1x64xf32, #tpu.memory_space<vmem>>, %arg4: memref<128x64xf32, #tpu.memory_space<vmem>>) attributes {dimension_semantics = [#tpu.dimension_semantics<parallel>], iteration_bounds = array<i64: 1>, scalar_prefetch = 0 : i64, scratch_operands = 0 : i64, tpu.core_type = #tpu.core_type<tc>, window_params = [{transform_indices = @transform_0, window_bounds = array<i64: 128, 64>}, {pipeline_mode = #tpu.pipeline_mode<synchronous>, transform_indices = @transform_1, window_bounds = array<i64: 64, 64>}, {pipeline_mode = #tpu.pipeline_mode<synchronous>, transform_indices = @transform_2, window_bounds = array<i64: 1, 64>}, {transform_indices = @transform_3, window_bounds = array<i64: 128, 64>}]} {
    %c0 = arith.constant 0 : index
    %c0_0 = arith.constant 0 : index
    %0 = vector.load %arg1[%c0, %c0_0] : memref<128x64xbf16, #tpu.memory_space<vmem>>, vector<128x64xbf16>
    %c0_1 = arith.constant 0 : index
    %c0_2 = arith.constant 0 : index
    %1 = vector.load %arg2[%c0_1, %c0_2] : memref<64x64xbf16, #tpu.memory_space<vmem>>, vector<64x64xbf16>
    %cst = arith.constant dense<0.000000e+00> : vector<128x64xf32>
    %2 = tpu.matmul %0, %1, %cst {dimension_numbers = #tpu.dot_dimension_numbers<[1], [0], [0], [1], [0, 0, 1, 1], [], []>} : vector<128x64xbf16>, vector<64x64xbf16>, vector<128x64xf32> -> vector<128x64xf32>
    %c0_3 = arith.constant 0 : index
    %c0_4 = arith.constant 0 : index
    %3 = vector.load %arg3[%c0_3, %c0_4] : memref<1x64xf32, #tpu.memory_space<vmem>>, vector<1x64xf32>
    %4 = vector.broadcast %3 : vector<1x64xf32> to vector<128x64xf32>
    %5 = arith.addf %2, %4 : vector<128x64xf32>
    %cst_5 = arith.constant 0.000000e+00 : f32
    %6 = vector.broadcast %cst_5 : f32 to vector<128x64xf32>
    %7 = arith.cmpf oge, %5, %6 : vector<128x64xf32>
    %cst_6 = arith.constant 2.000000e-01 : f32
    %8 = vector.broadcast %cst_6 : f32 to vector<128x64xf32>
    %9 = arith.mulf %8, %5 : vector<128x64xf32>
    %10 = arith.select %7, %5, %9 : vector<128x64xi1>, vector<128x64xf32>
    %c0_7 = arith.constant 0 : index
    %c0_8 = arith.constant 0 : index
    %11 = vector.load %arg4[%c0_7, %c0_8] : memref<128x64xf32, #tpu.memory_space<vmem>>, vector<128x64xf32>
    tpu.vector_store %arg4[%c0_7, %c0_8], %10 {strides = array<i32>} : memref<128x64xf32, #tpu.memory_space<vmem>>, vector<128x64xf32>,
    return
  }
  func.func @transform_0(%arg0: i32) -> (i32, i32) {
    %c0_i32 = arith.constant 0 : i32
    %c0_i32_0 = arith.constant 0 : i32
    return %arg0, %c0_i32 : i32, i32
  }
  func.func @transform_1(%arg0: i32) -> (i32, i32) {
    %c0_i32 = arith.constant 0 : i32
    %c0_i32_0 = arith.constant 0 : i32
    %c0_i32_1 = arith.constant 0 : i32
    return %c0_i32, %c0_i32_0 : i32, i32
  }
  func.func @transform_2(%arg0: i32) -> (i32, i32) {
    %c0_i32 = arith.constant 0 : i32
    %c0_i32_0 = arith.constant 0 : i32
    %c0_i32_1 = arith.constant 0 : i32
    return %c0_i32, %c0_i32_0 : i32, i32
  }
  func.func @transform_3(%arg0: i32) -> (i32, i32) {
    %c0_i32 = arith.constant 0 : i32
    %c0_i32_0 = arith.constant 0 : i32
    return %arg0, %c0_i32 : i32, i32
  }
}

module attributes {stable_mosaic.version = 11 : i64} {
  func.func @_matmul_bias_act_kernel(%arg0: i32, %arg1: memref<32x1024xbf16, #tpu.memory_space<vmem>>, %arg2: memref<1024x128xbf16, #tpu.memory_space<vmem>>, %arg3: memref<1x128xf32, #tpu.memory_space<vmem>>, %arg4: memref<32x128xf32, #tpu.memory_space<vmem>>) attributes {dimension_semantics = [#tpu.dimension_semantics<parallel>], iteration_bounds = array<i64: 1>, scalar_prefetch = 0 : i64, scratch_operands = 0 : i64, tpu.core_type = #tpu.core_type<tc>, window_params = [{transform_indices = @transform_0, window_bounds = array<i64: 32, 1024>}, {pipeline_mode = #tpu.pipeline_mode<synchronous>, transform_indices = @transform_1, window_bounds = array<i64: 1024, 128>}, {pipeline_mode = #tpu.pipeline_mode<synchronous>, transform_indices = @transform_2, window_bounds = array<i64: 1, 128>}, {transform_indices = @transform_3, window_bounds = array<i64: 32, 128>}]} {
    %c0 = arith.constant 0 : index
    %c0_0 = arith.constant 0 : index
    %0 = vector.load %arg1[%c0, %c0_0] : memref<32x1024xbf16, #tpu.memory_space<vmem>>, vector<32x1024xbf16>
    %c0_1 = arith.constant 0 : index
    %c0_2 = arith.constant 0 : index
    %1 = vector.load %arg2[%c0_1, %c0_2] : memref<1024x128xbf16, #tpu.memory_space<vmem>>, vector<1024x128xbf16>
    %cst = arith.constant dense<0.000000e+00> : vector<32x128xf32>
    %2 = tpu.matmul %0, %1, %cst {dimension_numbers = #tpu.dot_dimension_numbers<[1], [0], [0], [1], [0, 0, 1, 1], [], []>} : vector<32x1024xbf16>, vector<1024x128xbf16>, vector<32x128xf32> -> vector<32x128xf32>
    %c0_3 = arith.constant 0 : index
    %c0_4 = arith.constant 0 : index
    %3 = vector.load %arg3[%c0_3, %c0_4] : memref<1x128xf32, #tpu.memory_space<vmem>>, vector<1x128xf32>
    %4 = vector.broadcast %3 : vector<1x128xf32> to vector<32x128xf32>
    %5 = arith.addf %2, %4 : vector<32x128xf32>
    %c0_5 = arith.constant 0 : index
    %c0_6 = arith.constant 0 : index
    %6 = vector.load %arg4[%c0_5, %c0_6] : memref<32x128xf32, #tpu.memory_space<vmem>>, vector<32x128xf32>
    tpu.vector_store %arg4[%c0_5, %c0_6], %5 {strides = array<i32>} : memref<32x128xf32, #tpu.memory_space<vmem>>, vector<32x128xf32>,
    return
  }
  func.func @transform_0(%arg0: i32) -> (i32, i32) {
    %c0_i32 = arith.constant 0 : i32
    %c0_i32_0 = arith.constant 0 : i32
    return %arg0, %c0_i32 : i32, i32
  }
  func.func @transform_1(%arg0: i32) -> (i32, i32) {
    %c0_i32 = arith.constant 0 : i32
    %c0_i32_0 = arith.constant 0 : i32
    %c0_i32_1 = arith.constant 0 : i32
    return %c0_i32, %c0_i32_0 : i32, i32
  }
  func.func @transform_2(%arg0: i32) -> (i32, i32) {
    %c0_i32 = arith.constant 0 : i32
    %c0_i32_0 = arith.constant 0 : i32
    %c0_i32_1 = arith.constant 0 : i32
    return %c0_i32, %c0_i32_0 : i32, i32
  }
  func.func @transform_3(%arg0: i32) -> (i32, i32) {
    %c0_i32 = arith.constant 0 : i32
    %c0_i32_0 = arith.constant 0 : i32
    return %arg0, %c0_i32 : i32, i32
  }
}

module attributes {stable_mosaic.version = 11 : i64} {
  func.func @_inorm_lrelu_kernel(%arg0: i32, %arg1: i32, %arg2: memref<1x16x128xf32, #tpu.memory_space<vmem>>, %arg3: memref<1x16x128xf32, #tpu.memory_space<vmem>>) attributes {dimension_semantics = [#tpu.dimension_semantics<parallel>, #tpu.dimension_semantics<parallel>], iteration_bounds = array<i64: 2, 1>, scalar_prefetch = 0 : i64, scratch_operands = 0 : i64, tpu.core_type = #tpu.core_type<tc>, window_params = [{transform_indices = @transform_0, window_bounds = array<i64: 1, 16, 128>}, {transform_indices = @transform_1, window_bounds = array<i64: 1, 16, 128>}]} {
    %c0 = arith.constant 0 : index
    %c0_0 = arith.constant 0 : index
    %c0_1 = arith.constant 0 : index
    %0 = vector.load %arg2[%c0, %c0_0, %c0_1] : memref<1x16x128xf32, #tpu.memory_space<vmem>>, vector<1x16x128xf32>
    %cst = arith.constant dense<0.000000e+00> : vector<1x128xf32>
    %1 = vector.multi_reduction <add>, %0, %cst [1] : vector<1x16x128xf32> to vector<1x128xf32>
    %2 = vector.shape_cast %1 : vector<1x128xf32> to vector<1x1x128xf32>
    %cst_2 = arith.constant 1.600000e+01 : f32
    %3 = vector.broadcast %cst_2 : f32 to vector<1x1x128xf32>
    %4 = arith.divf %2, %3 : vector<1x1x128xf32>
    %5 = vector.broadcast %4 : vector<1x1x128xf32> to vector<1x16x128xf32>
    %6 = arith.subf %0, %5 : vector<1x16x128xf32>
    %7 = arith.mulf %6, %6 : vector<1x16x128xf32>
    %cst_3 = arith.constant dense<0.000000e+00> : vector<1x128xf32>
    %8 = vector.multi_reduction <add>, %7, %cst_3 [1] : vector<1x16x128xf32> to vector<1x128xf32>
    %9 = vector.shape_cast %8 : vector<1x128xf32> to vector<1x1x128xf32>
    %cst_4 = arith.constant 1.600000e+01 : f32
    %10 = vector.broadcast %cst_4 : f32 to vector<1x1x128xf32>
    %11 = arith.divf %9, %10 : vector<1x1x128xf32>
    %12 = vector.broadcast %4 : vector<1x1x128xf32> to vector<1x16x128xf32>
    %13 = arith.subf %0, %12 : vector<1x16x128xf32>
    %cst_5 = arith.constant 9.99999974E-6 : f32
    %14 = vector.broadcast %cst_5 : f32 to vector<1x1x128xf32>
    %15 = arith.addf %11, %14 : vector<1x1x128xf32>
    %16 = math.rsqrt %15 : vector<1x1x128xf32>
    %17 = vector.broadcast %16 : vector<1x1x128xf32> to vector<1x16x128xf32>
    %18 = arith.mulf %13, %17 : vector<1x16x128xf32>
    %cst_6 = arith.constant 0.000000e+00 : f32
    %19 = vector.broadcast %cst_6 : f32 to vector<1x16x128xf32>
    %20 = arith.cmpf oge, %18, %19 : vector<1x16x128xf32>
    %cst_7 = arith.constant 2.000000e-01 : f32
    %21 = vector.broadcast %cst_7 : f32 to vector<1x16x128xf32>
    %22 = arith.mulf %21, %18 : vector<1x16x128xf32>
    %23 = arith.select %20, %18, %22 : vector<1x16x128xi1>, vector<1x16x128xf32>
    %c0_8 = arith.constant 0 : index
    %c0_9 = arith.constant 0 : index
    %c0_10 = arith.constant 0 : index
    %24 = vector.load %arg3[%c0_8, %c0_9, %c0_10] : memref<1x16x128xf32, #tpu.memory_space<vmem>>, vector<1x16x128xf32>
    tpu.vector_store %arg3[%c0_8, %c0_9, %c0_10], %23 {strides = array<i32>} : memref<1x16x128xf32, #tpu.memory_space<vmem>>, vector<1x16x128xf32>,
    return
  }
  func.func @transform_0(%arg0: i32, %arg1: i32) -> (i32, i32, i32) {
    %c0_i32 = arith.constant 0 : i32
    %c0_i32_0 = arith.constant 0 : i32
    return %arg0, %c0_i32, %arg1 : i32, i32, i32
  }
  func.func @transform_1(%arg0: i32, %arg1: i32) -> (i32, i32, i32) {
    %c0_i32 = arith.constant 0 : i32
    %c0_i32_0 = arith.constant 0 : i32
    return %arg0, %c0_i32, %arg1 : i32, i32, i32
  }
}

module attributes {stable_mosaic.version = 11 : i64} {
  func.func @_matmul_bias_act_kernel(%arg0: i32, %arg1: memref<8x2048xbf16, #tpu.memory_space<vmem>>, %arg2: memref<2048x256xbf16, #tpu.memory_space<vmem>>, %arg3: memref<1x256xf32, #tpu.memory_space<vmem>>, %arg4: memref<8x256xf32, #tpu.memory_space<vmem>>) attributes {dimension_semantics = [#tpu.dimension_semantics<parallel>], iteration_bounds = array<i64: 1>, scalar_prefetch = 0 : i64, scratch_operands = 0 : i64, tpu.core_type = #tpu.core_type<tc>, window_params = [{transform_indices = @transform_0, window_bounds = array<i64: 8, 2048>}, {pipeline_mode = #tpu.pipeline_mode<synchronous>, transform_indices = @transform_1, window_bounds = array<i64: 2048, 256>}, {pipeline_mode = #tpu.pipeline_mode<synchronous>, transform_indices = @transform_2, window_bounds = array<i64: 1, 256>}, {transform_indices = @transform_3, window_bounds = array<i64: 8, 256>}]} {
    %c0 = arith.constant 0 : index
    %c0_0 = arith.constant 0 : index
    %0 = vector.load %arg1[%c0, %c0_0] : memref<8x2048xbf16, #tpu.memory_space<vmem>>, vector<8x2048xbf16>
    %c0_1 = arith.constant 0 : index
    %c0_2 = arith.constant 0 : index
    %1 = vector.load %arg2[%c0_1, %c0_2] : memref<2048x256xbf16, #tpu.memory_space<vmem>>, vector<2048x256xbf16>
    %cst = arith.constant dense<0.000000e+00> : vector<8x256xf32>
    %2 = tpu.matmul %0, %1, %cst {dimension_numbers = #tpu.dot_dimension_numbers<[1], [0], [0], [1], [0, 0, 1, 1], [], []>} : vector<8x2048xbf16>, vector<2048x256xbf16>, vector<8x256xf32> -> vector<8x256xf32>
    %c0_3 = arith.constant 0 : index
    %c0_4 = arith.constant 0 : index
    %3 = vector.load %arg3[%c0_3, %c0_4] : memref<1x256xf32, #tpu.memory_space<vmem>>, vector<1x256xf32>
    %4 = vector.broadcast %3 : vector<1x256xf32> to vector<8x256xf32>
    %5 = arith.addf %2, %4 : vector<8x256xf32>
    %c0_5 = arith.constant 0 : index
    %c0_6 = arith.constant 0 : index
    %6 = vector.load %arg4[%c0_5, %c0_6] : memref<8x256xf32, #tpu.memory_space<vmem>>, vector<8x256xf32>
    tpu.vector_store %arg4[%c0_5, %c0_6], %5 {strides = array<i32>} : memref<8x256xf32, #tpu.memory_space<vmem>>, vector<8x256xf32>,
    return
  }
  func.func @transform_0(%arg0: i32) -> (i32, i32) {
    %c0_i32 = arith.constant 0 : i32
    %c0_i32_0 = arith.constant 0 : i32
    return %arg0, %c0_i32 : i32, i32
  }
  func.func @transform_1(%arg0: i32) -> (i32, i32) {
    %c0_i32 = arith.constant 0 : i32
    %c0_i32_0 = arith.constant 0 : i32
    %c0_i32_1 = arith.constant 0 : i32
    return %c0_i32, %c0_i32_0 : i32, i32
  }
  func.func @transform_2(%arg0: i32) -> (i32, i32) {
    %c0_i32 = arith.constant 0 : i32
    %c0_i32_0 = arith.constant 0 : i32
    %c0_i32_1 = arith.constant 0 : i32
    return %c0_i32, %c0_i32_0 : i32, i32
  }
  func.func @transform_3(%arg0: i32) -> (i32, i32) {
    %c0_i32 = arith.constant 0 : i32
    %c0_i32_0 = arith.constant 0 : i32
    return %arg0, %c0_i32 : i32, i32
  }
}

module attributes {stable_mosaic.version = 11 : i64} {
  func.func @_inorm_lrelu_kernel(%arg0: i32, %arg1: i32, %arg2: memref<1x4x128xf32, #tpu.memory_space<vmem>>, %arg3: memref<1x4x128xf32, #tpu.memory_space<vmem>>) attributes {dimension_semantics = [#tpu.dimension_semantics<parallel>, #tpu.dimension_semantics<parallel>], iteration_bounds = array<i64: 2, 2>, scalar_prefetch = 0 : i64, scratch_operands = 0 : i64, tpu.core_type = #tpu.core_type<tc>, window_params = [{transform_indices = @transform_0, window_bounds = array<i64: 1, 4, 128>}, {transform_indices = @transform_1, window_bounds = array<i64: 1, 4, 128>}]} {
    %c0 = arith.constant 0 : index
    %c0_0 = arith.constant 0 : index
    %c0_1 = arith.constant 0 : index
    %0 = vector.load %arg2[%c0, %c0_0, %c0_1] : memref<1x4x128xf32, #tpu.memory_space<vmem>>, vector<1x4x128xf32>
    %cst = arith.constant dense<0.000000e+00> : vector<1x128xf32>
    %1 = vector.multi_reduction <add>, %0, %cst [1] : vector<1x4x128xf32> to vector<1x128xf32>
    %2 = vector.shape_cast %1 : vector<1x128xf32> to vector<1x1x128xf32>
    %cst_2 = arith.constant 4.000000e+00 : f32
    %3 = vector.broadcast %cst_2 : f32 to vector<1x1x128xf32>
    %4 = arith.divf %2, %3 : vector<1x1x128xf32>
    %5 = vector.broadcast %4 : vector<1x1x128xf32> to vector<1x4x128xf32>
    %6 = arith.subf %0, %5 : vector<1x4x128xf32>
    %7 = arith.mulf %6, %6 : vector<1x4x128xf32>
    %cst_3 = arith.constant dense<0.000000e+00> : vector<1x128xf32>
    %8 = vector.multi_reduction <add>, %7, %cst_3 [1] : vector<1x4x128xf32> to vector<1x128xf32>
    %9 = vector.shape_cast %8 : vector<1x128xf32> to vector<1x1x128xf32>
    %cst_4 = arith.constant 4.000000e+00 : f32
    %10 = vector.broadcast %cst_4 : f32 to vector<1x1x128xf32>
    %11 = arith.divf %9, %10 : vector<1x1x128xf32>
    %12 = vector.broadcast %4 : vector<1x1x128xf32> to vector<1x4x128xf32>
    %13 = arith.subf %0, %12 : vector<1x4x128xf32>
    %cst_5 = arith.constant 9.99999974E-6 : f32
    %14 = vector.broadcast %cst_5 : f32 to vector<1x1x128xf32>
    %15 = arith.addf %11, %14 : vector<1x1x128xf32>
    %16 = math.rsqrt %15 : vector<1x1x128xf32>
    %17 = vector.broadcast %16 : vector<1x1x128xf32> to vector<1x4x128xf32>
    %18 = arith.mulf %13, %17 : vector<1x4x128xf32>
    %cst_6 = arith.constant 0.000000e+00 : f32
    %19 = vector.broadcast %cst_6 : f32 to vector<1x4x128xf32>
    %20 = arith.cmpf oge, %18, %19 : vector<1x4x128xf32>
    %cst_7 = arith.constant 2.000000e-01 : f32
    %21 = vector.broadcast %cst_7 : f32 to vector<1x4x128xf32>
    %22 = arith.mulf %21, %18 : vector<1x4x128xf32>
    %23 = arith.select %20, %18, %22 : vector<1x4x128xi1>, vector<1x4x128xf32>
    %c0_8 = arith.constant 0 : index
    %c0_9 = arith.constant 0 : index
    %c0_10 = arith.constant 0 : index
    %24 = vector.load %arg3[%c0_8, %c0_9, %c0_10] : memref<1x4x128xf32, #tpu.memory_space<vmem>>, vector<1x4x128xf32>
    tpu.vector_store %arg3[%c0_8, %c0_9, %c0_10], %23 {strides = array<i32>} : memref<1x4x128xf32, #tpu.memory_space<vmem>>, vector<1x4x128xf32>,
    return
  }
  func.func @transform_0(%arg0: i32, %arg1: i32) -> (i32, i32, i32) {
    %c0_i32 = arith.constant 0 : i32
    %c0_i32_0 = arith.constant 0 : i32
    return %arg0, %c0_i32, %arg1 : i32, i32, i32
  }
  func.func @transform_1(%arg0: i32, %arg1: i32) -> (i32, i32, i32) {
    %c0_i32 = arith.constant 0 : i32
    %c0_i32_0 = arith.constant 0 : i32
    return %arg0, %c0_i32, %arg1 : i32, i32, i32
  }
}

</mosaic_0001>

<bundles_post_ra>
// kernel: discriminator_forward.5
= control target key start
LH: loop header
LB: loop body
LE: loop exit
PB: predicated region body
PF: predicated region fallthrough
CT: control target
= control target key end

     0   :  { %8 = vsyncpa [#allocation3], 0  ;;  %s372_s15 = smov [#allocation2]   ;;  %s522_s0 = inlined_call_operand.vmem [shape: bf16[128,64], index: 0, kind: input, shape index: {}]   ;;  %s523_s1 = inlined_call_operand.vmem [shape: bf16[64,64], index: 1, kind: input, shape index: {}]   ;;  %s524_s2 = inlined_call_operand.hbm [shape: f32[1,64], index: 2, kind: input, shape index: {}]   ;;  %s525_s3 = inlined_call_operand.vmem [shape: f32[128,64], index: 3, kind: output, shape index: {}]  }
   0x1   :  { %s18_s14 = sshll.u32 %s524_s2, 4  ;;  %s20_s16 = sshll.u32 %s372_s15, 4  ;;  %s19_s14 = int_to_ptr.hbm [resolvable:$true] %s18_s14  ;;  %s21_s16 = int_to_ptr.vmem [resolvable:$true] %s20_s16 }
   0x2   :  { %23 = dma.hbm_to_vmem [thread:$0]  %s19_s14, 16, %s21_s16, [#allocation3]  }
   0x3   :  { %370 = dma.done.wait [#allocation3], 16  }
   0x4   :  { %371 = vsyncadd [#allocation3], 4294967280  ;;  %v331_v0 = vld [vmem:[%s523_s1 + $0x18] sm:$0xff]  ;;  %v330_v1 = vld [vmem:[%s523_s1 + $0x10] sm:$0xff]  ;;  %vm121_vm0 = vcmask 523264  }
   0x5   :  { %150 = vmatpush.bf16.msra.mxu0 %v331_v0  ;;  %332 = vmatpush.bf16.msra.mxu1 %v331_v0  ;;  %v329_v2 = vld [vmem:[%s523_s1 + $0x8] sm:$0xff]  ;;  %v328_v3 = vld [vmem:[%s523_s1] sm:$0xff]  ;;  %v322_v5 = vld [vmem:[%s522_s0 + $0x10] sm:$0xff] }
   0x6   :  { %333 = vmatpush.bf16.msra.mxu2 %v331_v0  ;;  %334 = vmatpush.bf16.msra.mxu3 %v331_v0  ;;  %v320_v4 = vld [vmem:[%s522_s0] sm:$0xff]  ;;  %v326_v7 = vld [vmem:[%s522_s0 + $0x30] sm:$0xff]  ;;  %v321_v8 = vld [vmem:[%s522_s0 + $0x8] sm:$0xff] }
   0x7   :  { %v324_v6 = vld [vmem:[%s522_s0 + $0x20] sm:$0xff]  ;;  %v323_v9 = vld [vmem:[%s522_s0 + $0x18] sm:$0xff]  ;;  %v325_v10 = vld [vmem:[%s522_s0 + $0x28] sm:$0xff] }
   0x8   :  { %v327_v11 = vld [vmem:[%s522_s0 + $0x38] sm:$0xff]  ;;  %v440_v12 = vld [vmem:[#allocation2] ss:$0 sm:$0xff] }
   0x9   :  { %151 = vmatpush.bf16.msra.mxu0 %v330_v1  ;;  %335 = vmatpush.bf16.msra.mxu1 %v330_v1 }
   0xa   :  { %336 = vmatpush.bf16.msra.mxu2 %v330_v1  ;;  %337 = vmatpush.bf16.msra.mxu3 %v330_v1 }
   0xd   :  { %152 = vmatpush.bf16.msra.mxu0 %v329_v2  ;;  %338 = vmatpush.bf16.msra.mxu1 %v329_v2 }
   0xe   :  { %339 = vmatpush.bf16.msra.mxu2 %v329_v2  ;;  %340 = vmatpush.bf16.msra.mxu3 %v329_v2 }
  0x11   :  { %153 = vmatpush.bf16.msra.mxu0 %v328_v3  ;;  %341 = vmatpush.bf16.msra.mxu1 %v328_v3 }
  0x12   :  { %342 = vmatpush.bf16.msra.mxu2 %v328_v3  ;;  %343 = vmatpush.bf16.msra.mxu3 %v328_v3 }
  0x14   :  { %312 = vmatmul.msk.bf16.vlgmr.msra.gmra.mxu0 %vm121_vm0, %v320_v4  ;;  %314 = vmatmul.msk.bf16.vlgmr.msra.gmra.mxu1 %vm121_vm0, %v322_v5 }
  0x15   :  { %316 = vmatmul.msk.bf16.vlgmr.msra.gmra.mxu2 %vm121_vm0, %v324_v6  ;;  %318 = vmatmul.msk.bf16.vlgmr.msra.gmra.mxu3 %vm121_vm0, %v326_v7 }
  0x24   :  { %313 = vmatmul.msk.bf16.gmra.mxu0 %vm121_vm0, %v321_v8  ;;  %315 = vmatmul.msk.bf16.gmra.mxu1 %vm121_vm0, %v323_v9 }
  0x25   :  { %317 = vmatmul.msk.bf16.gmra.mxu2 %vm121_vm0, %v325_v10  ;;  %319 = vmatmul.msk.bf16.gmra.mxu3 %vm121_vm0, %v327_v11 }
  0x91   :  { %v155_v13 = vpop.f32.mrf.mxu0  ;;  %v165_v14 = vpop.f32.mrf.mxu1 }
  0x92   :  { %v156_v15 = vadd.f32 %v440_v12, %v155_v13  ;;  %v166_v16 = vadd.f32 %v440_v12, %v165_v14 }
  0x94   :  { %vm195_vm1 = vcmp.ge.f32.partialorder %v156_v15, 0.0  ;;  %v211_v17 = vmul.f32 0.2, %v156_v15  ;;  %vm199_vm2 = vcmp.ge.f32.partialorder %v166_v16, 0.0  ;;  %v215_v18 = vmul.f32 0.2, %v166_v16 }
  0x96   :  { %v227_v19 = vsel %vm195_vm1, %v156_v15, %v211_v17  ;;  %v231_v20 = vsel %vm199_vm2, %v166_v16, %v215_v18 }
  0x97   :  { %243 = vst.msk [vmem:[%s525_s3] sm:$0xff] %vm121_vm0, %v227_v19 }
  0x98   :  { %247 = vst.msk [vmem:[%s525_s3 + $0x20] sm:$0xff] %vm121_vm0, %v231_v20  ;;  %v175_v21 = vpop.f32.mrf.mxu2  ;;  %v185_v22 = vpop.f32.mrf.mxu3 }
  0x99   :  { %v176_v23 = vadd.f32 %v440_v12, %v175_v21  ;;  %v186_v24 = vadd.f32 %v440_v12, %v185_v22  ;;  %v157_v25 = vpop.f32.mrf.mxu0  ;;  %v167_v26 = vpop.f32.mrf.mxu1 }
  0x9a   :  { %v158_v27 = vadd.f32 %v440_v12, %v157_v25  ;;  %v168_v28 = vadd.f32 %v440_v12, %v167_v26 }
  0x9b   :  { %vm203_vm3 = vcmp.ge.f32.partialorder %v176_v23, 0.0  ;;  %v219_v29 = vmul.f32 0.2, %v176_v23  ;;  %vm207_vm4 = vcmp.ge.f32.partialorder %v186_v24, 0.0  ;;  %v223_v30 = vmul.f32 0.2, %v186_v24 }
  0x9c   :  { %vm196_vm5 = vcmp.ge.f32.partialorder %v158_v27, 0.0  ;;  %v212_v31 = vmul.f32 0.2, %v158_v27  ;;  %vm200_vm6 = vcmp.ge.f32.partialorder %v168_v28, 0.0  ;;  %v216_v32 = vmul.f32 0.2, %v168_v28 }
  0x9d   :  { %v235_v33 = vsel %vm203_vm3, %v176_v23, %v219_v29  ;;  %v239_v34 = vsel %vm207_vm4, %v186_v24, %v223_v30 }
  0x9e   :  { %251 = vst.msk [vmem:[%s525_s3 + $0x40] sm:$0xff] %vm121_vm0, %v235_v33  ;;  %v228_v35 = vsel %vm196_vm5, %v158_v27, %v212_v31  ;;  %v232_v36 = vsel %vm200_vm6, %v168_v28, %v216_v32 }
  0x9f   :  { %255 = vst.msk [vmem:[%s525_s3 + $0x60] sm:$0xff] %vm121_vm0, %v239_v34 }
  0xa0   :  { %244 = vst.msk [vmem:[%s525_s3 + $0x8] sm:$0xff] %vm121_vm0, %v228_v35  ;;  %v177_v37 = vpop.f32.mrf.mxu2  ;;  %v187_v38 = vpop.f32.mrf.mxu3 }
  0xa1   :  { %248 = vst.msk [vmem:[%s525_s3 + $0x28] sm:$0xff] %vm121_vm0, %v232_v36  ;;  %v178_v39 = vadd.f32 %v440_v12, %v177_v37  ;;  %v188_v40 = vadd.f32 %v440_v12, %v187_v38  ;;  %v160_v41 = vpop.f32.mrf.mxu0  ;;  %v170_v42 = vpop.f32.mrf.mxu1 }
  0xa2   :  { %v161_v43 = vadd.f32 %v440_v12, %v160_v41  ;;  %v171_v44 = vadd.f32 %v440_v12, %v170_v42 }
  0xa3   :  { %vm204_vm7 = vcmp.ge.f32.partialorder %v178_v39, 0.0  ;;  %v220_v45 = vmul.f32 0.2, %v178_v39  ;;  %vm208_vm8 = vcmp.ge.f32.partialorder %v188_v40, 0.0  ;;  %v224_v46 = vmul.f32 0.2, %v188_v40 }
  0xa4   :  { %vm197_vm9 = vcmp.ge.f32.partialorder %v161_v43, 0.0  ;;  %v213_v47 = vmul.f32 0.2, %v161_v43  ;;  %vm201_vm10 = vcmp.ge.f32.partialorder %v171_v44, 0.0  ;;  %v217_v48 = vmul.f32 0.2, %v171_v44 }
  0xa5   :  { %v236_v49 = vsel %vm204_vm7, %v178_v39, %v220_v45  ;;  %v240_v50 = vsel %vm208_vm8, %v188_v40, %v224_v46 }
  0xa6   :  { %252 = vst.msk [vmem:[%s525_s3 + $0x48] sm:$0xff] %vm121_vm0, %v236_v49  ;;  %v229_v51 = vsel %vm197_vm9, %v161_v43, %v213_v47  ;;  %v233_v52 = vsel %vm201_vm10, %v171_v44, %v217_v48 }
  0xa7   :  { %256 = vst.msk [vmem:[%s525_s3 + $0x68] sm:$0xff] %vm121_vm0, %v240_v50 }
  0xa8   :  { %245 = vst.msk [vmem:[%s525_s3 + $0x10] sm:$0xff] %vm121_vm0, %v229_v51  ;;  %v180_v53 = vpop.f32.mrf.mxu2  ;;  %v190_v54 = vpop.f32.mrf.mxu3 }
  0xa9   :  { %249 = vst.msk [vmem:[%s525_s3 + $0x30] sm:$0xff] %vm121_vm0, %v233_v52  ;;  %v181_v55 = vadd.f32 %v440_v12, %v180_v53  ;;  %v191_v56 = vadd.f32 %v440_v12, %v190_v54  ;;  %v162_v57 = vpop.f32.mrf.mxu0  ;;  %v172_v58 = vpop.f32.mrf.mxu1 }
  0xaa   :  { %v163_v59 = vadd.f32 %v440_v12, %v162_v57  ;;  %v173_v60 = vadd.f32 %v440_v12, %v172_v58 }
  0xab   :  { %vm205_vm11 = vcmp.ge.f32.partialorder %v181_v55, 0.0  ;;  %v221_v61 = vmul.f32 0.2, %v181_v55  ;;  %vm209_vm12 = vcmp.ge.f32.partialorder %v191_v56, 0.0  ;;  %v225_v62 = vmul.f32 0.2, %v191_v56 }
  0xac   :  { %vm198_vm13 = vcmp.ge.f32.partialorder %v163_v59, 0.0  ;;  %v214_v63 = vmul.f32 0.2, %v163_v59  ;;  %vm202_vm14 = vcmp.ge.f32.partialorder %v173_v60, 0.0  ;;  %v218_v0 = vmul.f32 0.2, %v173_v60 }
  0xad   :  { %v237_v1 = vsel %vm205_vm11, %v181_v55, %v221_v61  ;;  %v241_v2 = vsel %vm209_vm12, %v191_v56, %v225_v62 }
  0xae   :  { %253 = vst.msk [vmem:[%s525_s3 + $0x50] sm:$0xff] %vm121_vm0, %v237_v1  ;;  %v230_v3 = vsel %vm198_vm13, %v163_v59, %v214_v63  ;;  %v234_v4 = vsel %vm202_vm14, %v173_v60, %v218_v0 }
  0xaf   :  { %257 = vst.msk [vmem:[%s525_s3 + $0x70] sm:$0xff] %vm121_vm0, %v241_v2 }
  0xb0   :  { %246 = vst.msk [vmem:[%s525_s3 + $0x18] sm:$0xff] %vm121_vm0, %v230_v3  ;;  %v182_v5 = vpop.f32.mrf.mxu2  ;;  %v192_v6 = vpop.f32.mrf.mxu3 }
  0xb1   :  { %250 = vst.msk [vmem:[%s525_s3 + $0x38] sm:$0xff] %vm121_vm0, %v234_v4  ;;  %v183_v7 = vadd.f32 %v440_v12, %v182_v5  ;;  %v193_v8 = vadd.f32 %v440_v12, %v192_v6 }
  0xb3   :  { %vm206_vm15 = vcmp.ge.f32.partialorder %v183_v7, 0.0  ;;  %v222_v9 = vmul.f32 0.2, %v183_v7  ;;  %vm210_vm1 = vcmp.ge.f32.partialorder %v193_v8, 0.0  ;;  %v226_v10 = vmul.f32 0.2, %v193_v8 }
  0xb5   :  { %v238_v11 = vsel %vm206_vm15, %v183_v7, %v222_v9  ;;  %v242_v13 = vsel %vm210_vm1, %v193_v8, %v226_v10 }
  0xb6   :  { %254 = vst.msk [vmem:[%s525_s3 + $0x58] sm:$0xff] %vm121_vm0, %v238_v11 }
  0xb7   :  { %258 = vst.msk [vmem:[%s525_s3 + $0x78] sm:$0xff] %vm121_vm0, %v242_v13 }
  0xb8   :  { %263 = vsyncpa [#allocation3], 1 }

// kernel: discriminator_forward.7
= control target key start
LH: loop header
LB: loop body
LE: loop exit
PB: predicated region body
PF: predicated region fallthrough
CT: control target
= control target key end

     0   :  { %s358_s6 = smov 0   ;;  %s360_s7 = smov 0   ;;  %s398_s0 = inlined_call_operand.vmem [shape: f32[2,16,128], index: 0, kind: input, shape index: {}]   ;;  %s399_s1 = inlined_call_operand.vmem [shape: f32[2,16,128], index: 1, kind: output, shape index: {}]  }
   0x1   :  { %s362_s8 = smov 0  }
   0x2 LB: > { %s23_s9 = sadd.s32 1, %s341_s7  ;;  %p285_p0 = scmp.ge.s32.totalorder %s345_s8, 1  ;;  %s345_s8 = sphi %s362_s8, %s11_s8   ;;  %s341_s7 = sphi %s360_s7, %s401_s7   ;;  %s337_s6 = sphi %s358_s6, %s400_s6  }
   0x3   : > { %p25_p1 = scmp.ge.s32.totalorder %s23_s9, 2  ;;  %p106_p2 = scmp.lt.s32.totalorder %s345_s8, 3 }
   0x5   : > { %s403_s9 = smov (%p25_p1, %s23_s9), 0  ;;  %p107_p3 = pnand %p285_p0, %p106_p2 }
   0x6   : > { %p132_p4 = scmp.lt.s32.totalorder (!%p107_p3), %s337_s6, 1 }
   0x7   : > { %110 = sbr.rel (%p107_p3) target bundleno = 79 (0x4f), region = 24 }
   0xc   : > { %v347_v0 = vmov 16.0   ;;  %s405_s6 = smov (!%p132_p4, %s337_s6), 1 }
   0xd   : > { %319 = vrcp.f32 %v347_v0  ;;  %s292_s10 = sshll.u32 %s405_s6, 4 }
   0xe   : > { %s139_s13 = scalar_lea.vmem %s398_s0, %s292_s10  ;;  %s147_s16 = scalar_lea.vmem %s399_s1, %s292_s10 }
   0xf   : > { %v148_v1 = vld [vmem:[%s139_s13] sm:$0xff]  ;;  %v149_v2 = vld [vmem:[%s139_s13 + $0x8] sm:$0xff] }
  0x10   : > { %v150_v4 = vadd.f32 %v149_v2, %v148_v1 }
  0x12   : > { %v151_v6 = vrot.slane %v150_v4, 4 }
  0x13   : > { %v320_v3 = vpop.eup %319 }
  0x14   : > { %v158_v5 = vmul.f32 16.0, %v320_v3  ;;  %v152_v8 = vadd.f32 %v151_v6, %v150_v4  ;;  %vm162_vm0 = vweird.f32 %v320_v3 }
  0x16   : > { %v159_v7 = vsub.f32 1.0, %v158_v5  ;;  %v153_v10 = vrot.slane %v152_v8, 2 }
  0x18   : > { %v160_v9 = vmul.f32 %v320_v3, %v159_v7  ;;  %v154_v12 = vadd.f32 %v153_v10, %v152_v8 }
  0x1a   : > { %v161_v11 = vadd.f32 %v320_v3, %v160_v9  ;;  %v155_v13 = vrot.slane %v154_v12, 1 }
  0x1c   : > { %v163_v14 = vsel %vm162_vm0, %v320_v3, %v161_v11  ;;  %v156_v15 = vadd.f32 %v155_v13, %v154_v12 }
  0x1e   : > { %v164_v16 = vmul.f32 %v163_v14, %v156_v15 }
  0x20   : > { %v165_v17 = vsub.f32 %v148_v1, %v164_v16  ;;  %v166_v18 = vsub.f32 %v149_v2, %v164_v16 }
  0x22   : > { %v167_v19 = vmul.f32 %v165_v17, %v165_v17  ;;  %v168_v20 = vmul.f32 %v166_v18, %v166_v18 }
  0x24   : > { %v169_v21 = vadd.f32 %v168_v20, %v167_v19 }
  0x26   : > { %v170_v22 = vrot.slane %v169_v21, 4 }
  0x28   : > { %v171_v23 = vadd.f32 %v170_v22, %v169_v21 }
  0x2a   : > { %v172_v24 = vrot.slane %v171_v23, 2 }
  0x2c   : > { %v173_v25 = vadd.f32 %v172_v24, %v171_v23 }
  0x2e   : > { %v174_v26 = vrot.slane %v173_v25, 1 }
  0x30   : > { %v175_v27 = vadd.f32 %v174_v26, %v173_v25 }
  0x32   : > { %v176_v28 = vmul.f32 %v175_v27, %v163_v14 }
  0x34   : > { %v177_v29 = vadd.f32 1e-05, %v176_v28 }
  0x36   : > { %321 = vrsqrt.f32 %v177_v29  ;;  %vm184_vm1 = vweird.f32 %v177_v29 }
  0x3c   : > { %v322_v30 = vpop.eup %321 }
  0x3d   : > { %v179_v31 = vmul.f32 %v322_v30, %v177_v29  ;;  %vm185_vm2 = vweird.f32 %v322_v30 }
  0x3e   : > { %vm186_vm3 = vmor %vm184_vm1, %vm185_vm2 }
  0x3f   : > { %v180_v32 = vmul.f32 %v322_v30, %v179_v31 }
  0x41   : > { %v181_v33 = vmul.f32 0.5, %v180_v32 }
  0x43   : > { %v182_v34 = vsub.f32 1.5, %v181_v33 }
  0x45   : > { %v183_v35 = vmul.f32 %v322_v30, %v182_v34 }
  0x47   : > { %v187_v36 = vsel %vm186_vm3, %v322_v30, %v183_v35 }
  0x48   : > { %v188_v37 = vmul.f32 %v187_v36, %v165_v17  ;;  %v189_v38 = vmul.f32 %v187_v36, %v166_v18 }
  0x4a   : > { %vm190_vm4 = vcmp.ge.f32.partialorder %v188_v37, 0.0  ;;  %v192_v39 = vmul.f32 0.2, %v188_v37  ;;  %vm191_vm5 = vcmp.ge.f32.partialorder %v189_v38, 0.0  ;;  %v193_v40 = vmul.f32 0.2, %v189_v38 }
  0x4c   : > { %v194_v41 = vsel %vm190_vm4, %v188_v37, %v192_v39  ;;  %v195_v42 = vsel %vm191_vm5, %v189_v38, %v193_v40 }
  0x4d   : > { %196 = vst [vmem:[%s147_s16] sm:$0xff] %v194_v41 }
  0x4e   : > { %197 = vst [vmem:[%s147_s16 + $0x8] sm:$0xff] %v195_v42 }
  0x4f PF: > { %s11_s8 = sadd.s32 1, %s345_s8   ;;  %s400_s6 = smov %s341_s7 }
  0x50   : > { %p8_p5 = scmp.ge.s32.totalorder %s11_s8, 4   ;;  %s401_s7 = smov %s403_s9 }
  0x52   :  { %10 = sbr.rel (!%p8_p5) target bundleno = 2 (0x2), region = 54 }

// kernel: discriminator_forward.6
= control target key start
LH: loop header
LB: loop body
LE: loop exit
PB: predicated region body
PF: predicated region fallthrough
CT: control target
= control target key end

     0   :  { %s1510_s1 = inlined_call_operand.vmem [shape: bf16[1024,128], index: 1, kind: input, shape index: {}]   ;;  %s1511_s0 = inlined_call_operand.vmem [shape: bf16[32,1024], index: 0, kind: input, shape index: {}]   ;;  %s1512_s2 = inlined_call_operand.vmem [shape: f32[1,128], index: 2, kind: input, shape index: {}]   ;;  %s1513_s3 = inlined_call_operand.vmem [shape: f32[32,128], index: 3, kind: output, shape index: {}]  }
   0x1   :  { %v1129_v0 = vld [vmem:[%s1510_s1 + $0x38] sm:$0xff]  ;;  %v1128_v4 = vld [vmem:[%s1510_s1 + $0x30] sm:$0xff]  ;;  %v1127_v8 = vld [vmem:[%s1510_s1 + $0x28] sm:$0xff] }
   0x2   :  { %v1137_v1 = vld [vmem:[%s1510_s1 + $0x78] sm:$0xff]  ;;  %626 = vmatpush.bf16.msra.mxu0 %v1129_v0  ;;  %v1136_v5 = vld [vmem:[%s1510_s1 + $0x70] sm:$0xff]  ;;  %v1135_v9 = vld [vmem:[%s1510_s1 + $0x68] sm:$0xff] }
   0x3   :  { %v1145_v2 = vld [vmem:[%s1510_s1 + $0xb8] sm:$0xff]  ;;  %645 = vmatpush.bf16.msra.mxu1 %v1137_v1  ;;  %v1144_v6 = vld [vmem:[%s1510_s1 + $0xb0] sm:$0xff]  ;;  %v1143_v10 = vld [vmem:[%s1510_s1 + $0xa8] sm:$0xff] }
   0x4   :  { %v1153_v3 = vld [vmem:[%s1510_s1 + $0xf8] sm:$0xff]  ;;  %664 = vmatpush.bf16.msra.mxu2 %v1145_v2  ;;  %v1152_v7 = vld [vmem:[%s1510_s1 + $0xf0] sm:$0xff]  ;;  %v1151_v11 = vld [vmem:[%s1510_s1 + $0xe8] sm:$0xff] }
   0x5   :  { %683 = vmatpush.bf16.msra.mxu3 %v1153_v3  ;;  %v1126_v12 = vld [vmem:[%s1510_s1 + $0x20] sm:$0xff]  ;;  %v1125_v16 = vld [vmem:[%s1510_s1 + $0x18] sm:$0xff]  ;;  %v1124_v20 = vld [vmem:[%s1510_s1 + $0x10] sm:$0xff] }
   0x6   :  { %627 = vmatpush.bf16.msra.mxu0 %v1128_v4  ;;  %v1134_v13 = vld [vmem:[%s1510_s1 + $0x60] sm:$0xff]  ;;  %v1133_v17 = vld [vmem:[%s1510_s1 + $0x58] sm:$0xff]  ;;  %v1132_v21 = vld [vmem:[%s1510_s1 + $0x50] sm:$0xff] }
   0x7   :  { %646 = vmatpush.bf16.msra.mxu1 %v1136_v5  ;;  %v1142_v14 = vld [vmem:[%s1510_s1 + $0xa0] sm:$0xff]  ;;  %v1141_v18 = vld [vmem:[%s1510_s1 + $0x98] sm:$0xff]  ;;  %v1140_v22 = vld [vmem:[%s1510_s1 + $0x90] sm:$0xff] }
   0x8   :  { %665 = vmatpush.bf16.msra.mxu2 %v1144_v6  ;;  %v1150_v15 = vld [vmem:[%s1510_s1 + $0xe0] sm:$0xff]  ;;  %v1149_v19 = vld [vmem:[%s1510_s1 + $0xd8] sm:$0xff]  ;;  %v1148_v23 = vld [vmem:[%s1510_s1 + $0xd0] sm:$0xff] }
   0x9   :  { %684 = vmatpush.bf16.msra.mxu3 %v1152_v7  ;;  %v1123_v24 = vld [vmem:[%s1510_s1 + $0x8] sm:$0xff]  ;;  %v1122_v28 = vld [vmem:[%s1510_s1] sm:$0xff]  ;;  %v1177_v40 = vld [vmem:[%s1510_s1 + $0x1b8] sm:$0xff] }
   0xa   :  { %628 = vmatpush.bf16.msra.mxu0 %v1127_v8  ;;  %v1131_v25 = vld [vmem:[%s1510_s1 + $0x48] sm:$0xff]  ;;  %v1130_v29 = vld [vmem:[%s1510_s1 + $0x40] sm:$0xff]  ;;  %v1161_v41 = vld [vmem:[%s1510_s1 + $0x138] sm:$0xff] }
   0xb   :  { %647 = vmatpush.bf16.msra.mxu1 %v1135_v9  ;;  %v1139_v26 = vld [vmem:[%s1510_s1 + $0x88] sm:$0xff]  ;;  %v1138_v30 = vld [vmem:[%s1510_s1 + $0x80] sm:$0xff]  ;;  %v1169_v46 = vld [vmem:[%s1510_s1 + $0x178] sm:$0xff] }
   0xc   :  { %666 = vmatpush.bf16.msra.mxu2 %v1143_v10  ;;  %v1147_v27 = vld [vmem:[%s1510_s1 + $0xc8] sm:$0xff]  ;;  %v1146_v31 = vld [vmem:[%s1510_s1 + $0xc0] sm:$0xff]  ;;  %v1185_v47 = vld [vmem:[%s1510_s1 + $0x1f8] sm:$0xff] }
   0xd   :  { %685 = vmatpush.bf16.msra.mxu3 %v1151_v11  ;;  %v788_v32 = vld [vmem:[%s1511_s0] sm:$0xf]  ;;  %v1106_v34 = vld [vmem:[%s1511_s0 + $0x4] sm:$0xf]  ;;  %v796_v36 = vld [vmem:[%s1511_s0 + $0x8] sm:$0xf] }
   0xe   :  { %629 = vmatpush.bf16.msra.mxu0 %v1126_v12  ;;  %v1110_v33 = vld [vmem:[%s1511_s0 + $0x1c] sm:$0xf0]  ;;  %v790_v35 = vld [vmem:[%s1511_s0 + $0x20] sm:$0xf0]  ;;  %v1111_v37 = vld [vmem:[%s1511_s0 + $0x24] sm:$0xf0] }
   0xf   :  { %648 = vmatpush.bf16.msra.mxu1 %v1134_v13  ;;  %v1107_v38 = vld [vmem:[%s1511_s0 + $0xc] sm:$0xf]  ;;  %v789_v42 = vor.u32 %v1110_v33, %v788_v32  ;;  %v793_v43 = vor.u32 %v1106_v34, %v790_v35  ;;  %v797_v44 = vor.u32 %v1111_v37, %v796_v36  ;;  %v1176_v48 = vld [vmem:[%s1510_s1 + $0x1b0] sm:$0xff]  ;;  %v1174_v56 = vld [vmem:[%s1510_s1 + $0x1a0] sm:$0xff] }
  0x10   :  { %667 = vmatpush.bf16.msra.mxu2 %v1142_v14  ;;  %v798_v39 = vld [vmem:[%s1511_s0 + $0x28] sm:$0xf0]  ;;  %v1160_v49 = vld [vmem:[%s1510_s1 + $0x130] sm:$0xff]  ;;  %v1158_v57 = vld [vmem:[%s1510_s1 + $0x120] sm:$0xff] }
  0x11   :  { %686 = vmatpush.bf16.msra.mxu3 %v1150_v15  ;;  %v801_v45 = vor.u32 %v1107_v38, %v798_v39  ;;  %v1168_v50 = vld [vmem:[%s1510_s1 + $0x170] sm:$0xff]  ;;  %v1175_v52 = vld [vmem:[%s1510_s1 + $0x1a8] sm:$0xff]  ;;  %v1166_v58 = vld [vmem:[%s1510_s1 + $0x160] sm:$0xff] }
  0x12   :  { %630 = vmatpush.bf16.msra.mxu0 %v1125_v16  ;;  %v1184_v51 = vld [vmem:[%s1510_s1 + $0x1f0] sm:$0xff]  ;;  %v1159_v53 = vld [vmem:[%s1510_s1 + $0x128] sm:$0xff]  ;;  %v1182_v59 = vld [vmem:[%s1510_s1 + $0x1e0] sm:$0xff] }
  0x13   :  { %649 = vmatpush.bf16.msra.mxu1 %v1133_v17  ;;  %v1167_v54 = vld [vmem:[%s1510_s1 + $0x168] sm:$0xff]  ;;  %v820_v60 = vld [vmem:[%s1511_s0 + $0x40] sm:$0xf]  ;;  %v1114_v62 = vld [vmem:[%s1511_s0 + $0x44] sm:$0xf] }
  0x14   :  { %668 = vmatpush.bf16.msra.mxu2 %v1141_v18  ;;  %v1183_v55 = vld [vmem:[%s1510_s1 + $0x1e8] sm:$0xff]  ;;  %v1118_v61 = vld [vmem:[%s1511_s0 + $0x5c] sm:$0xf0]  ;;  %v822_v63 = vld [vmem:[%s1511_s0 + $0x60] sm:$0xf0] }
  0x15   :  { %687 = vmatpush.bf16.msra.mxu3 %v1149_v19  ;;  %v828_v0 = vld [vmem:[%s1511_s0 + $0x48] sm:$0xf]  ;;  %v1115_v2 = vld [vmem:[%s1511_s0 + $0x4c] sm:$0xf]  ;;  %v1173_v4 = vld [vmem:[%s1510_s1 + $0x198] sm:$0xff]  ;;  %v821_v6 = vor.u32 %v1118_v61, %v820_v60  ;;  %v825_v7 = vor.u32 %v1114_v62, %v822_v63 }
  0x16   :  { %631 = vmatpush.bf16.msra.mxu0 %v1124_v20  ;;  %v1119_v1 = vld [vmem:[%s1511_s0 + $0x64] sm:$0xf0]  ;;  %v830_v3 = vld [vmem:[%s1511_s0 + $0x68] sm:$0xf0]  ;;  %v1157_v5 = vld [vmem:[%s1510_s1 + $0x118] sm:$0xff] }
  0x17   :  { %650 = vmatpush.bf16.msra.mxu1 %v1132_v21  ;;  %v829_v8 = vor.u32 %v1119_v1, %v828_v0  ;;  %v833_v9 = vor.u32 %v1115_v2, %v830_v3  ;;  %v1165_v10 = vld [vmem:[%s1510_s1 + $0x158] sm:$0xff]  ;;  %v1172_v12 = vld [vmem:[%s1510_s1 + $0x190] sm:$0xff]  ;;  %v1171_v16 = vld [vmem:[%s1510_s1 + $0x188] sm:$0xff] }
  0x18   :  { %669 = vmatpush.bf16.msra.mxu2 %v1140_v22  ;;  %v1181_v11 = vld [vmem:[%s1510_s1 + $0x1d8] sm:$0xff]  ;;  %v1156_v13 = vld [vmem:[%s1510_s1 + $0x110] sm:$0xff]  ;;  %v1155_v17 = vld [vmem:[%s1510_s1 + $0x108] sm:$0xff] }
  0x19   :  { %688 = vmatpush.bf16.msra.mxu3 %v1148_v23  ;;  %v1164_v14 = vld [vmem:[%s1510_s1 + $0x150] sm:$0xff]  ;;  %v1163_v18 = vld [vmem:[%s1510_s1 + $0x148] sm:$0xff]  ;;  %v1170_v20 = vld [vmem:[%s1510_s1 + $0x180] sm:$0xff] }
  0x1a   :  { %632 = vmatpush.bf16.msra.mxu0 %v1123_v24  ;;  %v1180_v15 = vld [vmem:[%s1510_s1 + $0x1d0] sm:$0xff]  ;;  %v1179_v19 = vld [vmem:[%s1510_s1 + $0x1c8] sm:$0xff]  ;;  %v1154_v21 = vld [vmem:[%s1510_s1 + $0x100] sm:$0xff] }
  0x1b   :  { %651 = vmatpush.bf16.msra.mxu1 %v1131_v25  ;;  %v1162_v22 = vld [vmem:[%s1510_s1 + $0x140] sm:$0xff]  ;;  %v804_v24 = vld [vmem:[%s1511_s0 + $0x10] sm:$0xf]  ;;  %v1116_v38 = vld [vmem:[%s1511_s0 + $0x54] sm:$0xf] }
  0x1c   :  { %670 = vmatpush.bf16.msra.mxu2 %v1139_v26  ;;  %v1178_v23 = vld [vmem:[%s1510_s1 + $0x1c0] sm:$0xff]  ;;  %v1112_v25 = vld [vmem:[%s1511_s0 + $0x2c] sm:$0xf0]  ;;  %v1108_v26 = vld [vmem:[%s1511_s0 + $0x14] sm:$0xf] }
  0x1d   :  { %689 = vmatpush.bf16.msra.mxu3 %v1147_v27  ;;  %v806_v27 = vld [vmem:[%s1511_s0 + $0x30] sm:$0xf0]  ;;  %v805_v32 = vor.u32 %v1112_v25, %v804_v24  ;;  %v836_v36 = vld [vmem:[%s1511_s0 + $0x50] sm:$0xf] }
  0x1e   :  { %633 = vmatpush.bf16.msra.mxu0 %v1122_v28  ;;  %v812_v28 = vld [vmem:[%s1511_s0 + $0x18] sm:$0xf]  ;;  %v809_v33 = vor.u32 %v1108_v26, %v806_v27  ;;  %v1120_v37 = vld [vmem:[%s1511_s0 + $0x6c] sm:$0xf0]  ;;  %v838_v39 = vld [vmem:[%s1511_s0 + $0x70] sm:$0xf0] }
  0x1f   :  { %652 = vmatpush.bf16.msra.mxu1 %v1130_v29  ;;  %v1113_v29 = vld [vmem:[%s1511_s0 + $0x34] sm:$0xf0] }
  0x20   :  { %671 = vmatpush.bf16.msra.mxu2 %v1138_v30  ;;  %v1109_v30 = vld [vmem:[%s1511_s0 + $0x1c] sm:$0xf]  ;;  %v813_v34 = vor.u32 %v1113_v29, %v812_v28 }
  0x21   :  { %690 = vmatpush.bf16.msra.mxu3 %v1146_v31  ;;  %634 = vmatmul.bf16.vlgmr.msra.gmra.mxu0 %v789_v42  ;;  %v814_v31 = vld [vmem:[%s1511_s0 + $0x38] sm:$0xf0] }
  0x22   :  { %702 = vmatpush.bf16.msrb.mxu0 %v1161_v41  ;;  %653 = vmatmul.bf16.vlgmr.msra.gmra.mxu1 %v793_v43  ;;  %v817_v35 = vor.u32 %v1109_v30, %v814_v31  ;;  %v1121_v41 = vld [vmem:[%s1511_s0 + $0x74] sm:$0xf0]  ;;  %v1117_v42 = vld [vmem:[%s1511_s0 + $0x5c] sm:$0xf] }
  0x23   :  { %672 = vmatmul.bf16.vlgmr.msra.gmra.mxu2 %v797_v44  ;;  %721 = vmatpush.bf16.msrb.mxu1 %v1169_v46  ;;  %v846_v43 = vld [vmem:[%s1511_s0 + $0x78] sm:$0xf0]  ;;  %v837_v44 = vor.u32 %v1120_v37, %v836_v36 }
  0x24   :  { %740 = vmatpush.bf16.msrb.mxu2 %v1177_v40  ;;  %691 = vmatmul.bf16.vlgmr.msra.gmra.mxu3 %v801_v45  ;;  %v844_v40 = vld [vmem:[%s1511_s0 + $0x58] sm:$0xf]  ;;  %v841_v45 = vor.u32 %v1116_v38, %v838_v39 }
  0x25   :  { %759 = vmatpush.bf16.msrb.mxu3 %v1185_v47  ;;  %v845_v46 = vor.u32 %v1121_v41, %v844_v40  ;;  %v849_v47 = vor.u32 %v1117_v42, %v846_v43 }
  0x26   :  { %703 = vmatpush.bf16.msrb.mxu0 %v1160_v49 }
  0x27   :  { %722 = vmatpush.bf16.msrb.mxu1 %v1168_v50 }
  0x28   :  { %741 = vmatpush.bf16.msrb.mxu2 %v1176_v48 }
  0x29   :  { %760 = vmatpush.bf16.msrb.mxu3 %v1184_v51 }
  0x2a   :  { %704 = vmatpush.bf16.msrb.mxu0 %v1159_v53 }
  0x2b   :  { %723 = vmatpush.bf16.msrb.mxu1 %v1167_v54 }
  0x2c   :  { %742 = vmatpush.bf16.msrb.mxu2 %v1175_v52 }
  0x2d   :  { %761 = vmatpush.bf16.msrb.mxu3 %v1183_v55 }
  0x2e   :  { %705 = vmatpush.bf16.msrb.mxu0 %v1158_v57 }
  0x2f   :  { %724 = vmatpush.bf16.msrb.mxu1 %v1166_v58 }
  0x30   :  { %743 = vmatpush.bf16.msrb.mxu2 %v1174_v56  ;;  %v1186_v56 = vld [vmem:[%s1512_s2] ss:$0 sm:$0xff] }
  0x31   :  { %762 = vmatpush.bf16.msrb.mxu3 %v1182_v59  ;;  %639 = vmatmul.bf16.gmra.mxu0 %v821_v6 }
  0x32   :  { %706 = vmatpush.bf16.msrb.mxu0 %v1157_v5  ;;  %658 = vmatmul.bf16.gmra.mxu1 %v825_v7 }
  0x33   :  { %677 = vmatmul.bf16.gmra.mxu2 %v829_v8  ;;  %725 = vmatpush.bf16.msrb.mxu1 %v1165_v10 }
  0x34   :  { %744 = vmatpush.bf16.msrb.mxu2 %v1173_v4  ;;  %696 = vmatmul.bf16.gmra.mxu3 %v833_v9 }
  0x35   :  { %763 = vmatpush.bf16.msrb.mxu3 %v1181_v11 }
  0x36   :  { %707 = vmatpush.bf16.msrb.mxu0 %v1156_v13 }
  0x37   :  { %726 = vmatpush.bf16.msrb.mxu1 %v1164_v14 }
  0x38   :  { %745 = vmatpush.bf16.msrb.mxu2 %v1172_v12 }
  0x39   :  { %764 = vmatpush.bf16.msrb.mxu3 %v1180_v15 }
  0x3a   :  { %708 = vmatpush.bf16.msrb.mxu0 %v1155_v17 }
  0x3b   :  { %727 = vmatpush.bf16.msrb.mxu1 %v1163_v18 }
  0x3c   :  { %746 = vmatpush.bf16.msrb.mxu2 %v1171_v16 }
  0x3d   :  { %765 = vmatpush.bf16.msrb.mxu3 %v1179_v19 }
  0x3e   :  { %709 = vmatpush.bf16.msrb.mxu0 %v1154_v21 }
  0x3f   :  { %728 = vmatpush.bf16.msrb.mxu1 %v1162_v22 }
  0x40   :  { %747 = vmatpush.bf16.msrb.mxu2 %v1170_v20 }
  0x41   :  { %766 = vmatpush.bf16.msrb.mxu3 %v1178_v23  ;;  %710 = vmatmul.bf16.vlgmr.msrb.gmra.mxu0 %v805_v32 }
  0x42   :  { %729 = vmatmul.bf16.vlgmr.msrb.gmra.mxu1 %v809_v33 }
  0x43   :  { %748 = vmatmul.bf16.vlgmr.msrb.gmra.mxu2 %v813_v34 }
  0x44   :  { %767 = vmatmul.bf16.vlgmr.msrb.gmra.mxu3 %v817_v35 }
  0x51   :  { %715 = vmatmul.bf16.gmra.mxu0 %v837_v44 }
  0x52   :  { %734 = vmatmul.bf16.gmra.mxu1 %v841_v45 }
  0x53   :  { %753 = vmatmul.bf16.gmra.mxu2 %v845_v46 }
  0x54   :  { %772 = vmatmul.bf16.gmra.mxu3 %v849_v47 }
  0x9e   :  { %v635_v48 = vpop.f32.mrf.mxu0 }
  0x9f   :  { %v654_v49 = vpop.f32.mrf.mxu1  ;;  %v636_v59 = vadd.f32 %v1186_v56, %v635_v48 }
  0xa1   :  { %v655_v62 = vadd.f32 %v654_v49, %v636_v59 }
  0xa6   :  { %v673_v50 = vpop.f32.mrf.mxu2  ;;  %v637_v52 = vpop.f32.mrf.mxu0 }
  0xa7   :  { %v692_v51 = vpop.f32.mrf.mxu3  ;;  %v656_v53 = vpop.f32.mrf.mxu1  ;;  %v674_v1 = vadd.f32 %v673_v50, %v655_v62  ;;  %v638_v2 = vadd.f32 %v1186_v56, %v637_v52 }
  0xa9   :  { %v693_v5 = vadd.f32 %v692_v51, %v674_v1  ;;  %v657_v8 = vadd.f32 %v656_v53, %v638_v2 }
  0xae   :  { %v675_v54 = vpop.f32.mrf.mxu2  ;;  %v640_v57 = vpop.f32.mrf.mxu0 }
  0xaf   :  { %v694_v55 = vpop.f32.mrf.mxu3  ;;  %v659_v58 = vpop.f32.mrf.mxu1  ;;  %v676_v10 = vadd.f32 %v675_v54, %v657_v8  ;;  %v641_v11 = vadd.f32 %v1186_v56, %v640_v57 }
  0xb1   :  { %v695_v14 = vadd.f32 %v694_v55, %v676_v10  ;;  %v660_v15 = vadd.f32 %v659_v58, %v641_v11 }
  0xb6   :  { %v678_v60 = vpop.f32.mrf.mxu2  ;;  %v642_v63 = vpop.f32.mrf.mxu0 }
  0xb7   :  { %v697_v61 = vpop.f32.mrf.mxu3  ;;  %v661_v0 = vpop.f32.mrf.mxu1  ;;  %v679_v22 = vadd.f32 %v678_v60, %v660_v15  ;;  %v643_v23 = vadd.f32 %v1186_v56, %v642_v63 }
  0xb9   :  { %v698_v26 = vadd.f32 %v697_v61, %v679_v22  ;;  %v662_v30 = vadd.f32 %v661_v0, %v643_v23 }
  0xbe   :  { %v680_v3 = vpop.f32.mrf.mxu2  ;;  %v711_v6 = vpop.f32.mrf.mxu0 }
  0xbf   :  { %v699_v4 = vpop.f32.mrf.mxu3  ;;  %v730_v7 = vpop.f32.mrf.mxu1  ;;  %v712_v9 = vadd.f32 %v711_v6, %v693_v5  ;;  %v681_v34 = vadd.f32 %v680_v3, %v662_v30 }
  0xc1   :  { %v731_v12 = vadd.f32 %v730_v7, %v712_v9  ;;  %v700_v37 = vadd.f32 %v699_v4, %v681_v34 }
  0xc6   :  { %v749_v13 = vpop.f32.mrf.mxu2  ;;  %v713_v18 = vpop.f32.mrf.mxu0 }
  0xc7   :  { %v750_v16 = vadd.f32 %v749_v13, %v731_v12  ;;  %v768_v17 = vpop.f32.mrf.mxu3  ;;  %v732_v19 = vpop.f32.mrf.mxu1  ;;  %v714_v21 = vadd.f32 %v713_v18, %v695_v14 }
  0xc9   :  { %v769_v20 = vadd.f32 %v768_v17, %v750_v16  ;;  %v733_v24 = vadd.f32 %v732_v19, %v714_v21 }
  0xcb   :  { %778 = vst [vmem:[%s1513_s3] sm:$0xff] %v769_v20 }
  0xce   :  { %v751_v25 = vpop.f32.mrf.mxu2  ;;  %v716_v29 = vpop.f32.mrf.mxu0 }
  0xcf   :  { %v752_v27 = vadd.f32 %v751_v25, %v733_v24  ;;  %v770_v28 = vpop.f32.mrf.mxu3  ;;  %v717_v32 = vadd.f32 %v716_v29, %v698_v26  ;;  %v735_v33 = vpop.f32.mrf.mxu1 }
  0xd1   :  { %v771_v31 = vadd.f32 %v770_v28, %v752_v27  ;;  %v736_v35 = vadd.f32 %v735_v33, %v717_v32 }
  0xd3   :  { %779 = vst [vmem:[%s1513_s3 + $0x8] sm:$0xff] %v771_v31 }
  0xd6   :  { %v754_v36 = vpop.f32.mrf.mxu2  ;;  %v718_v40 = vpop.f32.mrf.mxu0 }
  0xd7   :  { %v755_v38 = vadd.f32 %v754_v36, %v736_v35  ;;  %v773_v39 = vpop.f32.mrf.mxu3  ;;  %v719_v42 = vadd.f32 %v718_v40, %v700_v37  ;;  %v737_v43 = vpop.f32.mrf.mxu1 }
  0xd9   :  { %v774_v41 = vadd.f32 %v773_v39, %v755_v38  ;;  %v738_v44 = vadd.f32 %v737_v43, %v719_v42 }
  0xdb   :  { %780 = vst [vmem:[%s1513_s3 + $0x10] sm:$0xff] %v774_v41 }
  0xde   :  { %v756_v45 = vpop.f32.mrf.mxu2 }
  0xdf   :  { %v757_v46 = vadd.f32 %v756_v45, %v738_v44  ;;  %v775_v47 = vpop.f32.mrf.mxu3 }
  0xe1   :  { %v776_v48 = vadd.f32 %v775_v47, %v757_v46 }
  0xe3   :  { %781 = vst [vmem:[%s1513_s3 + $0x18] sm:$0xff] %v776_v48 }

// kernel: discriminator_forward.9
= control target key start
LH: loop header
LB: loop body
LE: loop exit
PB: predicated region body
PF: predicated region fallthrough
CT: control target
= control target key end

     0   :  { %s384_s6 = smov 0   ;;  %s386_s7 = smov 0   ;;  %s444_s0 = inlined_call_operand.vmem [shape: f32[2,4,256], index: 0, kind: input, shape index: {}]   ;;  %s445_s1 = inlined_call_operand.vmem [shape: f32[2,4,256], index: 1, kind: output, shape index: {}]  }
   0x1   :  { %s388_s8 = smov 0   ;;  %s390_s9 = smov 0  }
   0x2   :  { %s392_s10 = smov 0  }
   0x3 LB: > { %s20_s11 = sadd.s32 1, %s363_s8  ;;  %s23_s12 = sadd.s32 1, %s367_s9  ;;  %s371_s10 = sphi %s392_s10, %s11_s10   ;;  %s367_s9 = sphi %s390_s9, %s449_s9   ;;  %s363_s8 = sphi %s388_s8, %s448_s8   ;;  %s359_s7 = sphi %s386_s7, %s447_s7   ;;  %s355_s6 = sphi %s384_s6, %s446_s6  }
   0x4   : > { %p21_p0 = scmp.ge.s32.totalorder %s20_s11, 2  ;;  %p281_p1 = scmp.ge.s32.totalorder %s371_s10, 1 }
   0x5   : > { %p106_p2 = scmp.lt.s32.totalorder %s371_s10, 5 }
   0x6   : > { %s451_s11 = smov (%p21_p0, %s20_s11), 0  ;;  %s453_s12 = smov (!%p21_p0, %s23_s12), %s367_s9 }
   0x7   : > { %p107_p3 = pnand %p281_p1, %p106_p2  ;;  %p25_p4 = scmp.ge.s32.totalorder %s453_s12, 2 }
   0x8   : > { %p132_p5 = scmp.lt.s32.totalorder (!%p107_p3), %s359_s7, 1  ;;  %p134_p6 = scmp.lt.s32.totalorder (!%p107_p3), %s355_s6, 1 }
   0x9   : > { %s455_s12 = smov (%p25_p4, %s453_s12), 0  ;;  %110 = sbr.rel (%p107_p3) target bundleno = 80 (0x50), region = 24 }
   0xe   : > { %v373_v0 = vmov 4.0   ;;  %s457_s7 = smov (!%p132_p5, %s359_s7), 1  ;;  %s459_s6 = smov (!%p134_p6, %s355_s6), 1  ;;  %vm149_vm0 = vcmask 1043456  }
   0xf   : > { %329 = vrcp.f32 %v373_v0  ;;  %s282_s13 = sshll.u32 %s457_s7, 1 }
  0x10   : > { %s414_s14 = sadd.s32 %s282_s13, %s459_s6 }
  0x11   : > { %s283_s15 = sshll.u32 %s414_s14, 2 }
  0x12   : > { %s139_s18 = scalar_lea.vmem %s444_s0, %s283_s15  ;;  %s147_s21 = scalar_lea.vmem %s445_s1, %s283_s15 }
  0x13   : > { %v148_v2 = vld [vmem:[%s139_s18] sm:$0xf] }
  0x14   : > { %v150_v4 = vsel %vm149_vm0, %v148_v2, 0.0 }
  0x15   : > { %v330_v1 = vpop.eup %329  ;;  %v151_v5 = vrot.slane %v150_v4, 4 }
  0x16   : > { %v158_v3 = vmul.f32 4.0, %v330_v1  ;;  %vm162_vm1 = vweird.f32 %v330_v1 }
  0x17   : > { %v152_v7 = vadd.f32 %v151_v5, %v150_v4 }
  0x18   : > { %v159_v6 = vsub.f32 1.0, %v158_v3 }
  0x19   : > { %v153_v9 = vrot.slane %v152_v7, 2 }
  0x1a   : > { %v160_v8 = vmul.f32 %v330_v1, %v159_v6 }
  0x1b   : > { %v154_v11 = vadd.f32 %v153_v9, %v152_v7 }
  0x1c   : > { %v161_v10 = vadd.f32 %v330_v1, %v160_v8 }
  0x1d   : > { %v155_v12 = vrot.slane %v154_v11, 1 }
  0x1e   : > { %v163_v13 = vsel %vm162_vm1, %v330_v1, %v161_v10 }
  0x1f   : > { %v156_v14 = vadd.f32 %v155_v12, %v154_v11 }
  0x21   : > { %v164_v15 = vmul.f32 %v163_v13, %v156_v14 }
  0x23   : > { %v165_v16 = vsub.f32 %v148_v2, %v164_v15 }
  0x25   : > { %v166_v17 = vmul.f32 %v165_v16, %v165_v16 }
  0x27   : > { %v167_v18 = vsel %vm149_vm0, %v166_v17, 0.0 }
  0x28   : > { %v168_v19 = vrot.slane %v167_v18, 4 }
  0x2a   : > { %v169_v20 = vadd.f32 %v168_v19, %v167_v18 }
  0x2c   : > { %v170_v21 = vrot.slane %v169_v20, 2 }
  0x2e   : > { %v171_v22 = vadd.f32 %v170_v21, %v169_v20 }
  0x30   : > { %v172_v23 = vrot.slane %v171_v22, 1 }
  0x32   : > { %v173_v24 = vadd.f32 %v172_v23, %v171_v22 }
  0x34   : > { %v174_v25 = vmul.f32 %v173_v24, %v163_v13 }
  0x36   : > { %v175_v26 = vadd.f32 1e-05, %v174_v25 }
  0x38   : > { %331 = vrsqrt.f32 %v175_v26  ;;  %vm182_vm2 = vweird.f32 %v175_v26 }
  0x3e   : > { %v332_v27 = vpop.eup %331 }
  0x3f   : > { %v177_v28 = vmul.f32 %v332_v27, %v175_v26  ;;  %vm183_vm3 = vweird.f32 %v332_v27 }
  0x40   : > { %vm184_vm4 = vmor %vm182_vm2, %vm183_vm3 }
  0x41   : > { %v178_v29 = vmul.f32 %v332_v27, %v177_v28 }
  0x43   : > { %v179_v30 = vmul.f32 0.5, %v178_v29 }
  0x45   : > { %v180_v31 = vsub.f32 1.5, %v179_v30 }
  0x47   : > { %v181_v32 = vmul.f32 %v332_v27, %v180_v31 }
  0x49   : > { %v185_v33 = vsel %vm184_vm4, %v332_v27, %v181_v32 }
  0x4a   : > { %v186_v34 = vmul.f32 %v185_v33, %v165_v16 }
  0x4c   : > { %vm187_vm5 = vcmp.ge.f32.partialorder %v186_v34, 0.0  ;;  %v188_v35 = vmul.f32 0.2, %v186_v34 }
  0x4e   : > { %v189_v36 = vsel %vm187_vm5, %v186_v34, %v188_v35 }
  0x4f   : > { %190 = vst [vmem:[%s147_s21] sm:$0xf] %v189_v36 }
  0x50 PF: > { %s11_s10 = sadd.s32 1, %s371_s10   ;;  %s446_s6 = smov %s363_s8 }
  0x51   : > { %p8_p7 = scmp.ge.s32.totalorder %s11_s10, 6   ;;  %s447_s7 = smov %s367_s9 }
  0x52   : > { %s448_s8 = smov %s451_s11  ;;  %s449_s9 = smov %s455_s12 }
  0x53   :  { %10 = sbr.rel (!%p8_p7) target bundleno = 3 (0x3), region = 54 }

// kernel: discriminator_forward.8
= control target key start
LH: loop header
LB: loop body
LE: loop exit
PB: predicated region body
PF: predicated region fallthrough
CT: control target
= control target key end

     0   :  { %s5012_s1 = inlined_call_operand.vmem [shape: bf16[2048,256], index: 1, kind: input, shape index: {}]   ;;  %s5013_s0 = inlined_call_operand.vmem [shape: bf16[8,2048], index: 0, kind: input, shape index: {}]   ;;  %s5014_s2 = inlined_call_operand.vmem [shape: f32[1,256], index: 2, kind: input, shape index: {}]   ;;  %s5015_s3 = inlined_call_operand.vmem [shape: f32[8,256], index: 3, kind: output, shape index: {}]  }
   0x1   :  { %v2100_v0 = vld [vmem:[%s5012_s1 + $0x70] sm:$0xf]  ;;  %v3081_v1 = vld [vmem:[%s5012_s1 + $0x74] sm:$0xf0]  ;;  %v2092_v11 = vld [vmem:[%s5012_s1 + $0x60] sm:$0xf] }
   0x2   :  { %v2164_v2 = vld [vmem:[%s5012_s1 + $0xf0] sm:$0xf]  ;;  %v2101_v3 = vor.u32 %v3081_v1, %v2100_v0  ;;  %v3097_v4 = vld [vmem:[%s5012_s1 + $0xf4] sm:$0xf0]  ;;  %v3079_v13 = vld [vmem:[%s5012_s1 + $0x64] sm:$0xf0] }
   0x3   :  { %v2228_v5 = vld [vmem:[%s5012_s1 + $0x170] sm:$0xf]  ;;  %v3113_v6 = vld [vmem:[%s5012_s1 + $0x174] sm:$0xf0]  ;;  %v2165_v7 = vor.u32 %v3097_v4, %v2164_v2  ;;  %v2156_v14 = vld [vmem:[%s5012_s1 + $0xe0] sm:$0xf]  ;;  %v2093_v16 = vor.u32 %v3079_v13, %v2092_v11 }
   0x4   :  { %v2229_v8 = vor.u32 %v3113_v6, %v2228_v5  ;;  %v2292_v9 = vld [vmem:[%s5012_s1 + $0x1f0] sm:$0xf]  ;;  %v3129_v10 = vld [vmem:[%s5012_s1 + $0x1f4] sm:$0xf0]  ;;  %1620 = vmatpush.bf16.msra.mxu0 %v2101_v3  ;;  %v3095_v15 = vld [vmem:[%s5012_s1 + $0xe4] sm:$0xf0] }
   0x5   :  { %v2293_v12 = vor.u32 %v3129_v10, %v2292_v9  ;;  %1633 = vmatpush.bf16.msra.mxu1 %v2165_v7  ;;  %v2157_v17 = vor.u32 %v3095_v15, %v2156_v14  ;;  %v2220_v18 = vld [vmem:[%s5012_s1 + $0x160] sm:$0xf]  ;;  %v3111_v19 = vld [vmem:[%s5012_s1 + $0x164] sm:$0xf0]  ;;  %v2084_v23 = vld [vmem:[%s5012_s1 + $0x50] sm:$0xf] }
   0x6   :  { %1646 = vmatpush.bf16.msra.mxu2 %v2229_v8  ;;  %v2284_v20 = vld [vmem:[%s5012_s1 + $0x1e0] sm:$0xf]  ;;  %v2221_v21 = vor.u32 %v3111_v19, %v2220_v18  ;;  %v3127_v22 = vld [vmem:[%s5012_s1 + $0x1e4] sm:$0xf0]  ;;  %v3077_v24 = vld [vmem:[%s5012_s1 + $0x54] sm:$0xf0] }
   0x7   :  { %1659 = vmatpush.bf16.msra.mxu3 %v2293_v12  ;;  %v2285_v25 = vor.u32 %v3127_v22, %v2284_v20  ;;  %v2148_v26 = vld [vmem:[%s5012_s1 + $0xd0] sm:$0xf]  ;;  %v3093_v27 = vld [vmem:[%s5012_s1 + $0xd4] sm:$0xf0]  ;;  %v2085_v29 = vor.u32 %v3077_v24, %v2084_v23  ;;  %v2076_v35 = vld [vmem:[%s5012_s1 + $0x40] sm:$0xf] }
   0x8   :  { %v2212_v28 = vld [vmem:[%s5012_s1 + $0x150] sm:$0xf]  ;;  %1621 = vmatpush.bf16.msra.mxu0 %v2093_v16  ;;  %v3109_v30 = vld [vmem:[%s5012_s1 + $0x154] sm:$0xf0]  ;;  %v2149_v33 = vor.u32 %v3093_v27, %v2148_v26  ;;  %v3075_v36 = vld [vmem:[%s5012_s1 + $0x44] sm:$0xf0] }
   0x9   :  { %v2276_v31 = vld [vmem:[%s5012_s1 + $0x1d0] sm:$0xf]  ;;  %v3125_v32 = vld [vmem:[%s5012_s1 + $0x1d4] sm:$0xf0]  ;;  %1634 = vmatpush.bf16.msra.mxu1 %v2157_v17  ;;  %v2213_v34 = vor.u32 %v3109_v30, %v2212_v28  ;;  %v2140_v37 = vld [vmem:[%s5012_s1 + $0xc0] sm:$0xf]  ;;  %v2077_v44 = vor.u32 %v3075_v36, %v2076_v35 }
   0xa   :  { %1647 = vmatpush.bf16.msra.mxu2 %v2221_v21  ;;  %v2277_v38 = vor.u32 %v3125_v32, %v2276_v31  ;;  %v3091_v39 = vld [vmem:[%s5012_s1 + $0xc4] sm:$0xf0]  ;;  %v2204_v40 = vld [vmem:[%s5012_s1 + $0x140] sm:$0xf]  ;;  %v2068_v47 = vld [vmem:[%s5012_s1 + $0x30] sm:$0xf] }
   0xb   :  { %1660 = vmatpush.bf16.msra.mxu3 %v2285_v25  ;;  %v3107_v41 = vld [vmem:[%s5012_s1 + $0x144] sm:$0xf0]  ;;  %v2268_v42 = vld [vmem:[%s5012_s1 + $0x1c0] sm:$0xf]  ;;  %v2141_v45 = vor.u32 %v3091_v39, %v2140_v37  ;;  %v3073_v48 = vld [vmem:[%s5012_s1 + $0x34] sm:$0xf0] }
   0xc   :  { %v3123_v43 = vld [vmem:[%s5012_s1 + $0x1c4] sm:$0xf0]  ;;  %1622 = vmatpush.bf16.msra.mxu0 %v2085_v29  ;;  %v2205_v46 = vor.u32 %v3107_v41, %v2204_v40  ;;  %v2132_v49 = vld [vmem:[%s5012_s1 + $0xb0] sm:$0xf]  ;;  %v3089_v51 = vld [vmem:[%s5012_s1 + $0xb4] sm:$0xf0]  ;;  %v2069_v56 = vor.u32 %v3073_v48, %v2068_v47 }
   0xd   :  { %1635 = vmatpush.bf16.msra.mxu1 %v2149_v33  ;;  %v2269_v50 = vor.u32 %v3123_v43, %v2268_v42  ;;  %v2196_v52 = vld [vmem:[%s5012_s1 + $0x130] sm:$0xf]  ;;  %v3105_v53 = vld [vmem:[%s5012_s1 + $0x134] sm:$0xf0]  ;;  %v2133_v57 = vor.u32 %v3089_v51, %v2132_v49  ;;  %v2060_v59 = vld [vmem:[%s5012_s1 + $0x20] sm:$0xf] }
   0xe   :  { %1648 = vmatpush.bf16.msra.mxu2 %v2213_v34  ;;  %v2260_v54 = vld [vmem:[%s5012_s1 + $0x1b0] sm:$0xf]  ;;  %v3121_v55 = vld [vmem:[%s5012_s1 + $0x1b4] sm:$0xf0]  ;;  %v2197_v58 = vor.u32 %v3105_v53, %v2196_v52  ;;  %v3071_v60 = vld [vmem:[%s5012_s1 + $0x24] sm:$0xf0] }
   0xf   :  { %1661 = vmatpush.bf16.msra.mxu3 %v2277_v38  ;;  %v2124_v61 = vld [vmem:[%s5012_s1 + $0xa0] sm:$0xf]  ;;  %v2261_v62 = vor.u32 %v3121_v55, %v2260_v54  ;;  %v3087_v63 = vld [vmem:[%s5012_s1 + $0xa4] sm:$0xf0]  ;;  %v2061_v4 = vor.u32 %v3071_v60, %v2060_v59  ;;  %v2052_v7 = vld [vmem:[%s5012_s1 + $0x10] sm:$0xf] }
  0x10   :  { %1623 = vmatpush.bf16.msra.mxu0 %v2077_v44  ;;  %v2188_v0 = vld [vmem:[%s5012_s1 + $0x120] sm:$0xf]  ;;  %v3103_v1 = vld [vmem:[%s5012_s1 + $0x124] sm:$0xf0]  ;;  %v2125_v5 = vor.u32 %v3087_v63, %v2124_v61  ;;  %v3069_v8 = vld [vmem:[%s5012_s1 + $0x14] sm:$0xf0] }
  0x11   :  { %1636 = vmatpush.bf16.msra.mxu1 %v2141_v45  ;;  %v2252_v2 = vld [vmem:[%s5012_s1 + $0x1a0] sm:$0xf]  ;;  %v3119_v3 = vld [vmem:[%s5012_s1 + $0x1a4] sm:$0xf0]  ;;  %v2189_v6 = vor.u32 %v3103_v1, %v2188_v0  ;;  %v2116_v9 = vld [vmem:[%s5012_s1 + $0x90] sm:$0xf]  ;;  %v2053_v16 = vor.u32 %v3069_v8, %v2052_v7 }
  0x12   :  { %1649 = vmatpush.bf16.msra.mxu2 %v2205_v46  ;;  %v2253_v10 = vor.u32 %v3119_v3, %v2252_v2  ;;  %v3085_v11 = vld [vmem:[%s5012_s1 + $0x94] sm:$0xf0]  ;;  %v2180_v12 = vld [vmem:[%s5012_s1 + $0x110] sm:$0xf]  ;;  %v2044_v17 = vld [vmem:[%s5012_s1] sm:$0xf] }
  0x13   :  { %1662 = vmatpush.bf16.msra.mxu3 %v2269_v50  ;;  %v3101_v13 = vld [vmem:[%s5012_s1 + $0x114] sm:$0xf0]  ;;  %v2244_v14 = vld [vmem:[%s5012_s1 + $0x190] sm:$0xf]  ;;  %v3067_v18 = vld [vmem:[%s5012_s1 + $0x4] sm:$0xf0]  ;;  %v2117_v19 = vor.u32 %v3085_v11, %v2116_v9 }
  0x14   :  { %1624 = vmatpush.bf16.msra.mxu0 %v2069_v56  ;;  %v3117_v15 = vld [vmem:[%s5012_s1 + $0x194] sm:$0xf0]  ;;  %v2181_v20 = vor.u32 %v3101_v13, %v2180_v12  ;;  %v2108_v21 = vld [vmem:[%s5012_s1 + $0x80] sm:$0xf]  ;;  %v3083_v22 = vld [vmem:[%s5012_s1 + $0x84] sm:$0xf0]  ;;  %v2045_v31 = vor.u32 %v3067_v18, %v2044_v17 }
  0x15   :  { %1637 = vmatpush.bf16.msra.mxu1 %v2133_v57  ;;  %v2172_v23 = vld [vmem:[%s5012_s1 + $0x100] sm:$0xf]  ;;  %v2245_v24 = vor.u32 %v3117_v15, %v2244_v14  ;;  %v3099_v25 = vld [vmem:[%s5012_s1 + $0x104] sm:$0xf0]  ;;  %v2356_v28 = vld [vmem:[%s5012_s1 + $0x270] sm:$0xf]  ;;  %v2109_v35 = vor.u32 %v3083_v22, %v2108_v21 }
  0x16   :  { %1650 = vmatpush.bf16.msra.mxu2 %v2197_v58  ;;  %v2236_v26 = vld [vmem:[%s5012_s1 + $0x180] sm:$0xf]  ;;  %v3115_v27 = vld [vmem:[%s5012_s1 + $0x184] sm:$0xf0]  ;;  %v3145_v29 = vld [vmem:[%s5012_s1 + $0x274] sm:$0xf0]  ;;  %v2173_v36 = vor.u32 %v3099_v25, %v2172_v23 }
  0x17   :  { %1663 = vmatpush.bf16.msra.mxu3 %v2261_v62  ;;  %v2420_v30 = vld [vmem:[%s5012_s1 + $0x2f0] sm:$0xf]  ;;  %v3161_v32 = vld [vmem:[%s5012_s1 + $0x2f4] sm:$0xf0]  ;;  %v2237_v39 = vor.u32 %v3115_v27, %v2236_v26  ;;  %v2357_v40 = vor.u32 %v3145_v29, %v2356_v28  ;;  %v2348_v43 = vld [vmem:[%s5012_s1 + $0x260] sm:$0xf] }
  0x18   :  { %1625 = vmatpush.bf16.msra.mxu0 %v2061_v4  ;;  %v2484_v33 = vld [vmem:[%s5012_s1 + $0x370] sm:$0xf]  ;;  %v3177_v34 = vld [vmem:[%s5012_s1 + $0x374] sm:$0xf0]  ;;  %v2421_v41 = vor.u32 %v3161_v32, %v2420_v30  ;;  %v3143_v44 = vld [vmem:[%s5012_s1 + $0x264] sm:$0xf0] }
  0x19   :  { %1638 = vmatpush.bf16.msra.mxu1 %v2125_v5  ;;  %v2548_v37 = vld [vmem:[%s5012_s1 + $0x3f0] sm:$0xf]  ;;  %v3193_v38 = vld [vmem:[%s5012_s1 + $0x3f4] sm:$0xf0]  ;;  %v2485_v42 = vor.u32 %v3177_v34, %v2484_v33  ;;  %v2412_v45 = vld [vmem:[%s5012_s1 + $0x2e0] sm:$0xf]  ;;  %v2349_v52 = vor.u32 %v3143_v44, %v2348_v43 }
  0x1a   :  { %1651 = vmatpush.bf16.msra.mxu2 %v2189_v6  ;;  %v2549_v46 = vor.u32 %v3193_v38, %v2548_v37  ;;  %v3159_v47 = vld [vmem:[%s5012_s1 + $0x2e4] sm:$0xf0]  ;;  %v2476_v48 = vld [vmem:[%s5012_s1 + $0x360] sm:$0xf]  ;;  %v2340_v53 = vld [vmem:[%s5012_s1 + $0x250] sm:$0xf] }
  0x1b   :  { %1664 = vmatpush.bf16.msra.mxu3 %v2253_v10  ;;  %v3175_v49 = vld [vmem:[%s5012_s1 + $0x364] sm:$0xf0]  ;;  %v2540_v50 = vld [vmem:[%s5012_s1 + $0x3e0] sm:$0xf]  ;;  %v2413_v54 = vor.u32 %v3159_v47, %v2412_v45  ;;  %v3141_v56 = vld [vmem:[%s5012_s1 + $0x254] sm:$0xf0] }
  0x1c   :  { %1626 = vmatpush.bf16.msra.mxu0 %v2053_v16  ;;  %v3191_v51 = vld [vmem:[%s5012_s1 + $0x3e4] sm:$0xf0]  ;;  %v2477_v55 = vor.u32 %v3175_v49, %v2476_v48  ;;  %v2404_v57 = vld [vmem:[%s5012_s1 + $0x2d0] sm:$0xf]  ;;  %v3157_v60 = vld [vmem:[%s5012_s1 + $0x2d4] sm:$0xf0]  ;;  %v2341_v3 = vor.u32 %v3141_v56, %v2340_v53 }
  0x1d   :  { %1639 = vmatpush.bf16.msra.mxu1 %v2117_v19  ;;  %v15_v58 = vld [vmem:[%s5013_s0 + $0x8] sm:$0xff]  ;;  %v2541_v59 = vor.u32 %v3191_v51, %v2540_v50  ;;  %v2468_v61 = vld [vmem:[%s5012_s1 + $0x350] sm:$0xf]  ;;  %v3173_v62 = vld [vmem:[%s5012_s1 + $0x354] sm:$0xf0]  ;;  %v2405_v7 = vor.u32 %v3157_v60, %v2404_v57 }
  0x1e   :  { %1652 = vmatpush.bf16.msra.mxu2 %v2181_v20  ;;  %v294_v63 = vunpack.c.l.b16 %v15_v58  ;;  %v295_v0 = vunpack.c.h.b16 %v15_v58  ;;  %v2532_v1 = vld [vmem:[%s5012_s1 + $0x3d0] sm:$0xf]  ;;  %v3189_v2 = vld [vmem:[%s5012_s1 + $0x3d4] sm:$0xf0]  ;;  %v14_v5 = vld [vmem:[%s5013_s0] sm:$0xff]  ;;  %v2469_v8 = vor.u32 %v3173_v62, %v2468_v61 }
  0x1f   :  { %1665 = vmatpush.bf16.msra.mxu3 %v2245_v24  ;;  %v2332_v9 = vld [vmem:[%s5012_s1 + $0x240] sm:$0xf]  ;;  %v3139_v10 = vld [vmem:[%s5012_s1 + $0x244] sm:$0xf0]  ;;  %v292_v12 = vunpack.c.l.b16 %v14_v5  ;;  %v293_v13 = vunpack.c.h.b16 %v14_v5  ;;  %v2533_v14 = vor.u32 %v3189_v2, %v2532_v1  ;;  %v2324_v25 = vld [vmem:[%s5012_s1 + $0x230] sm:$0xf] }
  0x20   :  { %1627 = vmatpush.bf16.msra.mxu0 %v2045_v31  ;;  %v3609_v4 = vpack.c.b16 %v294_v63, %v294_v63  ;;  %v3614_v6 = vpack.c.b16 %v295_v0, %v295_v0  ;;  %v2396_v11 = vld [vmem:[%s5012_s1 + $0x2c0] sm:$0xf]  ;;  %v3155_v15 = vld [vmem:[%s5012_s1 + $0x2c4] sm:$0xf0]  ;;  %v2333_v22 = vor.u32 %v3139_v10, %v2332_v9  ;;  %v3137_v26 = vld [vmem:[%s5012_s1 + $0x234] sm:$0xf0] }
  0x21   :  { %1640 = vmatpush.bf16.msra.mxu1 %v2109_v35  ;;  %v2460_v16 = vld [vmem:[%s5012_s1 + $0x340] sm:$0xf]  ;;  %v3171_v17 = vld [vmem:[%s5012_s1 + $0x344] sm:$0xf0]  ;;  %v3641_v20 = vpack.c.b16 %v292_v12, %v292_v12  ;;  %v3644_v21 = vpack.c.b16 %v293_v13, %v293_v13  ;;  %v2397_v23 = vor.u32 %v3155_v15, %v2396_v11  ;;  %v2388_v27 = vld [vmem:[%s5012_s1 + $0x2b0] sm:$0xf]  ;;  %v2325_v34 = vor.u32 %v3137_v26, %v2324_v25 }
  0x22   :  { %1653 = vmatpush.bf16.msra.mxu2 %v2173_v36  ;;  %v2524_v18 = vld [vmem:[%s5012_s1 + $0x3c0] sm:$0xf]  ;;  %v3187_v19 = vld [vmem:[%s5012_s1 + $0x3c4] sm:$0xf0]  ;;  %v2461_v24 = vor.u32 %v3171_v17, %v2460_v16  ;;  %v3153_v29 = vld [vmem:[%s5012_s1 + $0x2b4] sm:$0xf0] }
  0x23   :  { %1666 = vmatpush.bf16.msra.mxu3 %v2237_v39  ;;  %v2525_v28 = vor.u32 %v3187_v19, %v2524_v18  ;;  %v2452_v30 = vld [vmem:[%s5012_s1 + $0x330] sm:$0xf]  ;;  %v3169_v31 = vld [vmem:[%s5012_s1 + $0x334] sm:$0xf0]  ;;  %1628 = vmatmul.bf16.vlgmr.msra.gmra.mxu0 %v3641_v20  ;;  %v2389_v35 = vor.u32 %v3153_v29, %v2388_v27  ;;  %v2316_v37 = vld [vmem:[%s5012_s1 + $0x220] sm:$0xf] }
  0x24   :  { %1672 = vmatpush.bf16.msrb.mxu0 %v2357_v40  ;;  %v2516_v32 = vld [vmem:[%s5012_s1 + $0x3b0] sm:$0xf]  ;;  %v3185_v33 = vld [vmem:[%s5012_s1 + $0x3b4] sm:$0xf0]  ;;  %1641 = vmatmul.bf16.vlgmr.msra.gmra.mxu1 %v3644_v21  ;;  %v2453_v36 = vor.u32 %v3169_v31, %v2452_v30  ;;  %v3135_v38 = vld [vmem:[%s5012_s1 + $0x224] sm:$0xf0] }
  0x25   :  { %1685 = vmatpush.bf16.msrb.mxu1 %v2421_v41  ;;  %1654 = vmatmul.bf16.vlgmr.msra.gmra.mxu2 %v3609_v4  ;;  %v2380_v39 = vld [vmem:[%s5012_s1 + $0x2a0] sm:$0xf]  ;;  %v2517_v40 = vor.u32 %v3185_v33, %v2516_v32  ;;  %v3151_v41 = vld [vmem:[%s5012_s1 + $0x2a4] sm:$0xf0]  ;;  %v2308_v49 = vld [vmem:[%s5012_s1 + $0x210] sm:$0xf] }
  0x26   :  { %1698 = vmatpush.bf16.msrb.mxu2 %v2485_v42  ;;  %1667 = vmatmul.bf16.vlgmr.msra.gmra.mxu3 %v3614_v6  ;;  %v2444_v42 = vld [vmem:[%s5012_s1 + $0x320] sm:$0xf]  ;;  %v3167_v43 = vld [vmem:[%s5012_s1 + $0x324] sm:$0xf0]  ;;  %v2381_v47 = vor.u32 %v3151_v41, %v2380_v39  ;;  %v3133_v50 = vld [vmem:[%s5012_s1 + $0x214] sm:$0xf0] }
  0x27   :  { %1711 = vmatpush.bf16.msrb.mxu3 %v2549_v46  ;;  %v2508_v44 = vld [vmem:[%s5012_s1 + $0x3a0] sm:$0xf]  ;;  %v3183_v45 = vld [vmem:[%s5012_s1 + $0x3a4] sm:$0xf0]  ;;  %v2317_v46 = vor.u32 %v3135_v38, %v2316_v37  ;;  %v2445_v48 = vor.u32 %v3167_v43, %v2444_v42  ;;  %v2372_v51 = vld [vmem:[%s5012_s1 + $0x290] sm:$0xf] }
  0x28   :  { %1673 = vmatpush.bf16.msrb.mxu0 %v2349_v52  ;;  %v2509_v52 = vor.u32 %v3183_v45, %v2508_v44  ;;  %v3149_v53 = vld [vmem:[%s5012_s1 + $0x294] sm:$0xf0]  ;;  %v2500_v56 = vld [vmem:[%s5012_s1 + $0x390] sm:$0xf]  ;;  %v2300_v58 = vld [vmem:[%s5012_s1 + $0x200] sm:$0xf] }
  0x29   :  { %1686 = vmatpush.bf16.msrb.mxu1 %v2413_v54  ;;  %v2436_v54 = vld [vmem:[%s5012_s1 + $0x310] sm:$0xf]  ;;  %v3181_v57 = vld [vmem:[%s5012_s1 + $0x394] sm:$0xf0]  ;;  %v3131_v60 = vld [vmem:[%s5012_s1 + $0x204] sm:$0xf0]  ;;  %v2373_v63 = vor.u32 %v3149_v53, %v2372_v51 }
  0x2a   :  { %1699 = vmatpush.bf16.msrb.mxu2 %v2477_v55  ;;  %v3165_v55 = vld [vmem:[%s5012_s1 + $0x314] sm:$0xf0]  ;;  %v2364_v61 = vld [vmem:[%s5012_s1 + $0x280] sm:$0xf]  ;;  %v3147_v62 = vld [vmem:[%s5012_s1 + $0x284] sm:$0xf0]  ;;  %v2501_v5 = vor.u32 %v3181_v57, %v2500_v56  ;;  %v2301_v13 = vor.u32 %v3131_v60, %v2300_v58 }
  0x2b   :  { %1712 = vmatpush.bf16.msrb.mxu3 %v2541_v59  ;;  %v2309_v59 = vor.u32 %v3133_v50, %v2308_v49  ;;  %v2437_v0 = vor.u32 %v3165_v55, %v2436_v54  ;;  %v2428_v1 = vld [vmem:[%s5012_s1 + $0x300] sm:$0xf]  ;;  %v3163_v2 = vld [vmem:[%s5012_s1 + $0x304] sm:$0xf0]  ;;  %v16_v9 = vld [vmem:[%s5013_s0 + $0x10] sm:$0xff]  ;;  %v2365_v18 = vor.u32 %v3147_v62, %v2364_v61 }
  0x2c   :  { %1674 = vmatpush.bf16.msrb.mxu0 %v2341_v3  ;;  %v17_v3 = vld [vmem:[%s5013_s0 + $0x18] sm:$0xff]  ;;  %v2612_v10 = vld [vmem:[%s5012_s1 + $0x470] sm:$0xf]  ;;  %v2429_v19 = vor.u32 %v3163_v2, %v2428_v1  ;;  %v2604_v31 = vld [vmem:[%s5012_s1 + $0x460] sm:$0xf] }
  0x2d   :  { %1687 = vmatpush.bf16.msrb.mxu1 %v2405_v7  ;;  %v2492_v7 = vld [vmem:[%s5012_s1 + $0x380] sm:$0xf]  ;;  %v3209_v11 = vld [vmem:[%s5012_s1 + $0x474] sm:$0xf0]  ;;  %v2676_v12 = vld [vmem:[%s5012_s1 + $0x4f0] sm:$0xf]  ;;  %v298_v17 = vunpack.c.l.b16 %v17_v3  ;;  %v299_v25 = vunpack.c.h.b16 %v17_v3 }
  0x2e   :  { %1700 = vmatpush.bf16.msrb.mxu2 %v2469_v8  ;;  %v3179_v8 = vld [vmem:[%s5012_s1 + $0x384] sm:$0xf0]  ;;  %v2740_v15 = vld [vmem:[%s5012_s1 + $0x570] sm:$0xf]  ;;  %v3241_v16 = vld [vmem:[%s5012_s1 + $0x574] sm:$0xf0]  ;;  %v2613_v27 = vor.u32 %v3209_v11, %v2612_v10 }
  0x2f   :  { %1713 = vmatpush.bf16.msrb.mxu3 %v2533_v14  ;;  %v3225_v14 = vld [vmem:[%s5012_s1 + $0x4f4] sm:$0xf0]  ;;  %v2493_v26 = vor.u32 %v3179_v8, %v2492_v7  ;;  %v2741_v30 = vor.u32 %v3241_v16, %v2740_v15  ;;  %v3207_v32 = vld [vmem:[%s5012_s1 + $0x464] sm:$0xf0]  ;;  %v2668_v33 = vld [vmem:[%s5012_s1 + $0x4e0] sm:$0xf]  ;;  %v3792_v38 = vpack.c.b16 %v298_v17, %v298_v17  ;;  %v3802_v42 = vpack.c.b16 %v299_v25, %v299_v25 }
  0x30   :  { %1675 = vmatpush.bf16.msrb.mxu0 %v2333_v22  ;;  %v2804_v22 = vld [vmem:[%s5012_s1 + $0x5f0] sm:$0xf]  ;;  %v2677_v29 = vor.u32 %v3225_v14, %v2676_v12  ;;  %v3239_v37 = vld [vmem:[%s5012_s1 + $0x564] sm:$0xf0]  ;;  %v2796_v39 = vld [vmem:[%s5012_s1 + $0x5e0] sm:$0xf]  ;;  %v2605_v43 = vor.u32 %v3207_v32, %v2604_v31 }
  0x31   :  { %1688 = vmatpush.bf16.msrb.mxu1 %v2397_v23  ;;  %v3257_v23 = vld [vmem:[%s5012_s1 + $0x5f4] sm:$0xf0]  ;;  %v2660_v49 = vld [vmem:[%s5012_s1 + $0x4d0] sm:$0xf]  ;;  %v3203_v60 = vld [vmem:[%s5012_s1 + $0x444] sm:$0xf0] }
  0x32   :  { %1701 = vmatpush.bf16.msrb.mxu2 %v2461_v24  ;;  %v296_v24 = vunpack.c.l.b16 %v16_v9  ;;  %v3221_v51 = vld [vmem:[%s5012_s1 + $0x4d4] sm:$0xf0]  ;;  %v2788_v54 = vld [vmem:[%s5012_s1 + $0x5d0] sm:$0xf]  ;;  %v2652_v61 = vld [vmem:[%s5012_s1 + $0x4c0] sm:$0xf] }
  0x33   :  { %1714 = vmatpush.bf16.msrb.mxu3 %v2525_v28  ;;  %v297_v28 = vunpack.c.h.b16 %v16_v9  ;;  %v3237_v53 = vld [vmem:[%s5012_s1 + $0x554] sm:$0xf0]  ;;  %v2661_v57 = vor.u32 %v3221_v51, %v2660_v49  ;;  %v3235_v1 = vld [vmem:[%s5012_s1 + $0x544] sm:$0xf0]  ;;  %v2780_v2 = vld [vmem:[%s5012_s1 + $0x5c0] sm:$0xf] }
  0x34   :  { %1676 = vmatpush.bf16.msrb.mxu0 %v2325_v34  ;;  %v2805_v34 = vor.u32 %v3257_v23, %v2804_v22  ;;  %v3800_v41 = vpack.c.b16 %v296_v24, %v296_v24  ;;  %v3253_v55 = vld [vmem:[%s5012_s1 + $0x5d4] sm:$0xf0]  ;;  %v3251_v3 = vld [vmem:[%s5012_s1 + $0x5c4] sm:$0xf0]  ;;  %v2580_v9 = vld [vmem:[%s5012_s1 + $0x430] sm:$0xf] }
  0x35   :  { %1689 = vmatpush.bf16.msrb.mxu1 %v2389_v35  ;;  %v3223_v35 = vld [vmem:[%s5012_s1 + $0x4e4] sm:$0xf0]  ;;  %v3804_v44 = vpack.c.b16 %v297_v28, %v297_v28  ;;  %v2789_v62 = vor.u32 %v3253_v55, %v2788_v54  ;;  %v3201_v10 = vld [vmem:[%s5012_s1 + $0x434] sm:$0xf0]  ;;  %v2644_v11 = vld [vmem:[%s5012_s1 + $0x4b0] sm:$0xf]  ;;  %v2781_v12 = vor.u32 %v3251_v3, %v2780_v2 }
  0x36   :  { %1702 = vmatpush.bf16.msrb.mxu2 %v2453_v36  ;;  %v2732_v36 = vld [vmem:[%s5012_s1 + $0x560] sm:$0xf]  ;;  %v2669_v45 = vor.u32 %v3223_v35, %v2668_v33  ;;  %v2708_v14 = vld [vmem:[%s5012_s1 + $0x530] sm:$0xf]  ;;  %v3233_v15 = vld [vmem:[%s5012_s1 + $0x534] sm:$0xf0] }
  0x37   :  { %1715 = vmatpush.bf16.msrb.mxu3 %v2517_v40  ;;  %v3255_v40 = vld [vmem:[%s5012_s1 + $0x5e4] sm:$0xf0]  ;;  %v2772_v16 = vld [vmem:[%s5012_s1 + $0x5b0] sm:$0xf]  ;;  %v3249_v17 = vld [vmem:[%s5012_s1 + $0x5b4] sm:$0xf0]  ;;  %v2709_v22 = vor.u32 %v3233_v15, %v2708_v14 }
  0x38   :  { %1677 = vmatpush.bf16.msrb.mxu0 %v2317_v46  ;;  %v2733_v46 = vor.u32 %v3239_v37, %v2732_v36  ;;  %v2797_v50 = vor.u32 %v3255_v40, %v2796_v39  ;;  %v2572_v23 = vld [vmem:[%s5012_s1 + $0x420] sm:$0xf]  ;;  %v3199_v24 = vld [vmem:[%s5012_s1 + $0x424] sm:$0xf0]  ;;  %v2564_v35 = vld [vmem:[%s5012_s1 + $0x410] sm:$0xf] }
  0x39   :  { %1690 = vmatpush.bf16.msrb.mxu1 %v2381_v47  ;;  %v2596_v47 = vld [vmem:[%s5012_s1 + $0x450] sm:$0xf]  ;;  %v2636_v25 = vld [vmem:[%s5012_s1 + $0x4a0] sm:$0xf]  ;;  %v3247_v31 = vld [vmem:[%s5012_s1 + $0x5a4] sm:$0xf0]  ;;  %v2573_v32 = vor.u32 %v3199_v24, %v2572_v23 }
  0x3a   :  { %1703 = vmatpush.bf16.msrb.mxu2 %v2445_v48  ;;  %v3205_v48 = vld [vmem:[%s5012_s1 + $0x454] sm:$0xf0]  ;;  %v2700_v28 = vld [vmem:[%s5012_s1 + $0x520] sm:$0xf]  ;;  %v2628_v37 = vld [vmem:[%s5012_s1 + $0x490] sm:$0xf] }
  0x3b   :  { %1716 = vmatpush.bf16.msrb.mxu3 %v2509_v52  ;;  %v2724_v52 = vld [vmem:[%s5012_s1 + $0x550] sm:$0xf]  ;;  %v2597_v56 = vor.u32 %v3205_v48, %v2596_v47  ;;  %v3197_v36 = vld [vmem:[%s5012_s1 + $0x414] sm:$0xf0]  ;;  %v2556_v48 = vld [vmem:[%s5012_s1 + $0x400] sm:$0xf] }
  0x3c   :  { %1678 = vmatpush.bf16.msrb.mxu0 %v2309_v59  ;;  %v2725_v58 = vor.u32 %v3237_v53, %v2724_v52  ;;  %v2588_v59 = vld [vmem:[%s5012_s1 + $0x440] sm:$0xf]  ;;  %v3213_v40 = vld [vmem:[%s5012_s1 + $0x494] sm:$0xf0]  ;;  %v2565_v49 = vor.u32 %v3197_v36, %v2564_v35  ;;  %v3211_v52 = vld [vmem:[%s5012_s1 + $0x484] sm:$0xf0] }
  0x3d   :  { %1691 = vmatpush.bf16.msrb.mxu1 %v2373_v63  ;;  %v3219_v63 = vld [vmem:[%s5012_s1 + $0x4c4] sm:$0xf0]  ;;  %v3245_v47 = vld [vmem:[%s5012_s1 + $0x594] sm:$0xf0]  ;;  %v2620_v51 = vld [vmem:[%s5012_s1 + $0x480] sm:$0xf]  ;;  %v2629_v53 = vor.u32 %v3213_v40, %v2628_v37 }
  0x3e   :  { %1704 = vmatpush.bf16.msrb.mxu2 %v2437_v0  ;;  %v2716_v0 = vld [vmem:[%s5012_s1 + $0x540] sm:$0xf]  ;;  %v2653_v7 = vor.u32 %v3219_v63, %v2652_v61  ;;  %v19_v61 = vld [vmem:[%s5013_s0 + $0x28] sm:$0xff]  ;;  %v3273_v63 = vld [vmem:[%s5012_s1 + $0x674] sm:$0xf0] }
  0x3f   :  { %1717 = vmatpush.bf16.msrb.mxu3 %v2501_v5  ;;  %v2589_v5 = vor.u32 %v3203_v60, %v2588_v59  ;;  %v2717_v8 = vor.u32 %v3235_v1, %v2716_v0  ;;  %v2684_v55 = vld [vmem:[%s5012_s1 + $0x500] sm:$0xf]  ;;  %v3243_v60 = vld [vmem:[%s5012_s1 + $0x584] sm:$0xf0]  ;;  %v2932_v0 = vld [vmem:[%s5012_s1 + $0x6f0] sm:$0xf] }
  0x40   :  { %1679 = vmatpush.bf16.msrb.mxu0 %v2301_v13  ;;  %v3217_v13 = vld [vmem:[%s5012_s1 + $0x4b4] sm:$0xf0]  ;;  %v2748_v59 = vld [vmem:[%s5012_s1 + $0x580] sm:$0xf]  ;;  %v2996_v3 = vld [vmem:[%s5012_s1 + $0x770] sm:$0xf] }
  0x41   :  { %1692 = vmatpush.bf16.msrb.mxu1 %v2365_v18  ;;  %v2581_v18 = vor.u32 %v3201_v10, %v2580_v9  ;;  %v3289_v2 = vld [vmem:[%s5012_s1 + $0x6f4] sm:$0xf0]  ;;  %v3060_v10 = vld [vmem:[%s5012_s1 + $0x7f0] sm:$0xf]  ;;  %v2749_v14 = vor.u32 %v3243_v60, %v2748_v59  ;;  %v2924_v23 = vld [vmem:[%s5012_s1 + $0x6e0] sm:$0xf] }
  0x42   :  { %1705 = vmatpush.bf16.msrb.mxu2 %v2429_v19  ;;  %v2645_v19 = vor.u32 %v3217_v13, %v2644_v11  ;;  %v3321_v11 = vld [vmem:[%s5012_s1 + $0x7f4] sm:$0xf0]  ;;  %v2852_v37 = vld [vmem:[%s5012_s1 + $0x650] sm:$0xf]  ;;  %v3299_v59 = vld [vmem:[%s5012_s1 + $0x744] sm:$0xf0] }
  0x43   :  { %1718 = vmatpush.bf16.msrb.mxu3 %v2493_v26  ;;  %1680 = vmatmul.bf16.vlgmr.msrb.gmra.mxu0 %v3800_v41  ;;  %v2773_v26 = vor.u32 %v3249_v17, %v2772_v16  ;;  %v303_v16 = vunpack.c.h.b16 %v19_v61  ;;  %v2933_v17 = vor.u32 %v3289_v2, %v2932_v0  ;;  %v3061_v24 = vor.u32 %v3321_v11, %v3060_v10  ;;  %v2916_v40 = vld [vmem:[%s5012_s1 + $0x6d0] sm:$0xf]  ;;  %v3036_v60 = vld [vmem:[%s5012_s1 + $0x7c0] sm:$0xf]  ;;  %v3265_v2 = vld [vmem:[%s5012_s1 + $0x634] sm:$0xf0] }
  0x44   :  { %1724 = vmatpush.bf16.msra.mxu0 %v2613_v27  ;;  %1693 = vmatmul.bf16.vlgmr.msrb.gmra.mxu1 %v3804_v44  ;;  %v3215_v27 = vld [vmem:[%s5012_s1 + $0x4a4] sm:$0xf0]  ;;  %v3028_v10 = vld [vmem:[%s5012_s1 + $0x7b0] sm:$0xf]  ;;  %v3313_v11 = vld [vmem:[%s5012_s1 + $0x7b4] sm:$0xf0] }
  0x45   :  { %1737 = vmatpush.bf16.msra.mxu1 %v2677_v29  ;;  %1706 = vmatmul.bf16.vlgmr.msrb.gmra.mxu2 %v3792_v38  ;;  %v3231_v29 = vld [vmem:[%s5012_s1 + $0x524] sm:$0xf0]  ;;  %v2637_v33 = vor.u32 %v3215_v27, %v2636_v25  ;;  %v2988_v27 = vld [vmem:[%s5012_s1 + $0x760] sm:$0xf] }
  0x46   :  { %1750 = vmatpush.bf16.msra.mxu2 %v2741_v30  ;;  %1719 = vmatmul.bf16.vlgmr.msrb.gmra.mxu3 %v3802_v42  ;;  %v2764_v30 = vld [vmem:[%s5012_s1 + $0x5a0] sm:$0xf] }
  0x47   :  { %1763 = vmatpush.bf16.msra.mxu3 %v2805_v34  ;;  %v2701_v34 = vor.u32 %v3231_v29, %v2700_v28  ;;  %v2765_v39 = vor.u32 %v3247_v31, %v2764_v30  ;;  %v3303_v28 = vld [vmem:[%s5012_s1 + $0x764] sm:$0xf0]  ;;  %v3052_v31 = vld [vmem:[%s5012_s1 + $0x7e0] sm:$0xf] }
  0x48   :  { %1725 = vmatpush.bf16.msra.mxu0 %v2605_v43  ;;  %v2692_v43 = vld [vmem:[%s5012_s1 + $0x510] sm:$0xf]  ;;  %v2989_v36 = vor.u32 %v3303_v28, %v2988_v27 }
  0x49   :  { %1738 = vmatpush.bf16.msra.mxu1 %v2669_v45  ;;  %v3229_v45 = vld [vmem:[%s5012_s1 + $0x514] sm:$0xf0] }
  0x4a   :  { %1751 = vmatpush.bf16.msra.mxu2 %v2733_v46  ;;  %v2756_v46 = vld [vmem:[%s5012_s1 + $0x590] sm:$0xf]  ;;  %v2693_v54 = vor.u32 %v3229_v45, %v2692_v43  ;;  %v3285_v45 = vld [vmem:[%s5012_s1 + $0x6d4] sm:$0xf0] }
  0x4b   :  { %1764 = vmatpush.bf16.msra.mxu3 %v2797_v50  ;;  %v3195_v50 = vld [vmem:[%s5012_s1 + $0x404] sm:$0xf0] }
  0x4c   :  { %1726 = vmatpush.bf16.msra.mxu0 %v2597_v56  ;;  %v3227_v56 = vld [vmem:[%s5012_s1 + $0x504] sm:$0xf0]  ;;  %v2557_v1 = vor.u32 %v3195_v50, %v2556_v48  ;;  %v3044_v48 = vld [vmem:[%s5012_s1 + $0x7d0] sm:$0xf] }
  0x4d   :  { %1739 = vmatpush.bf16.msra.mxu1 %v2661_v57  ;;  %v18_v57 = vld [vmem:[%s5013_s0 + $0x20] sm:$0xff]  ;;  %v2685_v9 = vor.u32 %v3227_v56, %v2684_v55 }
  0x4e   :  { %1752 = vmatpush.bf16.msra.mxu2 %v2725_v58  ;;  %v2757_v58 = vor.u32 %v3245_v47, %v2756_v46  ;;  %v301_v13 = vunpack.c.h.b16 %v18_v57  ;;  %v2980_v46 = vld [vmem:[%s5012_s1 + $0x750] sm:$0xf]  ;;  %v3301_v47 = vld [vmem:[%s5012_s1 + $0x754] sm:$0xf0]  ;;  %v2908_v55 = vld [vmem:[%s5012_s1 + $0x6c0] sm:$0xf] }
  0x4f   :  { %1765 = vmatpush.bf16.msra.mxu3 %v2789_v62  ;;  %v2868_v62 = vld [vmem:[%s5012_s1 + $0x670] sm:$0xf] }
  0x50   :  { %1727 = vmatpush.bf16.msra.mxu0 %v2589_v5  ;;  %v3305_v5 = vld [vmem:[%s5012_s1 + $0x774] sm:$0xf0]  ;;  %v2869_v15 = vor.u32 %v3273_v63, %v2868_v62  ;;  %v4006_v30 = vpack.c.b16 %v301_v13, %v301_v13 }
  0x51   :  { %1740 = vmatpush.bf16.msra.mxu1 %v2653_v7  ;;  %v300_v7 = vunpack.c.l.b16 %v18_v57  ;;  %v3283_v57 = vld [vmem:[%s5012_s1 + $0x6c4] sm:$0xf0] }
  0x52   :  { %1753 = vmatpush.bf16.msra.mxu2 %v2717_v8  ;;  %v2621_v8 = vor.u32 %v3211_v52, %v2620_v51  ;;  %v2917_v51 = vor.u32 %v3285_v45, %v2916_v40  ;;  %v2981_v52 = vor.u32 %v3301_v47, %v2980_v46  ;;  %v2909_v63 = vor.u32 %v3283_v57, %v2908_v55  ;;  %v3293_v40 = vld [vmem:[%s5012_s1 + $0x714] sm:$0xf0]  ;;  %v2812_v46 = vld [vmem:[%s5012_s1 + $0x600] sm:$0xf]  ;;  %v20_v55 = vld [vmem:[%s5013_s0 + $0x30] sm:$0xff] }
  0x53   :  { %1766 = vmatpush.bf16.msra.mxu3 %v2781_v12  ;;  %v302_v12 = vunpack.c.l.b16 %v19_v61  ;;  %v3993_v25 = vpack.c.b16 %v300_v7, %v300_v7  ;;  %v3315_v61 = vld [vmem:[%s5012_s1 + $0x7c4] sm:$0xf0]  ;;  %v3281_v7 = vld [vmem:[%s5012_s1 + $0x6b4] sm:$0xf0]  ;;  %v3004_v57 = vld [vmem:[%s5012_s1 + $0x780] sm:$0xf] }
  0x54   :  { %1728 = vmatpush.bf16.msra.mxu0 %v2581_v18  ;;  %v2997_v18 = vor.u32 %v3305_v5, %v2996_v3  ;;  %v2900_v3 = vld [vmem:[%s5012_s1 + $0x6b0] sm:$0xf]  ;;  %v3037_v5 = vor.u32 %v3315_v61, %v3036_v60  ;;  %v3309_v45 = vld [vmem:[%s5012_s1 + $0x794] sm:$0xf0]  ;;  %v3080_v60 = vld [vmem:[%s5012_s1 + $0x74] sm:$0xf] }
  0x55   :  { %1741 = vmatpush.bf16.msra.mxu1 %v2645_v19  ;;  %v2860_v19 = vld [vmem:[%s5012_s1 + $0x660] sm:$0xf]  ;;  %v4004_v29 = vpack.c.b16 %v302_v12, %v302_v12  ;;  %v2901_v13 = vor.u32 %v3281_v7, %v2900_v3  ;;  %v2102_v61 = vld [vmem:[%s5012_s1 + $0x78] sm:$0xf0]  ;;  %v304_v3 = vunpack.c.l.b16 %v20_v55 }
  0x56   :  { %1754 = vmatpush.bf16.msra.mxu2 %v2709_v22  ;;  %v3271_v22 = vld [vmem:[%s5012_s1 + $0x664] sm:$0xf0] }
  0x57   :  { %1767 = vmatpush.bf16.msra.mxu3 %v2773_v26  ;;  %v3287_v26 = vld [vmem:[%s5012_s1 + $0x6e4] sm:$0xf0] }
  0x58   :  { %1729 = vmatpush.bf16.msra.mxu0 %v2573_v32  ;;  %v3319_v32 = vld [vmem:[%s5012_s1 + $0x7e4] sm:$0xf0]  ;;  %v2925_v35 = vor.u32 %v3287_v26, %v2924_v23 }
  0x59   :  { %1742 = vmatpush.bf16.msra.mxu1 %v2637_v33  ;;  %v4014_v33 = vpack.c.b16 %v303_v16, %v303_v16  ;;  %v3053_v43 = vor.u32 %v3319_v32, %v3052_v31  ;;  %v3263_v16 = vld [vmem:[%s5012_s1 + $0x624] sm:$0xf0]  ;;  %v2820_v32 = vld [vmem:[%s5012_s1 + $0x610] sm:$0xf] }
  0x5a   :  { %1755 = vmatpush.bf16.msra.mxu2 %v2701_v34  ;;  %v2861_v34 = vor.u32 %v3271_v22, %v2860_v19  ;;  %v3279_v19 = vld [vmem:[%s5012_s1 + $0x6a4] sm:$0xf0]  ;;  %v2956_v22 = vld [vmem:[%s5012_s1 + $0x720] sm:$0xf] }
  0x5b   :  { %1768 = vmatpush.bf16.msra.mxu3 %v2765_v39  ;;  %v3269_v39 = vld [vmem:[%s5012_s1 + $0x654] sm:$0xf0]  ;;  %v3295_v23 = vld [vmem:[%s5012_s1 + $0x724] sm:$0xf0] }
  0x5c   :  { %1730 = vmatpush.bf16.msra.mxu0 %v2565_v49  ;;  %v3317_v49 = vld [vmem:[%s5012_s1 + $0x7d4] sm:$0xf0]  ;;  %v2853_v50 = vor.u32 %v3269_v39, %v2852_v37  ;;  %v3311_v26 = vld [vmem:[%s5012_s1 + $0x7a4] sm:$0xf0]  ;;  %v2957_v31 = vor.u32 %v3295_v23, %v2956_v22  ;;  %v2948_v39 = vld [vmem:[%s5012_s1 + $0x710] sm:$0xf]  ;;  %v4203_v23 = vpack.c.b16 %v304_v3, %v304_v3 }
  0x5d   :  { %1743 = vmatpush.bf16.msra.mxu1 %v2629_v53  ;;  %v2844_v53 = vld [vmem:[%s5012_s1 + $0x640] sm:$0xf]  ;;  %v3045_v56 = vor.u32 %v3317_v49, %v3044_v48  ;;  %v3277_v37 = vld [vmem:[%s5012_s1 + $0x694] sm:$0xf0]  ;;  %v3259_v48 = vld [vmem:[%s5012_s1 + $0x604] sm:$0xf0] }
  0x5e   :  { %1756 = vmatpush.bf16.msra.mxu2 %v2693_v54  ;;  %v3267_v54 = vld [vmem:[%s5012_s1 + $0x644] sm:$0xf0]  ;;  %v2876_v49 = vld [vmem:[%s5012_s1 + $0x680] sm:$0xf]  ;;  %v3072_v3 = vld [vmem:[%s5012_s1 + $0x34] sm:$0xf] }
  0x5f   :  { %1769 = vmatpush.bf16.msra.mxu3 %v2757_v58  ;;  %v2972_v58 = vld [vmem:[%s5012_s1 + $0x740] sm:$0xf]  ;;  %v2845_v62 = vor.u32 %v3267_v54, %v2844_v53  ;;  %v3291_v54 = vld [vmem:[%s5012_s1 + $0x704] sm:$0xf0] }
  0x60   :  { %1731 = vmatpush.bf16.msra.mxu0 %v2557_v1  ;;  %v2973_v0 = vor.u32 %v3299_v59, %v2972_v58  ;;  %v2836_v1 = vld [vmem:[%s5012_s1 + $0x630] sm:$0xf]  ;;  %v2940_v53 = vld [vmem:[%s5012_s1 + $0x700] sm:$0xf]  ;;  %v3307_v58 = vld [vmem:[%s5012_s1 + $0x784] sm:$0xf0] }
  0x61   :  { %1744 = vmatpush.bf16.msra.mxu1 %v2621_v8  ;;  %v2964_v8 = vld [vmem:[%s5012_s1 + $0x730] sm:$0xf]  ;;  %v2837_v12 = vor.u32 %v3265_v2, %v2836_v1  ;;  %v21_v59 = vld [vmem:[%s5013_s0 + $0x38] sm:$0xff]  ;;  %v3112_v1 = vld [vmem:[%s5012_s1 + $0x174] sm:$0xf]  ;;  %v2941_v7 = vor.u32 %v3291_v54, %v2940_v53 }
  0x62   :  { %1757 = vmatpush.bf16.msra.mxu2 %v2685_v9  ;;  %v3297_v9 = vld [vmem:[%s5012_s1 + $0x734] sm:$0xf0]  ;;  %v2230_v2 = vld [vmem:[%s5012_s1 + $0x178] sm:$0xf0] }
  0x63   :  { %1770 = vmatpush.bf16.msra.mxu3 %v2749_v14  ;;  %1732 = vmatmul.bf16.vlgmr.msra.gmra.mxu0 %v3993_v25  ;;  %v2965_v14 = vor.u32 %v3297_v9, %v2964_v8  ;;  %v3128_v8 = vld [vmem:[%s5012_s1 + $0x1f4] sm:$0xf]  ;;  %v2294_v9 = vld [vmem:[%s5012_s1 + $0x1f8] sm:$0xf0] }
  0x64   :  { %1776 = vmatpush.bf16.msrb.mxu0 %v2869_v15  ;;  %1745 = vmatmul.bf16.vlgmr.msra.gmra.mxu1 %v4006_v30  ;;  %v2828_v15 = vld [vmem:[%s5012_s1 + $0x620] sm:$0xf]  ;;  %v2297_v22 = vor.u32 %v3128_v8, %v2294_v9  ;;  %v2134_v9 = vld [vmem:[%s5012_s1 + $0xb8] sm:$0xf0] }
  0x65   :  { %1789 = vmatpush.bf16.msrb.mxu1 %v2933_v17  ;;  %1758 = vmatmul.bf16.vlgmr.msra.gmra.mxu2 %v4004_v29  ;;  %v2892_v17 = vld [vmem:[%s5012_s1 + $0x6a0] sm:$0xf]  ;;  %v2829_v27 = vor.u32 %v3263_v16, %v2828_v15  ;;  %v2233_v16 = vor.u32 %v3112_v1, %v2230_v2 }
  0x66   :  { %1802 = vmatpush.bf16.msrb.mxu2 %v2997_v18  ;;  %1771 = vmatmul.bf16.vlgmr.msra.gmra.mxu3 %v4014_v33  ;;  %v3029_v18 = vor.u32 %v3313_v11, %v3028_v10  ;;  %v2893_v28 = vor.u32 %v3279_v19, %v2892_v17  ;;  %v306_v10 = vunpack.c.l.b16 %v21_v59  ;;  %v305_v11 = vunpack.c.h.b16 %v20_v55  ;;  %v3078_v17 = vld [vmem:[%s5012_s1 + $0x64] sm:$0xf] }
  0x67   :  { %1815 = vmatpush.bf16.msrb.mxu3 %v3061_v24  ;;  %v3020_v24 = vld [vmem:[%s5012_s1 + $0x7a0] sm:$0xf]  ;;  %v3094_v19 = vld [vmem:[%s5012_s1 + $0xe4] sm:$0xf] }
  0x68   :  { %1777 = vmatpush.bf16.msrb.mxu0 %v2861_v34  ;;  %v3261_v34 = vld [vmem:[%s5012_s1 + $0x614] sm:$0xf0]  ;;  %v3074_v55 = vld [vmem:[%s5012_s1 + $0x44] sm:$0xf] }
  0x69   :  { %1790 = vmatpush.bf16.msrb.mxu1 %v2925_v35  ;;  %v2884_v35 = vld [vmem:[%s5012_s1 + $0x690] sm:$0xf]  ;;  %v2821_v47 = vor.u32 %v3261_v34, %v2820_v32  ;;  %v3126_v32 = vld [vmem:[%s5012_s1 + $0x1e4] sm:$0xf]  ;;  %v2286_v34 = vld [vmem:[%s5012_s1 + $0x1e8] sm:$0xf0] }
  0x6a   :  { %1803 = vmatpush.bf16.msrb.mxu2 %v2989_v36  ;;  %v3021_v36 = vor.u32 %v3311_v26, %v3020_v24  ;;  %v2158_v24 = vld [vmem:[%s5012_s1 + $0xe8] sm:$0xf0]  ;;  %v3110_v26 = vld [vmem:[%s5012_s1 + $0x164] sm:$0xf] }
  0x6b   :  { %1816 = vmatpush.bf16.msrb.mxu3 %v3053_v43  ;;  %v3012_v43 = vld [vmem:[%s5012_s1 + $0x790] sm:$0xf] }
  0x6c   :  { %1778 = vmatpush.bf16.msrb.mxu0 %v2853_v50  ;;  %v3275_v50 = vld [vmem:[%s5012_s1 + $0x684] sm:$0xf0] }
  0x6d   :  { %1791 = vmatpush.bf16.msrb.mxu1 %v2917_v51  ;;  %v2885_v51 = vor.u32 %v3277_v37, %v2884_v35  ;;  %v2161_v37 = vor.u32 %v3094_v19, %v2158_v24  ;;  %v3086_v19 = vld [vmem:[%s5012_s1 + $0xa4] sm:$0xf]  ;;  %v2126_v24 = vld [vmem:[%s5012_s1 + $0xa8] sm:$0xf0] }
  0x6e   :  { %1804 = vmatpush.bf16.msrb.mxu2 %v2981_v52  ;;  %v2949_v52 = vor.u32 %v3293_v40, %v2948_v39  ;;  %v3076_v40 = vld [vmem:[%s5012_s1 + $0x54] sm:$0xf] }
  0x6f   :  { %1817 = vmatpush.bf16.msrb.mxu3 %v3045_v56  ;;  %v3013_v56 = vor.u32 %v3309_v45, %v3012_v43  ;;  %v2086_v43 = vld [vmem:[%s5012_s1 + $0x58] sm:$0xf0]  ;;  %v3092_v45 = vld [vmem:[%s5012_s1 + $0xd4] sm:$0xf] }
  0x70   :  { %1779 = vmatpush.bf16.msrb.mxu0 %v2845_v62  ;;  %v3096_v62 = vld [vmem:[%s5012_s1 + $0xf4] sm:$0xf] }
  0x71   :  { %1792 = vmatpush.bf16.msrb.mxu1 %v2909_v63  ;;  %v2813_v63 = vor.u32 %v3259_v48, %v2812_v46  ;;  %v2289_v46 = vor.u32 %v3126_v32, %v2286_v34  ;;  %v3108_v48 = vld [vmem:[%s5012_s1 + $0x154] sm:$0xf]  ;;  %v3118_v32 = vld [vmem:[%s5012_s1 + $0x1a4] sm:$0xf]  ;;  %v2254_v34 = vld [vmem:[%s5012_s1 + $0x1a8] sm:$0xf0] }
  0x72   :  { %1805 = vmatpush.bf16.msrb.mxu2 %v2973_v0  ;;  %v2166_v0 = vld [vmem:[%s5012_s1 + $0xf8] sm:$0xf0] }
  0x73   :  { %1818 = vmatpush.bf16.msrb.mxu3 %v3037_v5  ;;  %v2877_v5 = vor.u32 %v3275_v50, %v2876_v49  ;;  %v2169_v15 = vor.u32 %v3096_v62, %v2166_v0  ;;  %v2214_v49 = vld [vmem:[%s5012_s1 + $0x158] sm:$0xf0]  ;;  %v3124_v50 = vld [vmem:[%s5012_s1 + $0x1d4] sm:$0xf]  ;;  %v3122_v62 = vld [vmem:[%s5012_s1 + $0x1c4] sm:$0xf] }
  0x74   :  { %1780 = vmatpush.bf16.msrb.mxu0 %v2837_v12  ;;  %v3005_v12 = vor.u32 %v3307_v58, %v3004_v57  ;;  %v2217_v54 = vor.u32 %v3108_v48, %v2214_v49  ;;  %v3090_v57 = vld [vmem:[%s5012_s1 + $0xc4] sm:$0xf]  ;;  %v3100_v48 = vld [vmem:[%s5012_s1 + $0x114] sm:$0xf]  ;;  %v2182_v49 = vld [vmem:[%s5012_s1 + $0x118] sm:$0xf0] }
  0x75   :  { %1793 = vmatpush.bf16.msrb.mxu1 %v2901_v13  ;;  %v2105_v13 = vor.u32 %v3080_v60, %v2102_v61  ;;  %v3106_v60 = vld [vmem:[%s5012_s1 + $0x144] sm:$0xf]  ;;  %v2206_v61 = vld [vmem:[%s5012_s1 + $0x148] sm:$0xf0] }
  0x76   :  { %1806 = vmatpush.bf16.msrb.mxu2 %v2965_v14  ;;  %v307_v14 = vunpack.c.h.b16 %v21_v59  ;;  %v2142_v59 = vld [vmem:[%s5012_s1 + $0xc8] sm:$0xf0]  ;;  %v2209_v2 = vor.u32 %v3106_v60, %v2206_v61 }
  0x77   :  { %1819 = vmatpush.bf16.msrb.mxu3 %v3029_v18  ;;  %v2094_v18 = vld [vmem:[%s5012_s1 + $0x68] sm:$0xf0]  ;;  %v2145_v1 = vor.u32 %v3090_v57, %v2142_v59  ;;  %v3082_v57 = vld [vmem:[%s5012_s1 + $0x84] sm:$0xf] }
  0x78   :  { %1781 = vmatpush.bf16.msrb.mxu0 %v2829_v27  ;;  %v2222_v27 = vld [vmem:[%s5012_s1 + $0x168] sm:$0xf0]  ;;  %v4224_v35 = vpack.c.b16 %v307_v14, %v307_v14  ;;  %v3098_v59 = vld [vmem:[%s5012_s1 + $0x104] sm:$0xf] }
  0x79   :  { %1794 = vmatpush.bf16.msrb.mxu1 %v2893_v28  ;;  %v4214_v28 = vpack.c.b16 %v306_v10, %v306_v10  ;;  %v2225_v39 = vor.u32 %v3110_v26, %v2222_v27  ;;  %v3104_v10 = vld [vmem:[%s5012_s1 + $0x134] sm:$0xf]  ;;  %v3102_v26 = vld [vmem:[%s5012_s1 + $0x124] sm:$0xf]  ;;  %v2190_v27 = vld [vmem:[%s5012_s1 + $0x128] sm:$0xf0] }
  0x7a   :  { %1807 = vmatpush.bf16.msrb.mxu2 %v2957_v31  ;;  %v4216_v31 = vpack.c.b16 %v305_v11, %v305_v11  ;;  %v2198_v11 = vld [vmem:[%s5012_s1 + $0x138] sm:$0xf0]  ;;  %v2174_v61 = vld [vmem:[%s5012_s1 + $0x108] sm:$0xf0] }
  0x7b   :  { %1820 = vmatpush.bf16.msrb.mxu3 %v3021_v36  ;;  %v2097_v36 = vor.u32 %v3078_v17, %v2094_v18  ;;  %v3070_v17 = vld [vmem:[%s5012_s1 + $0x24] sm:$0xf]  ;;  %v2062_v18 = vld [vmem:[%s5012_s1 + $0x28] sm:$0xf0] }
  0x7c   :  { %1782 = vmatpush.bf16.msrb.mxu0 %v2821_v47  ;;  %v2150_v47 = vld [vmem:[%s5012_s1 + $0xd8] sm:$0xf0] }
  0x7d   :  { %1795 = vmatpush.bf16.msrb.mxu1 %v2885_v51  ;;  %v2278_v51 = vld [vmem:[%s5012_s1 + $0x1d8] sm:$0xf0]  ;;  %v2153_v53 = vor.u32 %v3092_v45, %v2150_v47  ;;  %v3084_v45 = vld [vmem:[%s5012_s1 + $0x94] sm:$0xf] }
  0x7e   :  { %1808 = vmatpush.bf16.msrb.mxu2 %v2949_v52  ;;  %v2089_v52 = vor.u32 %v3076_v40, %v2086_v43  ;;  %v2281_v58 = vor.u32 %v3124_v50, %v2278_v51  ;;  %v3068_v40 = vld [vmem:[%s5012_s1 + $0x14] sm:$0xf]  ;;  %v2054_v43 = vld [vmem:[%s5012_s1 + $0x18] sm:$0xf0] }
  0x7f   :  { %1821 = vmatpush.bf16.msrb.mxu3 %v3013_v56  ;;  %v2078_v56 = vld [vmem:[%s5012_s1 + $0x48] sm:$0xf0]  ;;  %v2118_v47 = vld [vmem:[%s5012_s1 + $0x98] sm:$0xf0]  ;;  %v3116_v50 = vld [vmem:[%s5012_s1 + $0x194] sm:$0xf] }
  0x80   :  { %1783 = vmatpush.bf16.msrb.mxu0 %v2813_v63  ;;  %v2270_v63 = vld [vmem:[%s5012_s1 + $0x1c8] sm:$0xf0]  ;;  %v2081_v0 = vor.u32 %v3074_v55, %v2078_v56  ;;  %v2246_v51 = vld [vmem:[%s5012_s1 + $0x198] sm:$0xf0]  ;;  %v2121_v55 = vor.u32 %v3084_v45, %v2118_v47  ;;  %v2185_v56 = vor.u32 %v3100_v48, %v2182_v49  ;;  %v3156_v45 = vld [vmem:[%s5012_s1 + $0x2d4] sm:$0xf] }
  0x81   :  { %1796 = vmatpush.bf16.msrb.mxu1 %v2877_v5  ;;  %v2070_v5 = vld [vmem:[%s5012_s1 + $0x38] sm:$0xf0]  ;;  %v2273_v8 = vor.u32 %v3122_v62, %v2270_v63  ;;  %v2249_v60 = vor.u32 %v3116_v50, %v2246_v51  ;;  %v3114_v62 = vld [vmem:[%s5012_s1 + $0x184] sm:$0xf]  ;;  %v2238_v63 = vld [vmem:[%s5012_s1 + $0x188] sm:$0xf0] }
  0x82   :  { %1809 = vmatpush.bf16.msrb.mxu2 %v2941_v7  ;;  %v3088_v7 = vld [vmem:[%s5012_s1 + $0xb4] sm:$0xf]  ;;  %v2073_v14 = vor.u32 %v3072_v3, %v2070_v5  ;;  %v2422_v5 = vld [vmem:[%s5012_s1 + $0x2f8] sm:$0xf0] }
  0x83   :  { %1822 = vmatpush.bf16.msrb.mxu3 %v3005_v12  ;;  %1784 = vmatmul.bf16.vlgmr.msrb.gmra.mxu0 %v4203_v23  ;;  %v3120_v12 = vld [vmem:[%s5012_s1 + $0x1b4] sm:$0xf]  ;;  %v2406_v47 = vld [vmem:[%s5012_s1 + $0x2d8] sm:$0xf0] }
  0x84   :  { %1828 = vmatpush.bf16.msra.mxu0 %v2105_v13  ;;  %1797 = vmatmul.bf16.vlgmr.msrb.gmra.mxu1 %v4216_v31  ;;  %v2262_v13 = vld [vmem:[%s5012_s1 + $0x1b8] sm:$0xf0]  ;;  %v3172_v48 = vld [vmem:[%s5012_s1 + $0x354] sm:$0xf] }
  0x85   :  { %1841 = vmatpush.bf16.msra.mxu1 %v2169_v15  ;;  %1810 = vmatmul.bf16.vlgmr.msrb.gmra.mxu2 %v4214_v28  ;;  %v2137_v15 = vor.u32 %v3088_v7, %v2134_v9  ;;  %v3176_v7 = vld [vmem:[%s5012_s1 + $0x374] sm:$0xf]  ;;  %v2470_v49 = vld [vmem:[%s5012_s1 + $0x358] sm:$0xf0] }
  0x86   :  { %1854 = vmatpush.bf16.msra.mxu2 %v2233_v16  ;;  %1823 = vmatmul.bf16.vlgmr.msrb.gmra.mxu3 %v4224_v35  ;;  %v2201_v16 = vor.u32 %v3104_v10, %v2198_v11  ;;  %v2177_v10 = vor.u32 %v3098_v59, %v2174_v61  ;;  %v3192_v11 = vld [vmem:[%s5012_s1 + $0x3f4] sm:$0xf]  ;;  %v2534_v51 = vld [vmem:[%s5012_s1 + $0x3d8] sm:$0xf0]  ;;  %v2526_v59 = vld [vmem:[%s5012_s1 + $0x3c8] sm:$0xf0] }
  0x87   :  { %1867 = vmatpush.bf16.msra.mxu3 %v2297_v22  ;;  %v2265_v22 = vor.u32 %v3120_v12, %v2262_v13  ;;  %v2550_v12 = vld [vmem:[%s5012_s1 + $0x3f8] sm:$0xf0]  ;;  %v2241_v13 = vor.u32 %v3114_v62, %v2238_v63  ;;  %v3188_v50 = vld [vmem:[%s5012_s1 + $0x3d4] sm:$0xf] }
  0x88   :  { %1829 = vmatpush.bf16.msra.mxu0 %v2097_v36  ;;  %v2065_v36 = vor.u32 %v3070_v17, %v2062_v18  ;;  %v3142_v17 = vld [vmem:[%s5012_s1 + $0x264] sm:$0xf]  ;;  %v2350_v18 = vld [vmem:[%s5012_s1 + $0x268] sm:$0xf0]  ;;  %v3136_v63 = vld [vmem:[%s5012_s1 + $0x234] sm:$0xf] }
  0x89   :  { %1842 = vmatpush.bf16.msra.mxu1 %v2161_v37  ;;  %v2129_v37 = vor.u32 %v3086_v19, %v2126_v24  ;;  %v3158_v19 = vld [vmem:[%s5012_s1 + $0x2e4] sm:$0xf]  ;;  %v2414_v24 = vld [vmem:[%s5012_s1 + $0x2e8] sm:$0xf0] }
  0x8a   :  { %1855 = vmatpush.bf16.msra.mxu2 %v2225_v39  ;;  %v2193_v39 = vor.u32 %v3102_v26, %v2190_v27  ;;  %v3174_v26 = vld [vmem:[%s5012_s1 + $0x364] sm:$0xf]  ;;  %v2478_v27 = vld [vmem:[%s5012_s1 + $0x368] sm:$0xf0] }
  0x8b   :  { %1868 = vmatpush.bf16.msra.mxu3 %v2289_v46  ;;  %v2257_v46 = vor.u32 %v3118_v32, %v2254_v34  ;;  %v3190_v32 = vld [vmem:[%s5012_s1 + $0x3e4] sm:$0xf]  ;;  %v2542_v34 = vld [vmem:[%s5012_s1 + $0x3e8] sm:$0xf0] }
  0x8c   :  { %1830 = vmatpush.bf16.msra.mxu0 %v2089_v52  ;;  %v2057_v52 = vor.u32 %v3068_v40, %v2054_v43  ;;  %v3140_v40 = vld [vmem:[%s5012_s1 + $0x254] sm:$0xf]  ;;  %v2342_v43 = vld [vmem:[%s5012_s1 + $0x258] sm:$0xf0] }
  0x8d   :  { %1843 = vmatpush.bf16.msra.mxu1 %v2153_v53  ;;  %v3066_v53 = vld [vmem:[%s5012_s1 + $0x4] sm:$0xf] }
  0x8e   :  { %1856 = vmatpush.bf16.msra.mxu2 %v2217_v54  ;;  %v2046_v54 = vld [vmem:[%s5012_s1 + $0x8] sm:$0xf0] }
  0x8f   :  { %1869 = vmatpush.bf16.msra.mxu3 %v2281_v58  ;;  %v2110_v58 = vld [vmem:[%s5012_s1 + $0x88] sm:$0xf0]  ;;  %v2049_v3 = vor.u32 %v3066_v53, %v2046_v54  ;;  %v2409_v53 = vor.u32 %v3156_v45, %v2406_v47  ;;  %v3138_v54 = vld [vmem:[%s5012_s1 + $0x244] sm:$0xf]  ;;  %v3164_v47 = vld [vmem:[%s5012_s1 + $0x314] sm:$0xf] }
  0x90   :  { %1831 = vmatpush.bf16.msra.mxu0 %v2081_v0  ;;  %v3144_v0 = vld [vmem:[%s5012_s1 + $0x274] sm:$0xf]  ;;  %v2113_v9 = vor.u32 %v3082_v57, %v2110_v58  ;;  %v2462_v57 = vld [vmem:[%s5012_s1 + $0x348] sm:$0xf0]  ;;  %v3186_v58 = vld [vmem:[%s5012_s1 + $0x3c4] sm:$0xf] }
  0x91   :  { %1844 = vmatpush.bf16.msra.mxu1 %v2145_v1  ;;  %v2358_v1 = vld [vmem:[%s5012_s1 + $0x278] sm:$0xf0] }
  0x92   :  { %1857 = vmatpush.bf16.msra.mxu2 %v2209_v2  ;;  %v3160_v2 = vld [vmem:[%s5012_s1 + $0x2f4] sm:$0xf] }
  0x93   :  { %1870 = vmatpush.bf16.msra.mxu3 %v2273_v8  ;;  %v2486_v8 = vld [vmem:[%s5012_s1 + $0x378] sm:$0xf0] }
  0x94   :  { %1832 = vmatpush.bf16.msra.mxu0 %v2073_v14  ;;  %v2361_v14 = vor.u32 %v3144_v0, %v2358_v1  ;;  %v2326_v0 = vld [vmem:[%s5012_s1 + $0x238] sm:$0xf0]  ;;  %v3152_v1 = vld [vmem:[%s5012_s1 + $0x2b4] sm:$0xf] }
  0x95   :  { %1845 = vmatpush.bf16.msra.mxu1 %v2137_v15  ;;  %v2425_v15 = vor.u32 %v3160_v2, %v2422_v5  ;;  %v2529_v2 = vor.u32 %v3186_v58, %v2526_v59  ;;  %v3168_v5 = vld [vmem:[%s5012_s1 + $0x334] sm:$0xf]  ;;  %v3178_v58 = vld [vmem:[%s5012_s1 + $0x384] sm:$0xf]  ;;  %v2494_v59 = vld [vmem:[%s5012_s1 + $0x388] sm:$0xf0] }
  0x96   :  { %1858 = vmatpush.bf16.msra.mxu2 %v2201_v16  ;;  %v2489_v16 = vor.u32 %v3176_v7, %v2486_v8  ;;  %v2454_v7 = vld [vmem:[%s5012_s1 + $0x338] sm:$0xf0]  ;;  %v3184_v8 = vld [vmem:[%s5012_s1 + $0x3b4] sm:$0xf] }
  0x97   :  { %1871 = vmatpush.bf16.msra.mxu3 %v2265_v22  ;;  %v2553_v22 = vor.u32 %v3192_v11, %v2550_v12  ;;  %v2457_v12 = vor.u32 %v3168_v5, %v2454_v7 }
  0x98   :  { %1833 = vmatpush.bf16.msra.mxu0 %v2065_v36  ;;  %v2353_v36 = vor.u32 %v3142_v17, %v2350_v18  ;;  %v2382_v17 = vld [vmem:[%s5012_s1 + $0x2a8] sm:$0xf0]  ;;  %v3166_v18 = vld [vmem:[%s5012_s1 + $0x324] sm:$0xf] }
  0x99   :  { %1846 = vmatpush.bf16.msra.mxu1 %v2129_v37  ;;  %v2417_v37 = vor.u32 %v3158_v19, %v2414_v24  ;;  %v2446_v19 = vld [vmem:[%s5012_s1 + $0x328] sm:$0xf0] }
  0x9a   :  { %1859 = vmatpush.bf16.msra.mxu2 %v2193_v39  ;;  %v2481_v39 = vor.u32 %v3174_v26, %v2478_v27  ;;  %v2510_v24 = vld [vmem:[%s5012_s1 + $0x3a8] sm:$0xf0] }
  0x9b   :  { %1872 = vmatpush.bf16.msra.mxu3 %v2257_v46  ;;  %v2545_v46 = vor.u32 %v3190_v32, %v2542_v34 }
  0x9c   :  { %1834 = vmatpush.bf16.msra.mxu0 %v2057_v52  ;;  %v2345_v52 = vor.u32 %v3140_v40, %v2342_v43  ;;  %v3148_v40 = vld [vmem:[%s5012_s1 + $0x294] sm:$0xf] }
  0x9d   :  { %1847 = vmatpush.bf16.msra.mxu1 %v2121_v55  ;;  %v2334_v55 = vld [vmem:[%s5012_s1 + $0x248] sm:$0xf0] }
  0x9e   :  { %1860 = vmatpush.bf16.msra.mxu2 %v2185_v56  ;;  %v3170_v56 = vld [vmem:[%s5012_s1 + $0x344] sm:$0xf] }
  0x9f   :  { %1873 = vmatpush.bf16.msra.mxu3 %v2249_v60  ;;  %v2337_v60 = vor.u32 %v3138_v54, %v2334_v55  ;;  %v2465_v62 = vor.u32 %v3170_v56, %v2462_v57  ;;  %v2430_v57 = vld [vmem:[%s5012_s1 + $0x308] sm:$0xf0] }
  0xa0   :  { %1835 = vmatpush.bf16.msra.mxu0 %v2049_v3  ;;  %v2390_v3 = vld [vmem:[%s5012_s1 + $0x2b8] sm:$0xf0]  ;;  %v4522_v26 = vpop.f32.mrf.mxu0 }
  0xa1   :  { %1848 = vmatpush.bf16.msra.mxu1 %v2113_v9  ;;  %v2518_v9 = vld [vmem:[%s5012_s1 + $0x3b8] sm:$0xf0]  ;;  %v2393_v11 = vor.u32 %v3152_v1, %v2390_v3  ;;  %v4524_v32 = vpop.f32.mrf.mxu1 }
  0xa2   :  { %1861 = vmatpush.bf16.msra.mxu2 %v2177_v10  ;;  %v2329_v10 = vor.u32 %v3136_v63, %v2326_v0  ;;  %v2678_v1 = vld [vmem:[%s5012_s1 + $0x4f8] sm:$0xf0] }
  0xa3   :  { %1874 = vmatpush.bf16.msra.mxu3 %v2241_v13  ;;  %1836 = vmatmul.bf16.vlgmr.msra.gmra.mxu0 %v3641_v20  ;;  %v2537_v20 = vor.u32 %v3188_v50, %v2534_v51  ;;  %v3134_v13 = vld [vmem:[%s5012_s1 + $0x224] sm:$0xf]  ;;  %v3180_v50 = vld [vmem:[%s5012_s1 + $0x394] sm:$0xf]  ;;  %v2502_v51 = vld [vmem:[%s5012_s1 + $0x398] sm:$0xf0] }
  0xa4   :  { %1880 = vmatpush.bf16.msrb.mxu0 %v2361_v14  ;;  %1849 = vmatmul.bf16.vlgmr.msra.gmra.mxu1 %v3644_v21  ;;  %v2398_v21 = vld [vmem:[%s5012_s1 + $0x2c8] sm:$0xf0]  ;;  %v2505_v56 = vor.u32 %v3180_v50, %v2502_v51  ;;  %v2742_v3 = vld [vmem:[%s5012_s1 + $0x578] sm:$0xf0] }
  0xa5   :  { %1893 = vmatpush.bf16.msrb.mxu1 %v2425_v15  ;;  %1862 = vmatmul.bf16.vlgmr.msra.gmra.mxu2 %v3609_v4  ;;  %v2473_v4 = vor.u32 %v3172_v48, %v2470_v49  ;;  %v2318_v14 = vld [vmem:[%s5012_s1 + $0x228] sm:$0xf0]  ;;  %v3150_v15 = vld [vmem:[%s5012_s1 + $0x2a4] sm:$0xf]  ;;  %v2438_v48 = vld [vmem:[%s5012_s1 + $0x318] sm:$0xf0] }
  0xa6   :  { %1906 = vmatpush.bf16.msrb.mxu2 %v2489_v16  ;;  %1875 = vmatmul.bf16.vlgmr.msra.gmra.mxu3 %v3614_v6  ;;  %v3154_v6 = vld [vmem:[%s5012_s1 + $0x2c4] sm:$0xf]  ;;  %v2521_v16 = vor.u32 %v3184_v8, %v2518_v9  ;;  %v2321_v27 = vor.u32 %v3134_v13, %v2318_v14  ;;  %v2385_v34 = vor.u32 %v3150_v15, %v2382_v17  ;;  %v3256_v9 = vld [vmem:[%s5012_s1 + $0x5f4] sm:$0xf]  ;;  %v2662_v51 = vld [vmem:[%s5012_s1 + $0x4d8] sm:$0xf0] }
  0xa7   :  { %1919 = vmatpush.bf16.msrb.mxu3 %v2553_v22  ;;  %v2401_v61 = vor.u32 %v3154_v6, %v2398_v21  ;;  %v3182_v22 = vld [vmem:[%s5012_s1 + $0x3a4] sm:$0xf]  ;;  %v2441_v55 = vor.u32 %v3164_v47, %v2438_v48  ;;  %v2598_v47 = vld [vmem:[%s5012_s1 + $0x458] sm:$0xf0]  ;;  %v3220_v48 = vld [vmem:[%s5012_s1 + $0x4d4] sm:$0xf] }
  0xa8   :  { %1881 = vmatpush.bf16.msrb.mxu0 %v2353_v36  ;;  %v2449_v36 = vor.u32 %v3166_v18, %v2446_v19  ;;  %v4535_v43 = vpop.f32.mrf.mxu2  ;;  %v2513_v45 = vor.u32 %v3182_v22, %v2510_v24  ;;  %v3146_v6 = vld [vmem:[%s5012_s1 + $0x284] sm:$0xf]  ;;  %v1631_v63 = vpop.f32.mrf.mxu0  ;;  %v2606_v18 = vld [vmem:[%s5012_s1 + $0x468] sm:$0xf0] }
  0xa9   :  { %1894 = vmatpush.bf16.msrb.mxu1 %v2417_v37  ;;  %v3132_v37 = vld [vmem:[%s5012_s1 + $0x214] sm:$0xf]  ;;  %v4546_v49 = vpop.f32.mrf.mxu3  ;;  %v3162_v21 = vld [vmem:[%s5012_s1 + $0x304] sm:$0xf]  ;;  %v1644_v5 = vpop.f32.mrf.mxu1  ;;  %v2670_v24 = vld [vmem:[%s5012_s1 + $0x4e8] sm:$0xf0] }
  0xaa   :  { %1907 = vmatpush.bf16.msrb.mxu2 %v2481_v39  ;;  %v2310_v39 = vld [vmem:[%s5012_s1 + $0x218] sm:$0xf0]  ;;  %v2433_v8 = vor.u32 %v3162_v21, %v2430_v57  ;;  %v3206_v17 = vld [vmem:[%s5012_s1 + $0x464] sm:$0xf]  ;;  %v2718_v57 = vld [vmem:[%s5012_s1 + $0x548] sm:$0xf0] }
  0xab   :  { %1920 = vmatpush.bf16.msrb.mxu3 %v2545_v46  ;;  %v2374_v46 = vld [vmem:[%s5012_s1 + $0x298] sm:$0xf0]  ;;  %v3222_v19 = vld [vmem:[%s5012_s1 + $0x4e4] sm:$0xf] }
  0xac   :  { %1882 = vmatpush.bf16.msrb.mxu0 %v2345_v52  ;;  %v2313_v52 = vor.u32 %v3132_v37, %v2310_v39  ;;  %v2377_v54 = vor.u32 %v3148_v40, %v2374_v46  ;;  %v2798_v37 = vld [vmem:[%s5012_s1 + $0x5e8] sm:$0xf0]  ;;  %v2609_v39 = vor.u32 %v3206_v17, %v2606_v18  ;;  %v2673_v40 = vor.u32 %v3222_v19, %v2670_v24  ;;  %v3204_v46 = vld [vmem:[%s5012_s1 + $0x454] sm:$0xf]  ;;  %v3214_v17 = vld [vmem:[%s5012_s1 + $0x4a4] sm:$0xf] }
  0xad   :  { %1895 = vmatpush.bf16.msrb.mxu1 %v2409_v53  ;;  %v3130_v53 = vld [vmem:[%s5012_s1 + $0x204] sm:$0xf] }
  0xae   :  { %1908 = vmatpush.bf16.msrb.mxu2 %v2473_v4  ;;  %v2302_v4 = vld [vmem:[%s5012_s1 + $0x208] sm:$0xf0]  ;;  %v3230_v24 = vld [vmem:[%s5012_s1 + $0x524] sm:$0xf] }
  0xaf   :  { %1921 = vmatpush.bf16.msrb.mxu3 %v2537_v20  ;;  %v2366_v20 = vld [vmem:[%s5012_s1 + $0x288] sm:$0xf0]  ;;  %v2305_v0 = vor.u32 %v3130_v53, %v2302_v4  ;;  %v2726_v53 = vld [vmem:[%s5012_s1 + $0x558] sm:$0xf0] }
  0xb0   :  { %1883 = vmatpush.bf16.msrb.mxu0 %v2337_v60  ;;  %v3208_v60 = vld [vmem:[%s5012_s1 + $0x474] sm:$0xf]  ;;  %v2369_v7 = vor.u32 %v3146_v6, %v2366_v20  ;;  %v2790_v4 = vld [vmem:[%s5012_s1 + $0x5d8] sm:$0xf0]  ;;  %v3218_v20 = vld [vmem:[%s5012_s1 + $0x4c4] sm:$0xf] }
  0xb1   :  { %1896 = vmatpush.bf16.msrb.mxu1 %v2401_v61  ;;  %v2614_v61 = vld [vmem:[%s5012_s1 + $0x478] sm:$0xf0]  ;;  %v1670_v14 = vpop.f32.mrf.mxu3 }
  0xb2   :  { %1909 = vmatpush.bf16.msrb.mxu2 %v2465_v62  ;;  %v3224_v62 = vld [vmem:[%s5012_s1 + $0x4f4] sm:$0xf]  ;;  %v2617_v13 = vor.u32 %v3208_v60, %v2614_v61 }
  0xb3   :  { %1922 = vmatpush.bf16.msrb.mxu3 %v2529_v2  ;;  %v3240_v2 = vld [vmem:[%s5012_s1 + $0x574] sm:$0xf]  ;;  %v2681_v15 = vor.u32 %v3224_v62, %v2678_v1  ;;  %v2582_v1 = vld [vmem:[%s5012_s1 + $0x438] sm:$0xf0] }
  0xb4   :  { %1884 = vmatpush.bf16.msrb.mxu0 %v2329_v10  ;;  %v2806_v10 = vld [vmem:[%s5012_s1 + $0x5f8] sm:$0xf0] }
  0xb5   :  { %1897 = vmatpush.bf16.msrb.mxu1 %v2393_v11  ;;  %v1657_v11 = vpop.f32.mrf.mxu2  ;;  %v2809_v22 = vor.u32 %v3256_v9, %v2806_v10  ;;  %v2710_v9 = vld [vmem:[%s5012_s1 + $0x538] sm:$0xf0]  ;;  %v3248_v10 = vld [vmem:[%s5012_s1 + $0x5b4] sm:$0xf] }
  0xb6   :  { %1910 = vmatpush.bf16.msrb.mxu2 %v2457_v12  ;;  %v2497_v12 = vor.u32 %v3178_v58, %v2494_v59  ;;  %v3250_v58 = vld [vmem:[%s5012_s1 + $0x5c4] sm:$0xf]  ;;  %v2782_v59 = vld [vmem:[%s5012_s1 + $0x5c8] sm:$0xf0]  ;;  %v2774_v11 = vld [vmem:[%s5012_s1 + $0x5b8] sm:$0xf0] }
  0xb7   :  { %1923 = vmatpush.bf16.msrb.mxu3 %v2521_v16  ;;  %v2745_v16 = vor.u32 %v3240_v2, %v2742_v3  ;;  %v3216_v2 = vld [vmem:[%s5012_s1 + $0x4b4] sm:$0xf]  ;;  %v2785_v5 = vor.u32 %v3250_v58, %v2782_v59  ;;  %v2777_v19 = vor.u32 %v3248_v10, %v2774_v11  ;;  %v2622_v58 = vld [vmem:[%s5012_s1 + $0x488] sm:$0xf0]  ;;  %v3226_v59 = vld [vmem:[%s5012_s1 + $0x504] sm:$0xf] }
  0xb8   :  { %1885 = vmatpush.bf16.msrb.mxu0 %v2321_v27  ;;  %v3238_v27 = vld [vmem:[%s5012_s1 + $0x564] sm:$0xf]  ;;  %v2934_v10 = vld [vmem:[%s5012_s1 + $0x6f8] sm:$0xf0]  ;;  %v3304_v11 = vld [vmem:[%s5012_s1 + $0x774] sm:$0xf] }
  0xb9   :  { %1898 = vmatpush.bf16.msrb.mxu1 %v2385_v34  ;;  %v2734_v34 = vld [vmem:[%s5012_s1 + $0x568] sm:$0xf0] }
  0xba   :  { %1911 = vmatpush.bf16.msrb.mxu2 %v2449_v36  ;;  %v3254_v36 = vld [vmem:[%s5012_s1 + $0x5e4] sm:$0xf] }
  0xbb   :  { %1924 = vmatpush.bf16.msrb.mxu3 %v2513_v45  ;;  %v2737_v45 = vor.u32 %v3238_v27, %v2734_v34  ;;  %v2801_v50 = vor.u32 %v3254_v36, %v2798_v37  ;;  %v2702_v27 = vld [vmem:[%s5012_s1 + $0x528] sm:$0xf0]  ;;  %v3246_v36 = vld [vmem:[%s5012_s1 + $0x5a4] sm:$0xf] }
  0xbc   :  { %1886 = vmatpush.bf16.msrb.mxu0 %v2313_v52  ;;  %v3236_v52 = vld [vmem:[%s5012_s1 + $0x554] sm:$0xf]  ;;  %v2766_v37 = vld [vmem:[%s5012_s1 + $0x5a8] sm:$0xf0] }
  0xbd   :  { %1899 = vmatpush.bf16.msrb.mxu1 %v2377_v54  ;;  %v2601_v54 = vor.u32 %v3204_v46, %v2598_v47  ;;  %v2729_v6 = vor.u32 %v3236_v52, %v2726_v53  ;;  %v2705_v47 = vor.u32 %v3230_v24, %v2702_v27  ;;  %v2769_v53 = vor.u32 %v3246_v36, %v2766_v37  ;;  %v3270_v36 = vld [vmem:[%s5012_s1 + $0x664] sm:$0xf]  ;;  %v2862_v37 = vld [vmem:[%s5012_s1 + $0x668] sm:$0xf0] }
  0xbe   :  { %1912 = vmatpush.bf16.msrb.mxu2 %v2441_v55  ;;  %v2665_v55 = vor.u32 %v3220_v48, %v2662_v51  ;;  %v3196_v48 = vld [vmem:[%s5012_s1 + $0x414] sm:$0xf] }
  0xbf   :  { %1925 = vmatpush.bf16.msrb.mxu3 %v2505_v56  ;;  %v3234_v56 = vld [vmem:[%s5012_s1 + $0x544] sm:$0xf]  ;;  %v3212_v51 = vld [vmem:[%s5012_s1 + $0x494] sm:$0xf] }
  0xc0   :  { %1887 = vmatpush.bf16.msrb.mxu0 %v2305_v0  ;;  %v4678_v61 = vpop.f32.mrf.mxu0  ;;  %v2721_v63 = vor.u32 %v3234_v56, %v2718_v57  ;;  %v3200_v0 = vld [vmem:[%s5012_s1 + $0x434] sm:$0xf]  ;;  %v3210_v57 = vld [vmem:[%s5012_s1 + $0x484] sm:$0xf] }
  0xc1   :  { %1900 = vmatpush.bf16.msrb.mxu1 %v2369_v7  ;;  %v4689_v3 = vpop.f32.mrf.mxu1  ;;  %v2646_v7 = vld [vmem:[%s5012_s1 + $0x4b8] sm:$0xf0] }
  0xc2   :  { %1913 = vmatpush.bf16.msrb.mxu2 %v2433_v8  ;;  %v3232_v8 = vld [vmem:[%s5012_s1 + $0x534] sm:$0xf] }
  0xc3   :  { %1926 = vmatpush.bf16.msrb.mxu3 %v2497_v12  ;;  %1888 = vmatmul.bf16.vlgmr.msrb.gmra.mxu0 %v3800_v41  ;;  %v3202_v41 = vld [vmem:[%s5012_s1 + $0x444] sm:$0xf]  ;;  %v2585_v12 = vor.u32 %v3200_v0, %v2582_v1  ;;  %v2713_v14 = vor.u32 %v3232_v8, %v2710_v9  ;;  %v2750_v1 = vld [vmem:[%s5012_s1 + $0x588] sm:$0xf0]  ;;  %v3288_v8 = vld [vmem:[%s5012_s1 + $0x6f4] sm:$0xf] }
  0xc4   :  { %1932 = vmatpush.bf16.msra.mxu0 %v2617_v13  ;;  %1901 = vmatmul.bf16.vlgmr.msrb.gmra.mxu1 %v3804_v44  ;;  %v2654_v44 = vld [vmem:[%s5012_s1 + $0x4c8] sm:$0xf0]  ;;  %v2649_v13 = vor.u32 %v3216_v2, %v2646_v7  ;;  %v3242_v0 = vld [vmem:[%s5012_s1 + $0x584] sm:$0xf]  ;;  %v2870_v7 = vld [vmem:[%s5012_s1 + $0x678] sm:$0xf0]  ;;  %v2937_v24 = vor.u32 %v3288_v8, %v2934_v10 }
  0xc5   :  { %1945 = vmatpush.bf16.msra.mxu1 %v2681_v15  ;;  %1914 = vmatmul.bf16.vlgmr.msrb.gmra.mxu2 %v3792_v38  ;;  %v3252_v38 = vld [vmem:[%s5012_s1 + $0x5d4] sm:$0xf]  ;;  %v2657_v62 = vor.u32 %v3218_v20, %v2654_v44  ;;  %v3198_v15 = vld [vmem:[%s5012_s1 + $0x424] sm:$0xf]  ;;  %v2838_v10 = vld [vmem:[%s5012_s1 + $0x638] sm:$0xf0] }
  0xc6   :  { %1958 = vmatpush.bf16.msra.mxu2 %v2745_v16  ;;  %1927 = vmatmul.bf16.vlgmr.msrb.gmra.mxu3 %v3802_v42  ;;  %v2590_v42 = vld [vmem:[%s5012_s1 + $0x448] sm:$0xf0]  ;;  %v2793_v21 = vor.u32 %v3252_v38, %v2790_v4  ;;  %v2630_v38 = vld [vmem:[%s5012_s1 + $0x498] sm:$0xf0]  ;;  %v3228_v4 = vld [vmem:[%s5012_s1 + $0x514] sm:$0xf] }
  0xc7   :  { %1971 = vmatpush.bf16.msra.mxu3 %v2809_v22  ;;  %v2593_v60 = vor.u32 %v3202_v41, %v2590_v42  ;;  %v2574_v16 = vld [vmem:[%s5012_s1 + $0x428] sm:$0xf0]  ;;  %v3194_v20 = vld [vmem:[%s5012_s1 + $0x404] sm:$0xf]  ;;  %v2633_v44 = vor.u32 %v3212_v51, %v2630_v38  ;;  %v2865_v51 = vor.u32 %v3270_v36, %v2862_v37 }
  0xc8   :  { %1933 = vmatpush.bf16.msra.mxu0 %v2609_v39  ;;  %v4715_v18 = vpop.f32.mrf.mxu2  ;;  %v2638_v22 = vld [vmem:[%s5012_s1 + $0x4a8] sm:$0xf0]  ;;  %v4737_v39 = vld [vmem:[%s5014_s2] sm:$0x3]  ;;  %v3278_v37 = vld [vmem:[%s5012_s1 + $0x6a4] sm:$0xf] }
  0xc9   :  { %1946 = vmatpush.bf16.msra.mxu1 %v2673_v40  ;;  %v4726_v34 = vpop.f32.mrf.mxu3  ;;  %v2577_v40 = vor.u32 %v3198_v15, %v2574_v16  ;;  %v2641_v46 = vor.u32 %v3214_v17, %v2638_v22  ;;  %v1696_v52 = vpop.f32.mrf.mxu1  ;;  %v280_v41 = vperm.slane %v4737_v39, 0  ;;  %v3320_v15 = vld [vmem:[%s5012_s1 + $0x7f4] sm:$0xf]  ;;  %v3062_v16 = vld [vmem:[%s5012_s1 + $0x7f8] sm:$0xf0]  ;;  %v2753_v17 = vor.u32 %v3242_v0, %v2750_v1 }
  0xca   :  { %1959 = vmatpush.bf16.msra.mxu2 %v2737_v45  ;;  %v1683_v45 = vpop.f32.mrf.mxu0  ;;  %v3038_v0 = vld [vmem:[%s5012_s1 + $0x7c8] sm:$0xf0] }
  0xcb   :  { %1972 = vmatpush.bf16.msra.mxu3 %v2801_v50  ;;  %v2566_v50 = vld [vmem:[%s5012_s1 + $0x418] sm:$0xf0]  ;;  %v1630_v22 = vadd.f32 %v4522_v26, %v280_v41  ;;  %v3065_v45 = vor.u32 %v3320_v15, %v3062_v16  ;;  %v2926_v26 = vld [vmem:[%s5012_s1 + $0x6e8] sm:$0xf0]  ;;  %v3300_v41 = vld [vmem:[%s5012_s1 + $0x754] sm:$0xf] }
  0xcc   :  { %1934 = vmatpush.bf16.msra.mxu0 %v2601_v54  ;;  %v2694_v54 = vld [vmem:[%s5012_s1 + $0x518] sm:$0xf0]  ;;  %v2569_v42 = vor.u32 %v3196_v48, %v2566_v50  ;;  %v3318_v48 = vld [vmem:[%s5012_s1 + $0x7e4] sm:$0xf]  ;;  %v3054_v50 = vld [vmem:[%s5012_s1 + $0x7e8] sm:$0xf0] }
  0xcd   :  { %1947 = vmatpush.bf16.msra.mxu1 %v2665_v55  ;;  %v3244_v55 = vld [vmem:[%s5012_s1 + $0x594] sm:$0xf]  ;;  %v2697_v56 = vor.u32 %v3228_v4, %v2694_v54  ;;  %v1643_v52 = vadd.f32 %v4524_v32, %v1630_v22  ;;  %v2854_v54 = vld [vmem:[%s5012_s1 + $0x658] sm:$0xf0]  ;;  %v3057_v32 = vor.u32 %v3318_v48, %v3054_v50  ;;  %v2830_v36 = vld [vmem:[%s5012_s1 + $0x628] sm:$0xf0] }
  0xce   :  { %1960 = vmatpush.bf16.msra.mxu2 %v2729_v6  ;;  %v2758_v6 = vld [vmem:[%s5012_s1 + $0x598] sm:$0xf0]  ;;  %v3268_v4 = vld [vmem:[%s5012_s1 + $0x654] sm:$0xf]  ;;  %v3310_v48 = vld [vmem:[%s5012_s1 + $0x7a4] sm:$0xf] }
  0xcf   :  { %1973 = vmatpush.bf16.msra.mxu3 %v2793_v21  ;;  %v2558_v21 = vld [vmem:[%s5012_s1 + $0x408] sm:$0xf0]  ;;  %v3312_v15 = vld [vmem:[%s5012_s1 + $0x7b4] sm:$0xf]  ;;  %v3030_v16 = vld [vmem:[%s5012_s1 + $0x7b8] sm:$0xf0] }
  0xd0   :  { %1935 = vmatpush.bf16.msra.mxu0 %v2593_v60  ;;  %v1709_v60 = vpop.f32.mrf.mxu2  ;;  %v2561_v9 = vor.u32 %v3194_v20, %v2558_v21  ;;  %v3046_v20 = vld [vmem:[%s5012_s1 + $0x7d8] sm:$0xf0]  ;;  %v2857_v21 = vor.u32 %v3268_v4, %v2854_v54  ;;  %v3022_v50 = vld [vmem:[%s5012_s1 + $0x7a8] sm:$0xf0] }
  0xd1   :  { %1948 = vmatpush.bf16.msra.mxu1 %v2657_v62  ;;  %v2761_v62 = vor.u32 %v3244_v55, %v2758_v6  ;;  %v1722_v2 = vpop.f32.mrf.mxu3  ;;  %v3284_v55 = vld [vmem:[%s5012_s1 + $0x6d4] sm:$0xf]  ;;  %v2918_v6 = vld [vmem:[%s5012_s1 + $0x6d8] sm:$0xf0]  ;;  %v2974_v60 = vld [vmem:[%s5012_s1 + $0x748] sm:$0xf0] }
  0xd2   :  { %1961 = vmatpush.bf16.msra.mxu2 %v2721_v63  ;;  %v2686_v63 = vld [vmem:[%s5012_s1 + $0x508] sm:$0xf0] }
  0xd3   :  { %1974 = vmatpush.bf16.msra.mxu3 %v2785_v5  ;;  %v3272_v5 = vld [vmem:[%s5012_s1 + $0x674] sm:$0xf] }
  0xd4   :  { %1936 = vmatpush.bf16.msra.mxu0 %v2585_v12  ;;  %v2998_v12 = vld [vmem:[%s5012_s1 + $0x778] sm:$0xf0] }
  0xd5   :  { %1949 = vmatpush.bf16.msra.mxu1 %v2649_v13  ;;  %v2625_v13 = vor.u32 %v3210_v57, %v2622_v58  ;;  %v3001_v27 = vor.u32 %v3304_v11, %v2998_v12  ;;  %v2846_v57 = vld [vmem:[%s5012_s1 + $0x648] sm:$0xf0]  ;;  %v3280_v11 = vld [vmem:[%s5012_s1 + $0x6b4] sm:$0xf] }
  0xd6   :  { %1962 = vmatpush.bf16.msra.mxu2 %v2713_v14  ;;  %v2689_v14 = vor.u32 %v3226_v59, %v2686_v63  ;;  %v3298_v59 = vld [vmem:[%s5012_s1 + $0x744] sm:$0xf] }
  0xd7   :  { %1975 = vmatpush.bf16.msra.mxu3 %v2777_v19  ;;  %v2873_v19 = vor.u32 %v3272_v5, %v2870_v7  ;;  %v3314_v63 = vld [vmem:[%s5012_s1 + $0x7c4] sm:$0xf]  ;;  %v2977_v8 = vor.u32 %v3298_v59, %v2974_v60  ;;  %v2942_v60 = vld [vmem:[%s5012_s1 + $0x708] sm:$0xf0] }
  0xd8   :  { %1937 = vmatpush.bf16.msra.mxu0 %v2577_v40  ;;  %v3286_v40 = vld [vmem:[%s5012_s1 + $0x6e4] sm:$0xf]  ;;  %v3041_v12 = vor.u32 %v3314_v63, %v3038_v0 }
  0xd9   :  { %1950 = vmatpush.bf16.msra.mxu1 %v2641_v46  ;;  %v3302_v46 = vld [vmem:[%s5012_s1 + $0x764] sm:$0xf] }
  0xda   :  { %1963 = vmatpush.bf16.msra.mxu2 %v2705_v47  ;;  %v2990_v47 = vld [vmem:[%s5012_s1 + $0x768] sm:$0xf0]  ;;  %v3290_v59 = vld [vmem:[%s5012_s1 + $0x704] sm:$0xf] }
  0xdb   :  { %1976 = vmatpush.bf16.msra.mxu3 %v2769_v53  ;;  %v2929_v53 = vor.u32 %v3286_v40, %v2926_v26  ;;  %v2993_v38 = vor.u32 %v3302_v46, %v2990_v47  ;;  %v3033_v40 = vor.u32 %v3312_v15, %v3030_v16  ;;  %v3294_v26 = vld [vmem:[%s5012_s1 + $0x724] sm:$0xf]  ;;  %v2958_v46 = vld [vmem:[%s5012_s1 + $0x728] sm:$0xf0] }
  0xdc   :  { %1938 = vmatpush.bf16.msra.mxu0 %v2569_v42  ;;  %v2982_v42 = vld [vmem:[%s5012_s1 + $0x758] sm:$0xf0]  ;;  %v2961_v54 = vor.u32 %v3294_v26, %v2958_v46  ;;  %v3306_v0 = vld [vmem:[%s5012_s1 + $0x784] sm:$0xf] }
  0xdd   :  { %1951 = vmatpush.bf16.msra.mxu1 %v2633_v44  ;;  %v1656_v44 = vadd.f32 %v4535_v43, %v1643_v52  ;;  %v2910_v43 = vld [vmem:[%s5012_s1 + $0x6c8] sm:$0xf0] }
  0xde   :  { %1964 = vmatpush.bf16.msra.mxu2 %v2697_v56  ;;  %v2921_v56 = vor.u32 %v3284_v55, %v2918_v6  ;;  %v3260_v55 = vld [vmem:[%s5012_s1 + $0x614] sm:$0xf] }
  0xdf   :  { %1977 = vmatpush.bf16.msra.mxu3 %v2761_v62  ;;  %v1669_v5 = vadd.f32 %v4546_v49, %v1656_v44  ;;  %v2902_v49 = vld [vmem:[%s5012_s1 + $0x6b8] sm:$0xf0]  ;;  %v3276_v6 = vld [vmem:[%s5012_s1 + $0x694] sm:$0xf] }
  0xe0   :  { %1939 = vmatpush.bf16.msra.mxu0 %v2561_v9  ;;  %v4885_v62 = vpop.f32.mrf.mxu0  ;;  %v3264_v9 = vld [vmem:[%s5012_s1 + $0x634] sm:$0xf]  ;;  %v2905_v22 = vor.u32 %v3280_v11, %v2902_v49 }
  0xe1   :  { %1952 = vmatpush.bf16.msra.mxu1 %v2625_v13  ;;  %v4893_v2 = vpop.f32.mrf.mxu1  ;;  %v3296_v13 = vld [vmem:[%s5012_s1 + $0x734] sm:$0xf] }
  0xe2   :  { %1965 = vmatpush.bf16.msra.mxu2 %v2689_v14  ;;  %v2966_v14 = vld [vmem:[%s5012_s1 + $0x738] sm:$0xf0] }
  0xe3   :  { %1978 = vmatpush.bf16.msra.mxu3 %v2753_v17  ;;  %1940 = vmatmul.bf16.vlgmr.msra.gmra.mxu0 %v3993_v25  ;;  %v3316_v25 = vld [vmem:[%s5012_s1 + $0x7d4] sm:$0xf]  ;;  %v2841_v17 = vor.u32 %v3264_v9, %v2838_v10  ;;  %v2945_v10 = vor.u32 %v3290_v59, %v2942_v60 }
  0xe4   :  { %1984 = vmatpush.bf16.msrb.mxu0 %v2873_v19  ;;  %1953 = vmatmul.bf16.vlgmr.msra.gmra.mxu1 %v4006_v30  ;;  %v3266_v30 = vld [vmem:[%s5012_s1 + $0x644] sm:$0xf]  ;;  %v3049_v58 = vor.u32 %v3316_v25, %v3046_v20  ;;  %v1682_v19 = vadd.f32 %v4678_v61, %v1669_v5  ;;  %v2894_v61 = vld [vmem:[%s5012_s1 + $0x6a8] sm:$0xf0]  ;;  %v2950_v25 = vld [vmem:[%s5012_s1 + $0x718] sm:$0xf0] }
  0xe5   :  { %1997 = vmatpush.bf16.msrb.mxu1 %v2937_v24  ;;  %1966 = vmatmul.bf16.vlgmr.msra.gmra.mxu2 %v4004_v29  ;;  %v2985_v29 = vor.u32 %v3300_v41, %v2982_v42  ;;  %v2849_v1 = vor.u32 %v3266_v30, %v2846_v57  ;;  %v2969_v24 = vor.u32 %v3296_v13, %v2966_v14  ;;  %v3292_v42 = vld [vmem:[%s5012_s1 + $0x714] sm:$0xf]  ;;  %v3258_v57 = vld [vmem:[%s5012_s1 + $0x604] sm:$0xf] }
  0xe6   :  { %2010 = vmatpush.bf16.msrb.mxu2 %v3001_v27  ;;  %1979 = vmatmul.bf16.vlgmr.msra.gmra.mxu3 %v4014_v33  ;;  %v3282_v33 = vld [vmem:[%s5012_s1 + $0x6c4] sm:$0xf]  ;;  %v2897_v4 = vor.u32 %v3278_v37, %v2894_v61  ;;  %v3025_v41 = vor.u32 %v3310_v48, %v3022_v50  ;;  %v3308_v20 = vld [vmem:[%s5012_s1 + $0x794] sm:$0xf]  ;;  %v2953_v30 = vor.u32 %v3292_v42, %v2950_v25 }
  0xe7   :  { %2023 = vmatpush.bf16.msrb.mxu3 %v3065_v45  ;;  %v2913_v7 = vor.u32 %v3282_v33, %v2910_v43  ;;  %v3262_v27 = vld [vmem:[%s5012_s1 + $0x624] sm:$0xf]  ;;  %v2814_v33 = vld [vmem:[%s5012_s1 + $0x608] sm:$0xf0] }
  0xe8   :  { %1985 = vmatpush.bf16.msrb.mxu0 %v2865_v51  ;;  %v4930_v45 = vpop.f32.mrf.mxu2  ;;  %v1735_v51 = vpop.f32.mrf.mxu0  ;;  %v2833_v52 = vor.u32 %v3262_v27, %v2830_v36 }
  0xe9   :  { %1998 = vmatpush.bf16.msrb.mxu1 %v2929_v53  ;;  %v1772_v47 = vpop.f32.mrf.mxu3  ;;  %v1748_v53 = vpop.f32.mrf.mxu1 }
  0xea   :  { %2011 = vmatpush.bf16.msrb.mxu2 %v2993_v38  ;;  %v1695_v38 = vadd.f32 %v4689_v3, %v1682_v19  ;;  %v2886_v3 = vld [vmem:[%s5012_s1 + $0x698] sm:$0xf0] }
  0xeb   :  { %2024 = vmatpush.bf16.msrb.mxu3 %v3057_v32  ;;  %v2822_v32 = vld [vmem:[%s5012_s1 + $0x618] sm:$0xf0] }
  0xec   :  { %1986 = vmatpush.bf16.msrb.mxu0 %v2857_v21  ;;  %v3014_v21 = vld [vmem:[%s5012_s1 + $0x798] sm:$0xf0]  ;;  %v2825_v44 = vor.u32 %v3260_v55, %v2822_v32 }
  0xed   :  { %1999 = vmatpush.bf16.msrb.mxu1 %v2921_v56  ;;  %v1708_v56 = vadd.f32 %v4715_v18, %v1695_v38  ;;  %v3017_v43 = vor.u32 %v3308_v20, %v3014_v21  ;;  %v2878_v18 = vld [vmem:[%s5012_s1 + $0x688] sm:$0xf0] }
  0xee   :  { %2012 = vmatpush.bf16.msrb.mxu2 %v2985_v29  ;;  %v2889_v29 = vor.u32 %v3276_v6, %v2886_v3 }
  0xef   :  { %2025 = vmatpush.bf16.msrb.mxu3 %v3049_v58  ;;  %v3274_v58 = vld [vmem:[%s5012_s1 + $0x684] sm:$0xf] }
  0xf0   :  { %1987 = vmatpush.bf16.msrb.mxu0 %v2849_v1  ;;  %v1761_v63 = vpop.f32.mrf.mxu2  ;;  %v3006_v1 = vld [vmem:[%s5012_s1 + $0x788] sm:$0xf0]  ;;  %v2881_v9 = vor.u32 %v3274_v58, %v2878_v18 }
  0xf1   :  { %2000 = vmatpush.bf16.msrb.mxu1 %v2913_v7  ;;  %v1774_v5 = vpop.f32.mrf.mxu3  ;;  %v2817_v7 = vor.u32 %v3258_v57, %v2814_v33  ;;  %v3009_v11 = vor.u32 %v3306_v0, %v3006_v1 }
  0xf2   :  { %2013 = vmatpush.bf16.msrb.mxu2 %v2977_v8  ;;  %v1721_v8 = vadd.f32 %v4726_v34, %v1708_v56 }
  0xf3   :  { %2026 = vmatpush.bf16.msrb.mxu3 %v3041_v12 }
  0xf4   :  { %1988 = vmatpush.bf16.msrb.mxu0 %v2841_v17  ;;  %v1734_v12 = vadd.f32 %v4885_v62, %v1721_v8 }
  0xf5   :  { %2001 = vmatpush.bf16.msrb.mxu1 %v2905_v22 }
  0xf6   :  { %2014 = vmatpush.bf16.msrb.mxu2 %v2969_v24  ;;  %v1747_v49 = vadd.f32 %v4893_v2, %v1734_v12 }
  0xf7   :  { %2027 = vmatpush.bf16.msrb.mxu3 %v3033_v40 }
  0xf8   :  { %1989 = vmatpush.bf16.msrb.mxu0 %v2833_v52  ;;  %v1760_v34 = vadd.f32 %v4930_v45, %v1747_v49 }
  0xf9   :  { %2002 = vmatpush.bf16.msrb.mxu1 %v2897_v4 }
  0xfa   :  { %2015 = vmatpush.bf16.msrb.mxu2 %v2961_v54  ;;  %v1773_v13 = vadd.f32 %v1772_v47, %v1760_v34 }
  0xfb   :  { %2028 = vmatpush.bf16.msrb.mxu3 %v3025_v41 }
  0xfc   :  { %1990 = vmatpush.bf16.msrb.mxu0 %v2825_v44 }
  0xfd   :  { %2003 = vmatpush.bf16.msrb.mxu1 %v2889_v29 }
  0xfe   :  { %2016 = vmatpush.bf16.msrb.mxu2 %v2953_v30 }
  0xff   :  { %2029 = vmatpush.bf16.msrb.mxu3 %v3017_v43 }
 0x100   :  { %1991 = vmatpush.bf16.msrb.mxu0 %v2817_v7  ;;  %v1785_v14 = vpop.f32.mrf.mxu0 }
 0x101   :  { %2004 = vmatpush.bf16.msrb.mxu1 %v2881_v9  ;;  %v1798_v15 = vpop.f32.mrf.mxu1  ;;  %v1786_v62 = vadd.f32 %v1785_v14, %v1773_v13 }
 0x102   :  { %2017 = vmatpush.bf16.msrb.mxu2 %v2945_v10 }
 0x103   :  { %2030 = vmatpush.bf16.msrb.mxu3 %v3009_v11  ;;  %1992 = vmatmul.bf16.vlgmr.msrb.gmra.mxu0 %v4203_v23  ;;  %v1799_v16 = vadd.f32 %v1798_v15, %v1786_v62 }
 0x104   :  { %2005 = vmatmul.bf16.vlgmr.msrb.gmra.mxu1 %v4216_v31  ;;  %v281_v31 = vperm.slane %v4737_v39, 1 }
 0x105   :  { %2018 = vmatmul.bf16.vlgmr.msrb.gmra.mxu2 %v4214_v28 }
 0x106   :  { %2031 = vmatmul.bf16.vlgmr.msrb.gmra.mxu3 %v4224_v35 }
 0x108   :  { %v1811_v17 = vpop.f32.mrf.mxu2  ;;  %v1787_v24 = vpop.f32.mrf.mxu0 }
 0x109   :  { %v1812_v19 = vadd.f32 %v1811_v17, %v1799_v16  ;;  %v1824_v22 = vpop.f32.mrf.mxu3  ;;  %v1800_v2 = vpop.f32.mrf.mxu1 }
 0x10b   :  { %v1825_v27 = vadd.f32 %v1824_v22, %v1812_v19 }
 0x10d   :  { %2036 = vst [vmem:[%s5015_s3] sm:$0xff] %v1825_v27 }
 0x110   :  { %v1813_v23 = vpop.f32.mrf.mxu2 }
 0x111   :  { %v1826_v28 = vpop.f32.mrf.mxu3 }
 0x120   :  { %v1837_v35 = vpop.f32.mrf.mxu0 }
 0x121   :  { %v1838_v36 = vadd.f32 %v1837_v35, %v281_v31  ;;  %v1850_v37 = vpop.f32.mrf.mxu1 }
 0x123   :  { %v1851_v40 = vadd.f32 %v1850_v37, %v1838_v36 }
 0x128   :  { %v1863_v45 = vpop.f32.mrf.mxu2  ;;  %v1839_v47 = vpop.f32.mrf.mxu0 }
 0x129   :  { %v1864_v61 = vadd.f32 %v1863_v45, %v1851_v40  ;;  %v1876_v26 = vpop.f32.mrf.mxu3  ;;  %v1852_v48 = vpop.f32.mrf.mxu1 }
 0x12b   :  { %v1877_v46 = vadd.f32 %v1876_v26, %v1864_v61 }
 0x130   :  { %v1865_v50 = vpop.f32.mrf.mxu2 }
 0x131   :  { %v1878_v51 = vpop.f32.mrf.mxu3 }
 0x140   :  { %v1889_v52 = vpop.f32.mrf.mxu0 }
 0x141   :  { %v1902_v53 = vpop.f32.mrf.mxu1  ;;  %v1890_v3 = vadd.f32 %v1889_v52, %v1877_v46 }
 0x143   :  { %v1903_v21 = vadd.f32 %v1902_v53, %v1890_v3 }
 0x148   :  { %v1915_v38 = vpop.f32.mrf.mxu2  ;;  %v1891_v54 = vpop.f32.mrf.mxu0 }
 0x149   :  { %v1928_v4 = vpop.f32.mrf.mxu3  ;;  %v1904_v55 = vpop.f32.mrf.mxu1  ;;  %v1916_v56 = vadd.f32 %v1915_v38, %v1903_v21 }
 0x14b   :  { %v1929_v57 = vadd.f32 %v1928_v4, %v1916_v56 }
 0x150   :  { %v1917_v32 = vpop.f32.mrf.mxu2 }
 0x151   :  { %v1930_v39 = vpop.f32.mrf.mxu3 }
 0x160   :  { %v1941_v6 = vpop.f32.mrf.mxu0 }
 0x161   :  { %v1954_v41 = vpop.f32.mrf.mxu1  ;;  %v1942_v33 = vadd.f32 %v1941_v6, %v1929_v57 }
 0x163   :  { %v1955_v58 = vadd.f32 %v1954_v41, %v1942_v33 }
 0x168   :  { %v1967_v42 = vpop.f32.mrf.mxu2  ;;  %v1943_v20 = vpop.f32.mrf.mxu0 }
 0x169   :  { %v1980_v25 = vpop.f32.mrf.mxu3  ;;  %v1956_v44 = vpop.f32.mrf.mxu1  ;;  %v1968_v43 = vadd.f32 %v1967_v42, %v1955_v58 }
 0x16b   :  { %v1981_v18 = vadd.f32 %v1980_v25, %v1968_v43 }
 0x170   :  { %v1969_v29 = vpop.f32.mrf.mxu2 }
 0x171   :  { %v1982_v30 = vpop.f32.mrf.mxu3 }
 0x180   :  { %v1993_v59 = vpop.f32.mrf.mxu0 }
 0x181   :  { %v2006_v60 = vpop.f32.mrf.mxu1  ;;  %v1994_v63 = vadd.f32 %v1993_v59, %v1981_v18 }
 0x183   :  { %v2007_v0 = vadd.f32 %v2006_v60, %v1994_v63 }
 0x188   :  { %v2019_v1 = vpop.f32.mrf.mxu2  ;;  %v1995_v8 = vpop.f32.mrf.mxu0 }
 0x189   :  { %v2020_v5 = vadd.f32 %v2019_v1, %v2007_v0  ;;  %v2032_v7 = vpop.f32.mrf.mxu3  ;;  %v2008_v9 = vpop.f32.mrf.mxu1 }
 0x18b   :  { %v2033_v10 = vadd.f32 %v2032_v7, %v2020_v5 }
 0x18d   :  { %2037 = vst [vmem:[%s5015_s3 + $0x8] sm:$0xff] %v2033_v10 }
 0x190   :  { %v2021_v11 = vpop.f32.mrf.mxu2 }
 0x191   :  { %v2034_v12 = vpop.f32.mrf.mxu3 }

</bundles_post_ra>
